<compile_context>
chip_gen: v7x
topology: tpu7x:2x2x1
jax: 0.10.0
libtpu: 0.0.40
codegen_flags: <defaults>
</compile_context>

<pallas_src>
import math
import jax
import jax.numpy as jnp
from jax import lax
from jax.experimental import pallas as pl
from jax.experimental.pallas import tpu as pltpu

NHEAD = 10  # TransAm hard-codes nhead=10


def _layernorm(x, gamma, beta, eps=1e-5):
    mu = jnp.mean(x, axis=-1, keepdims=True)
    var = jnp.mean((x - mu) ** 2, axis=-1, keepdims=True)
    return (x - mu) * lax.rsqrt(var + eps) * gamma + beta


def transam_kernel(x_ref, pe_ref,
                   wqkv_ref, bqkv_ref, wo_ref, bo_ref,
                   ln1_g_ref, ln1_b_ref, ln2_g_ref, ln2_b_ref,
                   w1_ref, b1_ref, w2_ref, b2_ref,
                   o_ref):
    S, D = x_ref.shape
    H = NHEAD
    hd = D // H
    scale = 1.0 / math.sqrt(hd)

    # positional encoding (PositionalEncoding.forward)
    x = x_ref[...] + pe_ref[...]                                  # (S, D)

    # --- multi-head self-attention, causal -------------------------------
    # Fused per-head Q/K/V projection: wqkv_ref is (3H, D, hd) (pre-split /
    # pre-transposed in the wrapper).  One batched matmul, no `.T`, no lane
    # slicing, no concat.
    G = 3 * H
    xb = jnp.broadcast_to(x[None], (G, S, D))
    qkv = jnp.einsum('gsd,gde->gse', xb, wqkv_ref[...],
                     preferred_element_type=jnp.float32) + bqkv_ref[...]
    qh = qkv[0:H]                                                 # (H, S, hd)
    kh = qkv[H:2 * H]
    vh = qkv[2 * H:3 * H]

    # scores + causal masking (no dense -inf mask materialized)
    s = jnp.einsum('hqe,hke->hqk', qh, kh,
                   preferred_element_type=jnp.float32) * scale    # (H, S, S)
    row = lax.broadcasted_iota(jnp.int32, (H, S, S), 1)
    col = lax.broadcasted_iota(jnp.int32, (H, S, S), 2)
    s = jnp.where(col <= row, s, jnp.float32(-1e30))

    m = jnp.max(s, axis=-1, keepdims=True)
    e = jnp.exp(s - m)
    l = jnp.sum(e, axis=-1, keepdims=True)
    p = e * pl.reciprocal(l, approx=True)                         # EUP divide

    oh = jnp.einsum('hqk,hke->hqe', p, vh,
                    preferred_element_type=jnp.float32)           # (H, S, hd)
    # output projection folded per head (wo_ref: (H, hd, D)), then summed
    attn = jnp.sum(jnp.einsum('hse,hed->hsd', oh, wo_ref[...],
                              preferred_element_type=jnp.float32),
                   axis=0) + bo_ref[...]                          # (S, D)

    # residual + LayerNorm (post-norm); dropout = identity in eval
    x1 = _layernorm(x + attn, ln1_g_ref[...], ln1_b_ref[...])

    # --- feed-forward (weights pre-transposed: (D, dff), (dff, D)) --------
    h1 = jnp.maximum(
        jnp.dot(x1, w1_ref[...], preferred_element_type=jnp.float32)
        + b1_ref[...], 0.0)
    h2 = jnp.dot(h1, w2_ref[...],
                 preferred_element_type=jnp.float32) + b2_ref[...]
    x2 = _layernorm(x1 + h2, ln2_g_ref[...], ln2_b_ref[...])

    # lane-dense (S, D) output; the 1-wide decoder matmul runs in the wrapper
    o_ref[...] = x2


def make_positional_encoding(seq_len, d_model):
    position = jnp.arange(seq_len, dtype=jnp.float32)[:, None]
    div_term = jnp.exp(jnp.arange(0, d_model, 2, dtype=jnp.float32)
                       * (-math.log(10000.0) / d_model))
    pe = jnp.zeros((seq_len, d_model), jnp.float32)
    pe = pe.at[:, 0::2].set(jnp.sin(position * div_term))
    pe = pe.at[:, 1::2].set(jnp.cos(position * div_term))
    return pe


def init_params(key, d_model, d_ff=2048):
    ks = jax.random.split(key, 7)
    u = lambda k, shape: jax.random.uniform(k, shape, jnp.float32, -0.1, 0.1)
    z = lambda shape: jnp.zeros(shape, jnp.float32)
    return dict(
        wq=u(ks[0], (d_model, d_model)), bq=z((1, d_model)),
        wk=u(ks[1], (d_model, d_model)), bk=z((1, d_model)),
        wv=u(ks[2], (d_model, d_model)), bv=z((1, d_model)),
        wo=u(ks[3], (d_model, d_model)), bo=z((1, d_model)),
        ln1_g=jnp.ones((1, d_model), jnp.float32), ln1_b=z((1, d_model)),
        ln2_g=jnp.ones((1, d_model), jnp.float32), ln2_b=z((1, d_model)),
        w1=u(ks[4], (d_ff, d_model)), b1=z((1, d_ff)),
        w2=u(ks[5], (d_model, d_ff)), b2=z((1, d_model)),
        dec_w=u(ks[6], (1, d_model)), dec_b=z((1, 1)),
    )


def _prepare_weights(params, d_model):
    """One-time XLA-side layout prep: transpose + per-head split + QKV fuse."""
    hd = d_model // NHEAD

    def split_in(w, b):
        wt = w.T                                                   # (D_in, D_out)
        wh = wt.reshape(d_model, NHEAD, hd).transpose(1, 0, 2)     # (H, D, hd)
        bh = b.reshape(1, NHEAD, hd).transpose(1, 0, 2)            # (H, 1, hd)
        return wh, bh

    wq_h, bq_h = split_in(params["wq"], params["bq"])
    wk_h, bk_h = split_in(params["wk"], params["bk"])
    wv_h, bv_h = split_in(params["wv"], params["bv"])
    wqkv = jnp.concatenate([wq_h, wk_h, wv_h], axis=0)             # (3H, D, hd)
    bqkv = jnp.concatenate([bq_h, bk_h, bv_h], axis=0)             # (3H, 1, hd)
    wo_h = params["wo"].T.reshape(NHEAD, hd, d_model)              # (H, hd, D)
    # TODO(synk): on v6e/v7x, w1/w2 could be passed as bf16 (f32 accumulation)
    # to halve the dominant weight DMA; kept f32 here for bit-tight validation.
    return [wqkv, bqkv, wo_h, params["bo"],
            params["ln1_g"], params["ln1_b"],
            params["ln2_g"], params["ln2_b"],
            params["w1"].T, params["b1"],                          # (D, dff)
            params["w2"].T, params["b2"]]                          # (dff, D)


def transam_forward(src, params):
    """src: (seq, batch, d_model), PyTorch seq-first convention.
    Returns exactly `output[:, -1, :]` of the original module, shape (S, 1)."""
    S, B, D = src.shape
    pe = make_positional_encoding(S, D)

    # `output[:, -1, :]` selects batch index B-1; the encoder treats batch
    # elements independently, so only that sequence needs to be computed.
    x_last = src[:, B - 1, :]                                      # (S, D)

    inputs = [x_last, pe] + _prepare_weights(params, D)

    def full_spec(a):
        nd = a.ndim
        return pl.BlockSpec(a.shape, lambda i, _nd=nd: (0,) * _nd)

    x2 = pl.pallas_call(
        transam_kernel,
        out_shape=jax.ShapeDtypeStruct((S, D), jnp.float32),
        grid=(1,),
        in_specs=[full_spec(a) for a in inputs],
        out_specs=pl.BlockSpec((S, D), lambda i: (0, 0)),
        compiler_params=pltpu.CompilerParams(
            dimension_semantics=("arbitrary",)),
    )(*inputs)

    # decoder: Linear(D, 1), done lane-dense-friendly in XLA
    out = x2 @ params["dec_w"].T + params["dec_b"]                 # (S, 1)
    return out


def transam_reference(src, params):
    """Pure-JAX reference of the full forward (all batches), for validation."""
    S, B, D = src.shape
    hd = D // NHEAD
    pe = make_positional_encoding(S, D)
    x = jnp.transpose(src, (1, 0, 2)) + pe[None]                   # (B, S, D)
    mask = jnp.where(jnp.arange(S)[None, :] <= jnp.arange(S)[:, None],
                     0.0, -jnp.inf)
    q = x @ params["wq"].T + params["bq"]
    k = x @ params["wk"].T + params["bk"]
    v = x @ params["wv"].T + params["bv"]
    qh = q.reshape(B, S, NHEAD, hd).transpose(0, 2, 1, 3)
    kh = k.reshape(B, S, NHEAD, hd).transpose(0, 2, 1, 3)
    vh = v.reshape(B, S, NHEAD, hd).transpose(0, 2, 1, 3)
    s = qh @ jnp.swapaxes(kh, -1, -2) / math.sqrt(hd) + mask
    p = jax.nn.softmax(s, axis=-1)
    a = (p @ vh).transpose(0, 2, 1, 3).reshape(B, S, D)
    a = a @ params["wo"].T + params["bo"]

    def ln(y, g, b):
        mu = y.mean(-1, keepdims=True)
        var = ((y - mu) ** 2).mean(-1, keepdims=True)
        return (y - mu) / jnp.sqrt(var + 1e-5) * g + b

    x1 = ln(x + a, params["ln1_g"], params["ln1_b"])
    h = jax.nn.relu(x1 @ params["w1"].T + params["b1"])
    x2 = ln(x1 + h @ params["w2"].T + params["b2"],
            params["ln2_g"], params["ln2_b"])
    out = x2 @ params["dec_w"].T + params["dec_b"]                 # (B, S, 1)
    out = jnp.transpose(out, (1, 0, 2))                            # (S, B, 1)
    return out[:, -1, :]


if __name__ == "__main__":
    # nhead=10 => d_model % 10 == 0
    S, B, D = 8, 2, 40
    key = jax.random.PRNGKey(0)
    k_src, k_par = jax.random.split(key)
    src = jax.random.normal(k_src, (S, B, D), jnp.float32)         # (seq, batch, d_model)
    params = init_params(k_par, D)

    out = transam_forward(src, params)
    out = jax.block_until_ready(out)

    ref = transam_reference(src, params)
    assert out.shape == (S, 1), out.shape
    assert jnp.allclose(out, ref, atol=1e-2, rtol=1e-2), \
        float(jnp.max(jnp.abs(out - ref)))
    print("KERNEL_OK")
</pallas_src>

<mosaic_0001>
module attributes {stable_mosaic.version = 11 : i64} {
  func.func @transam_kernel(%arg0: i32, %arg1: memref<8x40xf32, #tpu.memory_space<vmem>>, %arg2: memref<8x40xf32, #tpu.memory_space<vmem>>, %arg3: memref<30x40x4xf32, #tpu.memory_space<vmem>>, %arg4: memref<30x1x4xf32, #tpu.memory_space<vmem>>, %arg5: memref<10x4x40xf32, #tpu.memory_space<vmem>>, %arg6: memref<1x40xf32, #tpu.memory_space<vmem>>, %arg7: memref<1x40xf32, #tpu.memory_space<vmem>>, %arg8: memref<1x40xf32, #tpu.memory_space<vmem>>, %arg9: memref<1x40xf32, #tpu.memory_space<vmem>>, %arg10: memref<1x40xf32, #tpu.memory_space<vmem>>, %arg11: memref<40x2048xf32, #tpu.memory_space<vmem>>, %arg12: memref<1x2048xf32, #tpu.memory_space<vmem>>, %arg13: memref<2048x40xf32, #tpu.memory_space<vmem>>, %arg14: memref<1x40xf32, #tpu.memory_space<vmem>>, %arg15: memref<8x40xf32, #tpu.memory_space<vmem>>) attributes {dimension_semantics = [#tpu.dimension_semantics<arbitrary>], iteration_bounds = array<i64: 1>, scalar_prefetch = 0 : i64, scratch_operands = 0 : i64, tpu.core_type = #tpu.core_type<tc>, window_params = [{pipeline_mode = #tpu.pipeline_mode<synchronous>, transform_indices = @transform_0, window_bounds = array<i64: 8, 40>}, {pipeline_mode = #tpu.pipeline_mode<synchronous>, transform_indices = @transform_1, window_bounds = array<i64: 8, 40>}, {pipeline_mode = #tpu.pipeline_mode<synchronous>, transform_indices = @transform_2, window_bounds = array<i64: 30, 40, 4>}, {pipeline_mode = #tpu.pipeline_mode<synchronous>, transform_indices = @transform_3, window_bounds = array<i64: 30, 1, 4>}, {pipeline_mode = #tpu.pipeline_mode<synchronous>, transform_indices = @transform_4, window_bounds = array<i64: 10, 4, 40>}, {pipeline_mode = #tpu.pipeline_mode<synchronous>, transform_indices = @transform_5, window_bounds = array<i64: 1, 40>}, {pipeline_mode = #tpu.pipeline_mode<synchronous>, transform_indices = @transform_6, window_bounds = array<i64: 1, 40>}, {pipeline_mode = #tpu.pipeline_mode<synchronous>, transform_indices = @transform_7, window_bounds = array<i64: 1, 40>}, {pipeline_mode = #tpu.pipeline_mode<synchronous>, transform_indices = @transform_8, window_bounds = array<i64: 1, 40>}, {pipeline_mode = #tpu.pipeline_mode<synchronous>, transform_indices = @transform_9, window_bounds = array<i64: 1, 40>}, {pipeline_mode = #tpu.pipeline_mode<synchronous>, transform_indices = @transform_10, window_bounds = array<i64: 40, 2048>}, {pipeline_mode = #tpu.pipeline_mode<synchronous>, transform_indices = @transform_11, window_bounds = array<i64: 1, 2048>}, {pipeline_mode = #tpu.pipeline_mode<synchronous>, transform_indices = @transform_12, window_bounds = array<i64: 2048, 40>}, {pipeline_mode = #tpu.pipeline_mode<synchronous>, transform_indices = @transform_13, window_bounds = array<i64: 1, 40>}, {pipeline_mode = #tpu.pipeline_mode<synchronous>, transform_indices = @transform_14, window_bounds = array<i64: 8, 40>}]} {
    %c0 = arith.constant 0 : index
    %c0_0 = arith.constant 0 : index
    %0 = vector.load %arg1[%c0, %c0_0] : memref<8x40xf32, #tpu.memory_space<vmem>>, vector<8x40xf32>
    %c0_1 = arith.constant 0 : index
    %c0_2 = arith.constant 0 : index
    %1 = vector.load %arg2[%c0_1, %c0_2] : memref<8x40xf32, #tpu.memory_space<vmem>>, vector<8x40xf32>
    %2 = arith.addf %0, %1 : vector<8x40xf32>
    %3 = vector.shape_cast %2 : vector<8x40xf32> to vector<1x8x40xf32>
    %4 = vector.shape_cast %3 : vector<1x8x40xf32> to vector<1x8x40xf32>
    %5 = vector.broadcast %4 : vector<1x8x40xf32> to vector<30x8x40xf32>
    %c0_3 = arith.constant 0 : index
    %c0_4 = arith.constant 0 : index
    %c0_5 = arith.constant 0 : index
    %6 = vector.load %arg3[%c0_3, %c0_4, %c0_5] : memref<30x40x4xf32, #tpu.memory_space<vmem>>, vector<30x40x4xf32>
    "tpu.trace_start"() <{level = 10 : i32, message = "gsd,gde->gse"}> : () -> ()
    %cst = arith.constant dense<0.000000e+00> : vector<30x8x4xf32>
    %7 = tpu.matmul %5, %6, %cst {dimension_numbers = #tpu.dot_dimension_numbers<[2], [1], [1], [2], [0, 0, 0, 1, 1, 2], [0], [0]>} : vector<30x8x40xf32>, vector<30x40x4xf32>, vector<30x8x4xf32> -> vector<30x8x4xf32>
    "tpu.trace_stop"() : () -> ()
    %c0_6 = arith.constant 0 : index
    %c0_7 = arith.constant 0 : index
    %c0_8 = arith.constant 0 : index
    %8 = vector.load %arg4[%c0_6, %c0_7, %c0_8] : memref<30x1x4xf32, #tpu.memory_space<vmem>>, vector<30x1x4xf32>
    %9 = vector.broadcast %8 : vector<30x1x4xf32> to vector<30x8x4xf32>
    %10 = arith.addf %7, %9 : vector<30x8x4xf32>
    %11 = vector.extract_strided_slice %10 {offsets = [0, 0, 0], sizes = [10, 8, 4], strides = [1, 1, 1]} : vector<30x8x4xf32> to vector<10x8x4xf32>
    %12 = vector.extract_strided_slice %10 {offsets = [10, 0, 0], sizes = [10, 8, 4], strides = [1, 1, 1]} : vector<30x8x4xf32> to vector<10x8x4xf32>
    %13 = vector.extract_strided_slice %10 {offsets = [20, 0, 0], sizes = [10, 8, 4], strides = [1, 1, 1]} : vector<30x8x4xf32> to vector<10x8x4xf32>
    "tpu.trace_start"() <{level = 10 : i32, message = "hqe,hke->hqk"}> : () -> ()
    %cst_9 = arith.constant dense<0.000000e+00> : vector<10x8x8xf32>
    %14 = tpu.matmul %11, %12, %cst_9 {dimension_numbers = #tpu.dot_dimension_numbers<[2], [2], [1], [1], [0, 0, 0, 1, 1, 1], [0], [0]>} : vector<10x8x4xf32>, vector<10x8x4xf32>, vector<10x8x8xf32> -> vector<10x8x8xf32>
    "tpu.trace_stop"() : () -> ()
    %cst_10 = arith.constant 5.000000e-01 : f32
    %15 = vector.broadcast %cst_10 : f32 to vector<10x8x8xf32>
    %16 = arith.mulf %14, %15 : vector<10x8x8xf32>
    %17 = tpu.iota {dimensions = array<i32: 1>} : vector<10x8x8xi32>
    %18 = tpu.iota {dimensions = array<i32: 2>} : vector<10x8x8xi32>
    %19 = arith.cmpi sle, %18, %17 : vector<10x8x8xi32>
    %cst_11 = arith.constant -1.000000e+30 : f32
    %20 = vector.broadcast %cst_11 : f32 to vector<10x8x8xf32>
    %21 = arith.select %19, %16, %20 : vector<10x8x8xi1>, vector<10x8x8xf32>
    %cst_12 = arith.constant dense<0xFF800000> : vector<10x8xf32>
    %22 = vector.multi_reduction <maximumf>, %21, %cst_12 [2] : vector<10x8x8xf32> to vector<10x8xf32>
    %23 = vector.shape_cast %22 : vector<10x8xf32> to vector<10x8x1xf32>
    %24 = vector.broadcast %23 : vector<10x8x1xf32> to vector<10x8x8xf32>
    %25 = arith.subf %21, %24 : vector<10x8x8xf32>
    %26 = math.exp %25 : vector<10x8x8xf32>
    %cst_13 = arith.constant dense<0.000000e+00> : vector<10x8xf32>
    %27 = vector.multi_reduction <add>, %26, %cst_13 [2] : vector<10x8x8xf32> to vector<10x8xf32>
    %28 = vector.shape_cast %27 : vector<10x8xf32> to vector<10x8x1xf32>
    %29 = tpu.reciprocal %28 {approx = true} : vector<10x8x1xf32> -> vector<10x8x1xf32>
    %30 = vector.broadcast %29 : vector<10x8x1xf32> to vector<10x8x8xf32>
    %31 = arith.mulf %26, %30 : vector<10x8x8xf32>
    "tpu.trace_start"() <{level = 10 : i32, message = "hqk,hke->hqe"}> : () -> ()
    %cst_14 = arith.constant dense<0.000000e+00> : vector<10x8x4xf32>
    %32 = tpu.matmul %31, %13, %cst_14 {dimension_numbers = #tpu.dot_dimension_numbers<[2], [1], [1], [2], [0, 0, 0, 1, 1, 2], [0], [0]>} : vector<10x8x8xf32>, vector<10x8x4xf32>, vector<10x8x4xf32> -> vector<10x8x4xf32>
    "tpu.trace_stop"() : () -> ()
    %c0_15 = arith.constant 0 : index
    %c0_16 = arith.constant 0 : index
    %c0_17 = arith.constant 0 : index
    %33 = vector.load %arg5[%c0_15, %c0_16, %c0_17] : memref<10x4x40xf32, #tpu.memory_space<vmem>>, vector<10x4x40xf32>
    "tpu.trace_start"() <{level = 10 : i32, message = "hse,hed->hsd"}> : () -> ()
    %cst_18 = arith.constant dense<0.000000e+00> : vector<10x8x40xf32>
    %34 = tpu.matmul %32, %33, %cst_18 {dimension_numbers = #tpu.dot_dimension_numbers<[2], [1], [1], [2], [0, 0, 0, 1, 1, 2], [0], [0]>} : vector<10x8x4xf32>, vector<10x4x40xf32>, vector<10x8x40xf32> -> vector<10x8x40xf32>
    "tpu.trace_stop"() : () -> ()
    %cst_19 = arith.constant dense<0.000000e+00> : vector<8x40xf32>
    %35 = vector.multi_reduction <add>, %34, %cst_19 [0] : vector<10x8x40xf32> to vector<8x40xf32>
    %c0_20 = arith.constant 0 : index
    %c0_21 = arith.constant 0 : index
    %36 = vector.load %arg6[%c0_20, %c0_21] : memref<1x40xf32, #tpu.memory_space<vmem>>, vector<1x40xf32>
    %37 = vector.broadcast %36 : vector<1x40xf32> to vector<8x40xf32>
    %38 = arith.addf %35, %37 : vector<8x40xf32>
    %39 = arith.addf %2, %38 : vector<8x40xf32>
    %c0_22 = arith.constant 0 : index
    %c0_23 = arith.constant 0 : index
    %40 = vector.load %arg7[%c0_22, %c0_23] : memref<1x40xf32, #tpu.memory_space<vmem>>, vector<1x40xf32>
    %c0_24 = arith.constant 0 : index
    %c0_25 = arith.constant 0 : index
    %41 = vector.load %arg8[%c0_24, %c0_25] : memref<1x40xf32, #tpu.memory_space<vmem>>, vector<1x40xf32>
    %cst_26 = arith.constant dense<0.000000e+00> : vector<8xf32>
    %42 = vector.multi_reduction <add>, %39, %cst_26 [1] : vector<8x40xf32> to vector<8xf32>
    %43 = vector.shape_cast %42 : vector<8xf32> to vector<8x1xf32>
    %cst_27 = arith.constant 4.000000e+01 : f32
    %44 = vector.broadcast %cst_27 : f32 to vector<8x1xf32>
    %45 = arith.divf %43, %44 : vector<8x1xf32>
    %46 = vector.broadcast %45 : vector<8x1xf32> to vector<8x40xf32>
    %47 = arith.subf %39, %46 : vector<8x40xf32>
    %48 = arith.mulf %47, %47 : vector<8x40xf32>
    %cst_28 = arith.constant dense<0.000000e+00> : vector<8xf32>
    %49 = vector.multi_reduction <add>, %48, %cst_28 [1] : vector<8x40xf32> to vector<8xf32>
    %50 = vector.shape_cast %49 : vector<8xf32> to vector<8x1xf32>
    %cst_29 = arith.constant 4.000000e+01 : f32
    %51 = vector.broadcast %cst_29 : f32 to vector<8x1xf32>
    %52 = arith.divf %50, %51 : vector<8x1xf32>
    %53 = vector.broadcast %45 : vector<8x1xf32> to vector<8x40xf32>
    %54 = arith.subf %39, %53 : vector<8x40xf32>
    %cst_30 = arith.constant 9.99999974E-6 : f32
    %55 = vector.broadcast %cst_30 : f32 to vector<8x1xf32>
    %56 = arith.addf %52, %55 : vector<8x1xf32>
    %57 = math.rsqrt %56 : vector<8x1xf32>
    %58 = vector.broadcast %57 : vector<8x1xf32> to vector<8x40xf32>
    %59 = arith.mulf %54, %58 : vector<8x40xf32>
    %60 = vector.broadcast %40 : vector<1x40xf32> to vector<8x40xf32>
    %61 = arith.mulf %59, %60 : vector<8x40xf32>
    %62 = vector.broadcast %41 : vector<1x40xf32> to vector<8x40xf32>
    %63 = arith.addf %61, %62 : vector<8x40xf32>
    %c0_31 = arith.constant 0 : index
    %c0_32 = arith.constant 0 : index
    %64 = vector.load %arg11[%c0_31, %c0_32] : memref<40x2048xf32, #tpu.memory_space<vmem>>, vector<40x2048xf32>
    %cst_33 = arith.constant dense<0.000000e+00> : vector<8x2048xf32>
    %65 = tpu.matmul %63, %64, %cst_33 {dimension_numbers = #tpu.dot_dimension_numbers<[1], [0], [0], [1], [0, 0, 1, 1], [], []>} : vector<8x40xf32>, vector<40x2048xf32>, vector<8x2048xf32> -> vector<8x2048xf32>
    %c0_34 = arith.constant 0 : index
    %c0_35 = arith.constant 0 : index
    %66 = vector.load %arg12[%c0_34, %c0_35] : memref<1x2048xf32, #tpu.memory_space<vmem>>, vector<1x2048xf32>
    %67 = vector.broadcast %66 : vector<1x2048xf32> to vector<8x2048xf32>
    %68 = arith.addf %65, %67 : vector<8x2048xf32>
    %cst_36 = arith.constant 0.000000e+00 : f32
    %69 = vector.broadcast %cst_36 : f32 to vector<8x2048xf32>
    %70 = arith.maximumf %68, %69 : vector<8x2048xf32>
    %c0_37 = arith.constant 0 : index
    %c0_38 = arith.constant 0 : index
    %71 = vector.load %arg13[%c0_37, %c0_38] : memref<2048x40xf32, #tpu.memory_space<vmem>>, vector<2048x40xf32>
    %cst_39 = arith.constant dense<0.000000e+00> : vector<8x40xf32>
    %72 = tpu.matmul %70, %71, %cst_39 {dimension_numbers = #tpu.dot_dimension_numbers<[1], [0], [0], [1], [0, 0, 1, 1], [], []>} : vector<8x2048xf32>, vector<2048x40xf32>, vector<8x40xf32> -> vector<8x40xf32>
    %c0_40 = arith.constant 0 : index
    %c0_41 = arith.constant 0 : index
    %73 = vector.load %arg14[%c0_40, %c0_41] : memref<1x40xf32, #tpu.memory_space<vmem>>, vector<1x40xf32>
    %74 = vector.broadcast %73 : vector<1x40xf32> to vector<8x40xf32>
    %75 = arith.addf %72, %74 : vector<8x40xf32>
    %76 = arith.addf %63, %75 : vector<8x40xf32>
    %c0_42 = arith.constant 0 : index
    %c0_43 = arith.constant 0 : index
    %77 = vector.load %arg9[%c0_42, %c0_43] : memref<1x40xf32, #tpu.memory_space<vmem>>, vector<1x40xf32>
    %c0_44 = arith.constant 0 : index
    %c0_45 = arith.constant 0 : index
    %78 = vector.load %arg10[%c0_44, %c0_45] : memref<1x40xf32, #tpu.memory_space<vmem>>, vector<1x40xf32>
    %cst_46 = arith.constant dense<0.000000e+00> : vector<8xf32>
    %79 = vector.multi_reduction <add>, %76, %cst_46 [1] : vector<8x40xf32> to vector<8xf32>
    %80 = vector.shape_cast %79 : vector<8xf32> to vector<8x1xf32>
    %cst_47 = arith.constant 4.000000e+01 : f32
    %81 = vector.broadcast %cst_47 : f32 to vector<8x1xf32>
    %82 = arith.divf %80, %81 : vector<8x1xf32>
    %83 = vector.broadcast %82 : vector<8x1xf32> to vector<8x40xf32>
    %84 = arith.subf %76, %83 : vector<8x40xf32>
    %85 = arith.mulf %84, %84 : vector<8x40xf32>
    %cst_48 = arith.constant dense<0.000000e+00> : vector<8xf32>
    %86 = vector.multi_reduction <add>, %85, %cst_48 [1] : vector<8x40xf32> to vector<8xf32>
    %87 = vector.shape_cast %86 : vector<8xf32> to vector<8x1xf32>
    %cst_49 = arith.constant 4.000000e+01 : f32
    %88 = vector.broadcast %cst_49 : f32 to vector<8x1xf32>
    %89 = arith.divf %87, %88 : vector<8x1xf32>
    %90 = vector.broadcast %82 : vector<8x1xf32> to vector<8x40xf32>
    %91 = arith.subf %76, %90 : vector<8x40xf32>
    %cst_50 = arith.constant 9.99999974E-6 : f32
    %92 = vector.broadcast %cst_50 : f32 to vector<8x1xf32>
    %93 = arith.addf %89, %92 : vector<8x1xf32>
    %94 = math.rsqrt %93 : vector<8x1xf32>
    %95 = vector.broadcast %94 : vector<8x1xf32> to vector<8x40xf32>
    %96 = arith.mulf %91, %95 : vector<8x40xf32>
    %97 = vector.broadcast %77 : vector<1x40xf32> to vector<8x40xf32>
    %98 = arith.mulf %96, %97 : vector<8x40xf32>
    %99 = vector.broadcast %78 : vector<1x40xf32> to vector<8x40xf32>
    %100 = arith.addf %98, %99 : vector<8x40xf32>
    %c0_51 = arith.constant 0 : index
    %c0_52 = arith.constant 0 : index
    %101 = vector.load %arg15[%c0_51, %c0_52] : memref<8x40xf32, #tpu.memory_space<vmem>>, vector<8x40xf32>
    tpu.vector_store %arg15[%c0_51, %c0_52], %100 {strides = array<i32>} : memref<8x40xf32, #tpu.memory_space<vmem>>, vector<8x40xf32>,
    return
  }
  func.func @transform_0(%arg0: i32) -> (i32, i32) {
    %c0_i32 = arith.constant 0 : i32
    %c0_i32_0 = arith.constant 0 : i32
    %c0_i32_1 = arith.constant 0 : i32
    return %c0_i32, %c0_i32_0 : i32, i32
  }
  func.func @transform_1(%arg0: i32) -> (i32, i32) {
    %c0_i32 = arith.constant 0 : i32
    %c0_i32_0 = arith.constant 0 : i32
    %c0_i32_1 = arith.constant 0 : i32
    return %c0_i32, %c0_i32_0 : i32, i32
  }
  func.func @transform_2(%arg0: i32) -> (i32, i32, i32) {
    %c0_i32 = arith.constant 0 : i32
    %c0_i32_0 = arith.constant 0 : i32
    %c0_i32_1 = arith.constant 0 : i32
    %c0_i32_2 = arith.constant 0 : i32
    return %c0_i32, %c0_i32_0, %c0_i32_1 : i32, i32, i32
  }
  func.func @transform_3(%arg0: i32) -> (i32, i32, i32) {
    %c0_i32 = arith.constant 0 : i32
    %c0_i32_0 = arith.constant 0 : i32
    %c0_i32_1 = arith.constant 0 : i32
    %c0_i32_2 = arith.constant 0 : i32
    return %c0_i32, %c0_i32_0, %c0_i32_1 : i32, i32, i32
  }
  func.func @transform_4(%arg0: i32) -> (i32, i32, i32) {
    %c0_i32 = arith.constant 0 : i32
    %c0_i32_0 = arith.constant 0 : i32
    %c0_i32_1 = arith.constant 0 : i32
    %c0_i32_2 = arith.constant 0 : i32
    return %c0_i32, %c0_i32_0, %c0_i32_1 : i32, i32, i32
  }
  func.func @transform_5(%arg0: i32) -> (i32, i32) {
    %c0_i32 = arith.constant 0 : i32
    %c0_i32_0 = arith.constant 0 : i32
    %c0_i32_1 = arith.constant 0 : i32
    return %c0_i32, %c0_i32_0 : i32, i32
  }
  func.func @transform_6(%arg0: i32) -> (i32, i32) {
    %c0_i32 = arith.constant 0 : i32
    %c0_i32_0 = arith.constant 0 : i32
    %c0_i32_1 = arith.constant 0 : i32
    return %c0_i32, %c0_i32_0 : i32, i32
  }
  func.func @transform_7(%arg0: i32) -> (i32, i32) {
    %c0_i32 = arith.constant 0 : i32
    %c0_i32_0 = arith.constant 0 : i32
    %c0_i32_1 = arith.constant 0 : i32
    return %c0_i32, %c0_i32_0 : i32, i32
  }
  func.func @transform_8(%arg0: i32) -> (i32, i32) {
    %c0_i32 = arith.constant 0 : i32
    %c0_i32_0 = arith.constant 0 : i32
    %c0_i32_1 = arith.constant 0 : i32
    return %c0_i32, %c0_i32_0 : i32, i32
  }
  func.func @transform_9(%arg0: i32) -> (i32, i32) {
    %c0_i32 = arith.constant 0 : i32
    %c0_i32_0 = arith.constant 0 : i32
    %c0_i32_1 = arith.constant 0 : i32
    return %c0_i32, %c0_i32_0 : i32, i32
  }
  func.func @transform_10(%arg0: i32) -> (i32, i32) {
    %c0_i32 = arith.constant 0 : i32
    %c0_i32_0 = arith.constant 0 : i32
    %c0_i32_1 = arith.constant 0 : i32
    return %c0_i32, %c0_i32_0 : i32, i32
  }
  func.func @transform_11(%arg0: i32) -> (i32, i32) {
    %c0_i32 = arith.constant 0 : i32
    %c0_i32_0 = arith.constant 0 : i32
    %c0_i32_1 = arith.constant 0 : i32
    return %c0_i32, %c0_i32_0 : i32, i32
  }
  func.func @transform_12(%arg0: i32) -> (i32, i32) {
    %c0_i32 = arith.constant 0 : i32
    %c0_i32_0 = arith.constant 0 : i32
    %c0_i32_1 = arith.constant 0 : i32
    return %c0_i32, %c0_i32_0 : i32, i32
  }
  func.func @transform_13(%arg0: i32) -> (i32, i32) {
    %c0_i32 = arith.constant 0 : i32
    %c0_i32_0 = arith.constant 0 : i32
    %c0_i32_1 = arith.constant 0 : i32
    return %c0_i32, %c0_i32_0 : i32, i32
  }
  func.func @transform_14(%arg0: i32) -> (i32, i32) {
    %c0_i32 = arith.constant 0 : i32
    %c0_i32_0 = arith.constant 0 : i32
    %c0_i32_1 = arith.constant 0 : i32
    return %c0_i32, %c0_i32_0 : i32, i32
  }
}

</mosaic_0001>

<bundles_post_ra>
// kernel: tpu_custom_call.1
= control target key start
LH: loop header
LB: loop body
LE: loop exit
PB: predicated region body
PF: predicated region fallthrough
CT: control target
= control target key end

     0   :  { %v8346_v3 = vmov 0.0|0.0   ;;  %vm8347_vm0 = vmmov 0   ;;  %v8348_v11 = vmov 0.0   ;;  %vm411_vm1 = vcmask 326656   ;;  %s10651_s0 = inlined_call_operand.vmem [shape: f32[8,40], index: 0, kind: input, shape index: {}]   ;;  %s10652_s1 = inlined_call_operand.vmem [shape: f32[8,40], index: 1, kind: input, shape index: {}]   ;;  %s10653_s2 = inlined_call_operand.vmem [shape: f32[30,40,4], index: 2, kind: input, shape index: {}]   ;;  %s10654_s3 = inlined_call_operand.vmem [shape: f32[30,1,4], index: 3, kind: input, shape index: {}]   ;;  %s10655_s4 = inlined_call_operand.vmem [shape: f32[10,4,40], index: 4, kind: input, shape index: {}]   ;;  %s10656_s5 = inlined_call_operand.vmem [shape: f32[1,40], index: 5, kind: input, shape index: {}]   ;;  %s10657_s6 = inlined_call_operand.vmem [shape: f32[1,40], index: 6, kind: input, shape index: {}]   ;;  %s10658_s7 = inlined_call_operand.vmem [shape: f32[1,40], index: 7, kind: input, shape index: {}]   ;;  %s10659_s8 = inlined_call_operand.vmem [shape: f32[1,40], index: 8, kind: input, shape index: {}]   ;;  %s10660_s9 = inlined_call_operand.vmem [shape: f32[1,40], index: 9, kind: input, shape index: {}]   ;;  %s10661_s10 = inlined_call_operand.vmem [shape: f32[40,2048], index: 10, kind: input, shape index: {}]   ;;  %s10662_s11 = inlined_call_operand.vmem [shape: f32[1,2048], index: 11, kind: input, shape index: {}]   ;;  %s10663_s12 = inlined_call_operand.vmem [shape: f32[2048,40], index: 12, kind: input, shape index: {}]   ;;  %s10664_s13 = inlined_call_operand.vmem [shape: f32[1,40], index: 13, kind: input, shape index: {}]   ;;  %s10665_s14 = inlined_call_operand.hbm [shape: f32[8,40], index: 14, kind: output, shape index: {}]  }
   0x1   :  { %v51_v0 = vld [vmem:[%s10653_s2] sm:$0xff]  ;;  %v52_v1 = vld [vmem:[%s10653_s2 + $0x8] sm:$0xff]  ;;  %7774 = vmatprep.subr.bf16.mxu0 %v8346_v3  ;;  %7780 = vmatprep.subr.bf16.mxu1 %v8346_v3  ;;  %v57_v5 = vld [vmem:[%s10653_s2 + $0x30] sm:$0xff] }
   0x2   :  { %v56_v2 = vld [vmem:[%s10653_s2 + $0x28] sm:$0xff]  ;;  %v7775_v4 = vpack.c.bf16 %v52_v1, %v51_v0  ;;  %v53_v6 = vld [vmem:[%s10653_s2 + $0x10] sm:$0xff]  ;;  %v54_v7 = vld [vmem:[%s10653_s2 + $0x18] sm:$0xff]  ;;  %7244 = vmatprep.mubr.msk.f32.mxu0 %vm8347_vm0, %v8348_v11  ;;  %7257 = vmatprep.mubr.msk.f32.mxu1 %vm8347_vm0, %v8348_v11 }
   0x3   :  { %v7781_v8 = vpack.c.bf16 %v57_v5, %v56_v2  ;;  %v58_v9 = vld [vmem:[%s10653_s2 + $0x38] sm:$0xff]  ;;  %v59_v10 = vld [vmem:[%s10653_s2 + $0x40] sm:$0xff]  ;;  %v7778_v12 = vpack.c.bf16 %v54_v7, %v53_v6  ;;  %v61_v16 = vld [vmem:[%s10653_s2 + $0x50] sm:$0xff] }
   0x4   :  { %7776 = vmatpush3.bf16.msra.mxu0 %v7775_v4  ;;  %v7784_v13 = vpack.c.bf16 %v59_v10, %v58_v9  ;;  %v48_v14 = vld [vmem:[%s10651_s0] sm:$0xff]  ;;  %v62_v17 = vld [vmem:[%s10653_s2 + $0x58] sm:$0xff]  ;;  %v60_v22 = vld [vmem:[%s10653_s2 + $0x48] sm:$0xff] }
   0x5   :  { %7782 = vmatpush3.bf16.msra.mxu1 %v7781_v8  ;;  %7777 = vmatprep.subr.bf16.mxu0 %v8346_v3  ;;  %v49_v15 = vld [vmem:[%s10652_s1] sm:$0xff]  ;;  %v66_v20 = vld [vmem:[%s10653_s2 + $0x78] sm:$0xff]  ;;  %v7787_v23 = vpack.c.bf16 %v62_v17, %v61_v16  ;;  %v64_v26 = vld [vmem:[%s10653_s2 + $0x68] sm:$0xff] }
   0x6   :  { %7783 = vmatprep.subr.bf16.mxu1 %v8346_v3  ;;  %v55_v18 = vld [vmem:[%s10653_s2 + $0x20] sm:$0xff]  ;;  %v8473_v19 = vadd.f32 %v49_v15, %v48_v14  ;;  %v68_v27 = vld [vmem:[%s10653_s2 + $0x88] sm:$0xff]  ;;  %v69_v28 = vld [vmem:[%s10653_s2 + $0x90] sm:$0xff] }
   0x7   :  { %v67_v21 = vld [vmem:[%s10653_s2 + $0x80] sm:$0xff]  ;;  %v7796_v30 = vpack.c.bf16 %v69_v28, %v68_v27  ;;  %v72_v32 = vld [vmem:[%s10653_s2 + $0xa8] sm:$0xff]  ;;  %v65_v33 = vld [vmem:[%s10653_s2 + $0x70] sm:$0xff] }
   0x8   :  { %7779 = vmatpush3.bf16.msra.mxu0 %v7778_v12  ;;  %v7793_v24 = vpack.c.bf16 %v67_v21, %v66_v20  ;;  %v63_v25 = vld [vmem:[%s10653_s2 + $0x60] sm:$0xff]  ;;  %v76_v34 = vld [vmem:[%s10653_s2 + $0xc8] sm:$0xff]  ;;  %v77_v35 = vld [vmem:[%s10653_s2 + $0xd0] sm:$0xff] }
   0x9   :  { %7785 = vmatpush3.bf16.msra.mxu1 %v7784_v13  ;;  %7242 = vmatprep.subr.mxu0 %v8348_v11  ;;  %v7790_v29 = vpack.c.bf16 %v64_v26, %v63_v25  ;;  %v71_v31 = vld [vmem:[%s10653_s2 + $0xa0] sm:$0xff]  ;;  %v70_v36 = vld [vmem:[%s10653_s2 + $0x98] sm:$0xff]  ;;  %v7805_v38 = vpack.c.bf16 %v77_v35, %v76_v34  ;;  %v73_v39 = vld [vmem:[%s10653_s2 + $0xb0] sm:$0xff] }
   0xa   :  { %7255 = vmatprep.subr.mxu1 %v8348_v11  ;;  %v7799_v37 = vpack.c.bf16 %v72_v32, %v71_v31  ;;  %v74_v40 = vld [vmem:[%s10653_s2 + $0xb8] sm:$0xff]  ;;  %v79_v42 = vld [vmem:[%s10653_s2 + $0xe0] sm:$0xff]  ;;  %v81_v45 = vld [vmem:[%s10653_s2 + $0xf0] sm:$0xff] }
   0xb   :  { %v78_v41 = vld [vmem:[%s10653_s2 + $0xd8] sm:$0xff]  ;;  %v7802_v43 = vpack.c.bf16 %v74_v40, %v73_v39  ;;  %v75_v47 = vld [vmem:[%s10653_s2 + $0xc0] sm:$0xff]  ;;  %v80_v50 = vld [vmem:[%s10653_s2 + $0xe8] sm:$0xff] }
   0xc   :  { %7243 = vmatpush3.msra.mxu0 %v55_v18  ;;  %v7808_v44 = vpack.c.bf16 %v79_v42, %v78_v41  ;;  %v82_v46 = vld [vmem:[%s10653_s2 + $0xf8] sm:$0xff]  ;;  %v87_v49 = vld [vmem:[%s10653_s2 + $0x120] sm:$0xff]  ;;  %v84_v54 = vld [vmem:[%s10653_s2 + $0x108] sm:$0xff] }
   0xd   :  { %7256 = vmatpush3.msra.mxu1 %v60_v22  ;;  %7245 = vmatmul.mubr.msk.f32.vlgmr.msra.gmra.mrb[0].mxu0 %vm411_vm1, %v8473_v19  ;;  %v86_v48 = vld [vmem:[%s10653_s2 + $0x118] sm:$0xff]  ;;  %v7811_v51 = vpack.c.bf16 %v82_v46, %v81_v45  ;;  %v83_v53 = vld [vmem:[%s10653_s2 + $0x100] sm:$0xff]  ;;  %v88_v55 = vld [vmem:[%s10653_s2 + $0x128] sm:$0xff] }
   0xe   :  { %7786 = vmatprep.subr.bf16.mxu0 %v8346_v3  ;;  %7792 = vmatprep.subr.bf16.mxu1 %v8346_v3  ;;  %v7817_v52 = vpack.c.bf16 %v87_v49, %v86_v48  ;;  %v89_v56 = vld [vmem:[%s10653_s2 + $0x130] sm:$0xff] }
   0xf   :  { %7258 = vmatmul.mubr.msk.f32.vlgmr.msra.gmra.mrb[0].mxu1 %vm411_vm1, %v8473_v19  ;;  %7788 = vmatpush3.bf16.msra.mxu0 %v7787_v23 }
  0x10   :  { %7794 = vmatpush3.bf16.msra.mxu1 %v7793_v24  ;;  %7789 = vmatprep.subr.bf16.mxu0 %v8346_v3 }
  0x11   :  { %7795 = vmatprep.subr.bf16.mxu1 %v8346_v3  ;;  %7270 = vmatprep.mubr.msk.f32.mxu0 %vm8347_vm0, %v8348_v11 }
  0x12   :  { %7283 = vmatprep.mubr.msk.f32.mxu1 %vm8347_vm0, %v8348_v11 }
  0x13   :  { %7791 = vmatpush3.bf16.msra.mxu0 %v7790_v29 }
  0x14   :  { %7797 = vmatpush3.bf16.msra.mxu1 %v7796_v30  ;;  %7268 = vmatprep.subr.mxu0 %v8348_v11 }
  0x15   :  { %7281 = vmatprep.subr.mxu1 %v8348_v11 }
  0x17   :  { %7269 = vmatpush3.msra.mxu0 %v65_v33 }
  0x18   :  { %7282 = vmatpush3.msra.mxu1 %v70_v36  ;;  %7271 = vmatmul.mubr.msk.f32.vlgmr.msra.gmra.mrb[2].mxu0 %vm411_vm1, %v8473_v19 }
  0x19   :  { %7798 = vmatprep.subr.bf16.mxu0 %v8346_v3  ;;  %7804 = vmatprep.subr.bf16.mxu1 %v8346_v3 }
  0x1a   :  { %7284 = vmatmul.mubr.msk.f32.vlgmr.msra.gmra.mrb[2].mxu1 %vm411_vm1, %v8473_v19  ;;  %7800 = vmatpush3.bf16.msra.mxu0 %v7799_v37 }
  0x1b   :  { %7806 = vmatpush3.bf16.msra.mxu1 %v7805_v38  ;;  %7801 = vmatprep.subr.bf16.mxu0 %v8346_v3 }
  0x1c   :  { %7807 = vmatprep.subr.bf16.mxu1 %v8346_v3  ;;  %7296 = vmatprep.mubr.msk.f32.mxu0 %vm8347_vm0, %v8348_v11 }
  0x1d   :  { %7309 = vmatprep.mubr.msk.f32.mxu1 %vm8347_vm0, %v8348_v11 }
  0x1e   :  { %7803 = vmatpush3.bf16.msra.mxu0 %v7802_v43 }
  0x1f   :  { %7809 = vmatpush3.bf16.msra.mxu1 %v7808_v44  ;;  %7294 = vmatprep.subr.mxu0 %v8348_v11 }
  0x20   :  { %7307 = vmatprep.subr.mxu1 %v8348_v11 }
  0x22   :  { %7295 = vmatpush3.msra.mxu0 %v75_v47 }
  0x23   :  { %7308 = vmatpush3.msra.mxu1 %v80_v50  ;;  %7297 = vmatmul.mubr.msk.f32.vlgmr.msra.gmra.mrb[4].mxu0 %vm411_vm1, %v8473_v19 }
  0x24   :  { %7810 = vmatprep.subr.bf16.mxu0 %v8346_v3  ;;  %7816 = vmatprep.subr.bf16.mxu1 %v8346_v3 }
  0x25   :  { %19 = vsyncpa [#allocation3], 0  ;;  %7310 = vmatmul.mubr.msk.f32.vlgmr.msra.gmra.mrb[4].mxu1 %vm411_vm1, %v8473_v19  ;;  %7812 = vmatpush3.bf16.msra.mxu0 %v7811_v51  ;;  %v7814_v57 = vpack.c.bf16 %v84_v54, %v83_v53  ;;  %v7820_v58 = vpack.c.bf16 %v89_v56, %v88_v55  ;;  %v91_v59 = vld [vmem:[%s10653_s2 + $0x140] sm:$0xff]  ;;  %v92_v60 = vld [vmem:[%s10653_s2 + $0x148] sm:$0xff]  ;;  %vm2515_vm2 = vcmask 31744   ;;  %vm3301_vm4 = vcmask 64512  }
  0x26   :  { %7818 = vmatpush3.bf16.msra.mxu1 %v7817_v52  ;;  %7813 = vmatprep.subr.bf16.mxu0 %v8346_v3  ;;  %v85_v61 = vld [vmem:[%s10653_s2 + $0x110] sm:$0xff]  ;;  %v96_v62 = vld [vmem:[%s10653_s2 + $0x168] sm:$0xff]  ;;  %v90_v0 = vld [vmem:[%s10653_s2 + $0x138] sm:$0xff]  ;;  %v7823_v1 = vpack.c.bf16 %v92_v60, %v91_v59  ;;  %vm4155_vm5 = vcmask 1043456   ;;  %s8349_s21 = smov [#allocation2]  }
  0x27   :  { %7819 = vmatprep.subr.bf16.mxu1 %v8346_v3  ;;  %7322 = vmatprep.mubr.msk.f32.mxu0 %vm8347_vm0, %v8348_v11  ;;  %v97_v63 = vld [vmem:[%s10653_s2 + $0x170] sm:$0xff]  ;;  %v94_v5 = vld [vmem:[%s10653_s2 + $0x158] sm:$0xff]  ;;  %v99_v7 = vld [vmem:[%s10653_s2 + $0x180] sm:$0xff]  ;;  %s6582_s22 = sshll.u32 %s8349_s21, 4  ;;  %s6583_s22 = int_to_ptr.vmem [resolvable:$true] %s6582_s22 }
  0x28   :  { %7335 = vmatprep.mubr.msk.f32.mxu1 %vm8347_vm0, %v8348_v11  ;;  %v7829_v2 = vpack.c.bf16 %v97_v63, %v96_v62  ;;  %v93_v4 = vld [vmem:[%s10653_s2 + $0x150] sm:$0xff]  ;;  %v98_v6 = vld [vmem:[%s10653_s2 + $0x178] sm:$0xff]  ;;  %v95_v13 = vld [vmem:[%s10653_s2 + $0x160] sm:$0xff]  ;;  %s8322_s0 = scalar_lea.vmem %s6583_s22, 128  ;;  %p8327_p1 = scmp.lt.s32.totalorder %s6583_s22, %s6583_s22 }
  0x29   :  { %7815 = vmatpush3.bf16.msra.mxu0 %v7814_v57  ;;  %v7826_v8 = vpack.c.bf16 %v94_v5, %v93_v4  ;;  %v7832_v9 = vpack.c.bf16 %v99_v7, %v98_v6  ;;  %v101_v10 = vld [vmem:[%s10653_s2 + $0x190] sm:$0xff]  ;;  %v102_v12 = vld [vmem:[%s10653_s2 + $0x198] sm:$0xff]  ;;  %v107_v15 = vld [vmem:[%s10653_s2 + $0x1c0] sm:$0xff]  ;;  %p8323_p0 = scmp.ne.s32.totalorder %s6583_s22, %s8322_s0  ;;  %p8328_p2 = scmp.lt.s32.totalorder %s8322_s0, %s8322_s0 }
  0x2a   :  { %7821 = vmatpush3.bf16.msra.mxu1 %v7820_v58  ;;  %7320 = vmatprep.subr.mxu0 %v8348_v11  ;;  %v106_v14 = vld [vmem:[%s10653_s2 + $0x1b8] sm:$0xff]  ;;  %v100_v16 = vld [vmem:[%s10653_s2 + $0x188] sm:$0xff]  ;;  %v7835_v17 = vpack.c.bf16 %v102_v12, %v101_v10  ;;  %v103_v20 = vld [vmem:[%s10653_s2 + $0x1a0] sm:$0xff] }
  0x2b   :  { %7333 = vmatprep.subr.mxu1 %v8348_v11  ;;  %v7841_v18 = vpack.c.bf16 %v107_v15, %v106_v14  ;;  %v104_v21 = vld [vmem:[%s10653_s2 + $0x1a8] sm:$0xff]  ;;  %v109_v23 = vld [vmem:[%s10653_s2 + $0x1d0] sm:$0xff]  ;;  %v111_v26 = vld [vmem:[%s10653_s2 + $0x1e0] sm:$0xff]  ;;  %p8329_p3 = por %p8328_p2, %p8327_p1 }
  0x2c   :  { %v108_v22 = vld [vmem:[%s10653_s2 + $0x1c8] sm:$0xff]  ;;  %v7838_v24 = vpack.c.bf16 %v104_v21, %v103_v20  ;;  %v105_v28 = vld [vmem:[%s10653_s2 + $0x1b0] sm:$0xff]  ;;  %v110_v31 = vld [vmem:[%s10653_s2 + $0x1d8] sm:$0xff] }
  0x2d   :  { %7321 = vmatpush3.msra.mxu0 %v85_v61  ;;  %v7844_v25 = vpack.c.bf16 %v109_v23, %v108_v22  ;;  %v112_v27 = vld [vmem:[%s10653_s2 + $0x1e8] sm:$0xff]  ;;  %v117_v30 = vld [vmem:[%s10653_s2 + $0x210] sm:$0xff]  ;;  %v114_v35 = vld [vmem:[%s10653_s2 + $0x1f8] sm:$0xff]  ;;  %p8330_p4 = pnand %p8329_p3, %p8323_p0 }
  0x2e   :  { %7334 = vmatpush3.msra.mxu1 %v90_v0  ;;  %7323 = vmatmul.mubr.msk.f32.vlgmr.msra.gmra.mrb[6].mxu0 %vm411_vm1, %v8473_v19  ;;  %v116_v29 = vld [vmem:[%s10653_s2 + $0x208] sm:$0xff]  ;;  %v7847_v32 = vpack.c.bf16 %v112_v27, %v111_v26  ;;  %v113_v34 = vld [vmem:[%s10653_s2 + $0x1f0] sm:$0xff]  ;;  %v118_v36 = vld [vmem:[%s10653_s2 + $0x218] sm:$0xff] }
  0x2f   :  { %7822 = vmatprep.subr.bf16.mxu0 %v8346_v3  ;;  %7828 = vmatprep.subr.bf16.mxu1 %v8346_v3  ;;  %v7853_v33 = vpack.c.bf16 %v117_v30, %v116_v29  ;;  %v119_v37 = vld [vmem:[%s10653_s2 + $0x220] sm:$0xff]  ;;  %v7850_v38 = vpack.c.bf16 %v114_v35, %v113_v34  ;;  %v121_v40 = vld [vmem:[%s10653_s2 + $0x230] sm:$0xff]  ;;  %v122_v41 = vld [vmem:[%s10653_s2 + $0x238] sm:$0xff] }
  0x30   :  { %7336 = vmatmul.mubr.msk.f32.vlgmr.msra.gmra.mrb[6].mxu1 %vm411_vm1, %v8473_v19  ;;  %7824 = vmatpush3.bf16.msra.mxu0 %v7823_v1  ;;  %v7856_v39 = vpack.c.bf16 %v119_v37, %v118_v36  ;;  %v115_v42 = vld [vmem:[%s10653_s2 + $0x200] sm:$0xff]  ;;  %v126_v43 = vld [vmem:[%s10653_s2 + $0x258] sm:$0xff]  ;;  %v120_v45 = vld [vmem:[%s10653_s2 + $0x228] sm:$0xff]  ;;  %v7859_v46 = vpack.c.bf16 %v122_v41, %v121_v40 }
  0x31   :  { %7830 = vmatpush3.bf16.msra.mxu1 %v7829_v2  ;;  %7825 = vmatprep.subr.bf16.mxu0 %v8346_v3  ;;  %v127_v44 = vld [vmem:[%s10653_s2 + $0x260] sm:$0xff]  ;;  %v124_v49 = vld [vmem:[%s10653_s2 + $0x248] sm:$0xff]  ;;  %v129_v51 = vld [vmem:[%s10653_s2 + $0x270] sm:$0xff] }
  0x32   :  { %7831 = vmatprep.subr.bf16.mxu1 %v8346_v3  ;;  %7348 = vmatprep.mubr.msk.f32.mxu0 %vm8347_vm0, %v8348_v11  ;;  %v7865_v47 = vpack.c.bf16 %v127_v44, %v126_v43  ;;  %v123_v48 = vld [vmem:[%s10653_s2 + $0x240] sm:$0xff]  ;;  %v128_v50 = vld [vmem:[%s10653_s2 + $0x268] sm:$0xff]  ;;  %v125_v56 = vld [vmem:[%s10653_s2 + $0x250] sm:$0xff] }
  0x33   :  { %7361 = vmatprep.mubr.msk.f32.mxu1 %vm8347_vm0, %v8348_v11  ;;  %v7862_v52 = vpack.c.bf16 %v124_v49, %v123_v48  ;;  %v7868_v53 = vpack.c.bf16 %v129_v51, %v128_v50  ;;  %v131_v54 = vld [vmem:[%s10653_s2 + $0x280] sm:$0xff]  ;;  %v132_v55 = vld [vmem:[%s10653_s2 + $0x288] sm:$0xff]  ;;  %v137_v58 = vld [vmem:[%s10653_s2 + $0x2b0] sm:$0xff] }
  0x34   :  { %7827 = vmatpush3.bf16.msra.mxu0 %v7826_v8  ;;  %v136_v57 = vld [vmem:[%s10653_s2 + $0x2a8] sm:$0xff]  ;;  %v130_v59 = vld [vmem:[%s10653_s2 + $0x278] sm:$0xff]  ;;  %v7871_v60 = vpack.c.bf16 %v132_v55, %v131_v54  ;;  %v133_v62 = vld [vmem:[%s10653_s2 + $0x290] sm:$0xff] }
  0x35   :  { %7833 = vmatpush3.bf16.msra.mxu1 %v7832_v9  ;;  %7346 = vmatprep.subr.mxu0 %v8348_v11  ;;  %v7877_v61 = vpack.c.bf16 %v137_v58, %v136_v57  ;;  %v134_v63 = vld [vmem:[%s10653_s2 + $0x298] sm:$0xff]  ;;  %v139_v1 = vld [vmem:[%s10653_s2 + $0x2c0] sm:$0xff]  ;;  %v141_v5 = vld [vmem:[%s10653_s2 + $0x2d0] sm:$0xff] }
  0x36   :  { %7359 = vmatprep.subr.mxu1 %v8348_v11  ;;  %v138_v0 = vld [vmem:[%s10653_s2 + $0x2b8] sm:$0xff]  ;;  %v7874_v2 = vpack.c.bf16 %v134_v63, %v133_v62  ;;  %v135_v7 = vld [vmem:[%s10653_s2 + $0x2a0] sm:$0xff]  ;;  %v140_v10 = vld [vmem:[%s10653_s2 + $0x2c8] sm:$0xff] }
  0x37   :  { %v7880_v4 = vpack.c.bf16 %v139_v1, %v138_v0  ;;  %v142_v6 = vld [vmem:[%s10653_s2 + $0x2d8] sm:$0xff]  ;;  %v147_v9 = vld [vmem:[%s10653_s2 + $0x300] sm:$0xff]  ;;  %v144_v15 = vld [vmem:[%s10653_s2 + $0x2e8] sm:$0xff] }
  0x38   :  { %7347 = vmatpush3.msra.mxu0 %v95_v13  ;;  %v146_v8 = vld [vmem:[%s10653_s2 + $0x2f8] sm:$0xff]  ;;  %v7883_v12 = vpack.c.bf16 %v142_v6, %v141_v5  ;;  %v143_v14 = vld [vmem:[%s10653_s2 + $0x2e0] sm:$0xff]  ;;  %v152_v22 = vld [vmem:[%s10653_s2 + $0x328] sm:$0xff] }
  0x39   :  { %7360 = vmatpush3.msra.mxu1 %v100_v16  ;;  %7349 = vmatmul.mubr.msk.f32.vlgmr.msra.gmra.mrb[8].mxu0 %vm411_vm1, %v8473_v19  ;;  %v7889_v13 = vpack.c.bf16 %v147_v9, %v146_v8  ;;  %v148_v16 = vld [vmem:[%s10653_s2 + $0x308] sm:$0xff]  ;;  %v151_v21 = vld [vmem:[%s10653_s2 + $0x320] sm:$0xff]  ;;  %v145_v23 = vld [vmem:[%s10653_s2 + $0x2f0] sm:$0xff] }
  0x3a   :  { %7834 = vmatprep.subr.bf16.mxu0 %v8346_v3  ;;  %7840 = vmatprep.subr.bf16.mxu1 %v8346_v3  ;;  %v150_v26 = vld [vmem:[%s10653_s2 + $0x318] sm:$0xff]  ;;  %v7895_v27 = vpack.c.bf16 %v152_v22, %v151_v21  ;;  %v153_v29 = vld [vmem:[%s10653_s2 + $0x330] sm:$0xff]  ;;  %v155_v37 = vld [vmem:[%s10653_s2 + $0x340] sm:$0xff] }
  0x3b   :  { %7362 = vmatmul.mubr.msk.f32.vlgmr.msra.gmra.mrb[8].mxu1 %vm411_vm1, %v8473_v19  ;;  %7836 = vmatpush3.bf16.msra.mxu0 %v7835_v17  ;;  %v149_v17 = vld [vmem:[%s10653_s2 + $0x310] sm:$0xff]  ;;  %v154_v30 = vld [vmem:[%s10653_s2 + $0x338] sm:$0xff]  ;;  %v160_v40 = vld [vmem:[%s10653_s2 + $0x368] sm:$0xff] }
  0x3c   :  { %7842 = vmatpush3.bf16.msra.mxu1 %v7841_v18  ;;  %7837 = vmatprep.subr.bf16.mxu0 %v8346_v3  ;;  %v7886_v18 = vpack.c.bf16 %v144_v15, %v143_v14  ;;  %v7892_v20 = vpack.c.bf16 %v149_v17, %v148_v16  ;;  %v161_v35 = vld [vmem:[%s10653_s2 + $0x370] sm:$0xff]  ;;  %v162_v36 = vld [vmem:[%s10653_s2 + $0x378] sm:$0xff]  ;;  %v163_v43 = vld [vmem:[%s10653_s2 + $0x380] sm:$0xff] }
  0x3d   :  { %7843 = vmatprep.subr.bf16.mxu1 %v8346_v3  ;;  %7374 = vmatprep.mubr.msk.f32.mxu0 %vm8347_vm0, %v8348_v11  ;;  %v7907_v41 = vpack.c.bf16 %v162_v36, %v161_v35  ;;  %v164_v44 = vld [vmem:[%s10653_s2 + $0x388] sm:$0xff]  ;;  %v171_v49 = vld [vmem:[%s10653_s2 + $0x3c0] sm:$0xff]  ;;  %v165_v51 = vld [vmem:[%s10653_s2 + $0x390] sm:$0xff] }
  0x3e   :  { %7387 = vmatprep.mubr.msk.f32.mxu1 %vm8347_vm0, %v8348_v11  ;;  %v172_v50 = vld [vmem:[%s10653_s2 + $0x3c8] sm:$0xff]  ;;  %v170_v54 = vld [vmem:[%s10653_s2 + $0x3b8] sm:$0xff]  ;;  %v173_v57 = vld [vmem:[%s10653_s2 + $0x3d0] sm:$0xff] }
  0x3f   :  { %7839 = vmatpush3.bf16.msra.mxu0 %v7838_v24  ;;  %v156_v24 = vld [vmem:[%s10653_s2 + $0x348] sm:$0xff]  ;;  %v7919_v55 = vpack.c.bf16 %v172_v50, %v171_v49  ;;  %v174_v58 = vld [vmem:[%s10653_s2 + $0x3d8] sm:$0xff]  ;;  %v181_v63 = vld [vmem:[%s10653_s2 + $0x410] sm:$0xff] }
  0x40   :  { %7845 = vmatpush3.bf16.msra.mxu1 %v7844_v25  ;;  %7372 = vmatprep.subr.mxu0 %v8348_v11  ;;  %v157_v25 = vld [vmem:[%s10653_s2 + $0x350] sm:$0xff]  ;;  %v182_v0 = vld [vmem:[%s10653_s2 + $0x418] sm:$0xff]  ;;  %v175_v1 = vld [vmem:[%s10653_s2 + $0x3e0] sm:$0xff] }
  0x41   :  { %7385 = vmatprep.subr.mxu1 %v8348_v11  ;;  %v180_v5 = vld [vmem:[%s10653_s2 + $0x408] sm:$0xff]  ;;  %v7931_v6 = vpack.c.bf16 %v182_v0, %v181_v63  ;;  %v183_v8 = vld [vmem:[%s10653_s2 + $0x420] sm:$0xff]  ;;  %v185_v17 = vld [vmem:[%s10653_s2 + $0x430] sm:$0xff] }
  0x42   :  { %v184_v9 = vld [vmem:[%s10653_s2 + $0x428] sm:$0xff]  ;;  %v191_v15 = vld [vmem:[%s10653_s2 + $0x460] sm:$0xff]  ;;  %v190_v21 = vld [vmem:[%s10653_s2 + $0x458] sm:$0xff] }
  0x43   :  { %7373 = vmatpush3.msra.mxu0 %v105_v28  ;;  %v7901_v28 = vpack.c.bf16 %v157_v25, %v156_v24  ;;  %v192_v16 = vld [vmem:[%s10653_s2 + $0x468] sm:$0xff]  ;;  %v193_v24 = vld [vmem:[%s10653_s2 + $0x470] sm:$0xff]  ;;  %v194_v25 = vld [vmem:[%s10653_s2 + $0x478] sm:$0xff] }
  0x44   :  { %7386 = vmatpush3.msra.mxu1 %v110_v31  ;;  %7375 = vmatmul.mubr.msk.f32.vlgmr.msra.gmra.mrb[10].mxu0 %vm411_vm1, %v8473_v19  ;;  %v158_v31 = vld [vmem:[%s10653_s2 + $0x358] sm:$0xff]  ;;  %v7943_v22 = vpack.c.bf16 %v192_v16, %v191_v15  ;;  %v6602_v63 = vld [vmem:[%s10654_s3 + $0xc] ss:$0 sm:$0xff]  ;;  %v6603_v0 = vld [vmem:[%s10654_s3 + $0xd] ss:$0 sm:$0xff] }
  0x45   :  { %7388 = vmatmul.mubr.msk.f32.vlgmr.msra.gmra.mrb[10].mxu1 %vm411_vm1, %v8473_v19  ;;  %7846 = vmatprep.subr.bf16.mxu0 %v8346_v3  ;;  %v6594_v16 = vld [vmem:[%s10654_s3 + $0x4] ss:$0 sm:$0xff] }
  0x46   :  { %7852 = vmatprep.subr.bf16.mxu1 %v8346_v3  ;;  %7848 = vmatpush3.bf16.msra.mxu0 %v7847_v32  ;;  %v159_v32 = vld [vmem:[%s10653_s2 + $0x360] sm:$0xff] }
  0x47   :  { %7854 = vmatpush3.bf16.msra.mxu1 %v7853_v33  ;;  %7849 = vmatprep.subr.bf16.mxu0 %v8346_v3  ;;  %v7898_v33 = vpack.c.bf16 %v154_v30, %v153_v29  ;;  %v7904_v34 = vpack.c.bf16 %v159_v32, %v158_v31  ;;  %v195_v30 = vld [vmem:[%s10653_s2 + $0x480] sm:$0xff] }
  0x48   :  { %7855 = vmatprep.subr.bf16.mxu1 %v8346_v3  ;;  %7400 = vmatprep.mubr.msk.f32.mxu0 %vm8347_vm0, %v8348_v11 }
  0x49   :  { %7413 = vmatprep.mubr.msk.f32.mxu1 %vm8347_vm0, %v8348_v11 }
  0x4a   :  { %7851 = vmatpush3.bf16.msra.mxu0 %v7850_v38  ;;  %v166_v38 = vld [vmem:[%s10653_s2 + $0x398] sm:$0xff] }
  0x4b   :  { %7857 = vmatpush3.bf16.msra.mxu1 %v7856_v39  ;;  %7398 = vmatprep.subr.mxu0 %v8348_v11  ;;  %v167_v39 = vld [vmem:[%s10653_s2 + $0x3a0] sm:$0xff] }
  0x4c   :  { %7411 = vmatprep.subr.mxu1 %v8348_v11 }
  0x4e   :  { %7399 = vmatpush3.msra.mxu0 %v115_v42  ;;  %v7913_v42 = vpack.c.bf16 %v167_v39, %v166_v38 }
  0x4f   :  { %7412 = vmatpush3.msra.mxu1 %v120_v45  ;;  %7401 = vmatmul.mubr.msk.f32.vlgmr.msra.gmra.mrb[12].mxu0 %vm411_vm1, %v8473_v19  ;;  %v168_v45 = vld [vmem:[%s10653_s2 + $0x3a8] sm:$0xff] }
  0x50   :  { %7414 = vmatmul.mubr.msk.f32.vlgmr.msra.gmra.mrb[12].mxu1 %vm411_vm1, %v8473_v19  ;;  %7858 = vmatprep.subr.bf16.mxu0 %v8346_v3 }
  0x51   :  { %7864 = vmatprep.subr.bf16.mxu1 %v8346_v3  ;;  %7860 = vmatpush3.bf16.msra.mxu0 %v7859_v46  ;;  %v169_v46 = vld [vmem:[%s10653_s2 + $0x3b0] sm:$0xff] }
  0x52   :  { %7866 = vmatpush3.bf16.msra.mxu1 %v7865_v47  ;;  %7861 = vmatprep.subr.bf16.mxu0 %v8346_v3  ;;  %v7910_v47 = vpack.c.bf16 %v164_v44, %v163_v43  ;;  %v7916_v48 = vpack.c.bf16 %v169_v46, %v168_v45 }
  0x53   :  { %7867 = vmatprep.subr.bf16.mxu1 %v8346_v3  ;;  %7426 = vmatprep.mubr.msk.f32.mxu0 %vm8347_vm0, %v8348_v11 }
  0x54   :  { %7439 = vmatprep.mubr.msk.f32.mxu1 %vm8347_vm0, %v8348_v11 }
  0x55   :  { %7863 = vmatpush3.bf16.msra.mxu0 %v7862_v52  ;;  %v176_v52 = vld [vmem:[%s10653_s2 + $0x3e8] sm:$0xff] }
  0x56   :  { %7869 = vmatpush3.bf16.msra.mxu1 %v7868_v53  ;;  %7424 = vmatprep.subr.mxu0 %v8348_v11  ;;  %v177_v53 = vld [vmem:[%s10653_s2 + $0x3f0] sm:$0xff] }
  0x57   :  { %7437 = vmatprep.subr.mxu1 %v8348_v11 }
  0x59   :  { %7425 = vmatpush3.msra.mxu0 %v125_v56  ;;  %v7925_v56 = vpack.c.bf16 %v177_v53, %v176_v52  ;;  %v6601_v52 = vld [vmem:[%s10654_s3 + $0xb] ss:$0 sm:$0xff] }
  0x5a   :  { %7438 = vmatpush3.msra.mxu1 %v130_v59  ;;  %7427 = vmatmul.mubr.msk.f32.vlgmr.msra.gmra.mrb[14].mxu0 %vm411_vm1, %v8473_v19  ;;  %v178_v59 = vld [vmem:[%s10653_s2 + $0x3f8] sm:$0xff] }
  0x5b   :  { %7440 = vmatmul.mubr.msk.f32.vlgmr.msra.gmra.mrb[14].mxu1 %vm411_vm1, %v8473_v19  ;;  %7870 = vmatprep.subr.bf16.mxu0 %v8346_v3 }
  0x5c   :  { %7876 = vmatprep.subr.bf16.mxu1 %v8346_v3  ;;  %7872 = vmatpush3.bf16.msra.mxu0 %v7871_v60  ;;  %v179_v60 = vld [vmem:[%s10653_s2 + $0x400] sm:$0xff] }
  0x5d   :  { %7878 = vmatpush3.bf16.msra.mxu1 %v7877_v61  ;;  %7873 = vmatprep.subr.bf16.mxu0 %v8346_v3  ;;  %v7922_v61 = vpack.c.bf16 %v174_v58, %v173_v57  ;;  %v7928_v62 = vpack.c.bf16 %v179_v60, %v178_v59  ;;  %v6591_v58 = vld [vmem:[%s10654_s3 + $0x1] ss:$0 sm:$0xff] }
  0x5e   :  { %7879 = vmatprep.subr.bf16.mxu1 %v8346_v3  ;;  %7452 = vmatprep.mubr.msk.f32.mxu0 %vm8347_vm0, %v8348_v11 }
  0x5f   :  { %7465 = vmatprep.mubr.msk.f32.mxu1 %vm8347_vm0, %v8348_v11 }
  0x60   :  { %7875 = vmatpush3.bf16.msra.mxu0 %v7874_v2  ;;  %v186_v2 = vld [vmem:[%s10653_s2 + $0x438] sm:$0xff] }
  0x61   :  { %7881 = vmatpush3.bf16.msra.mxu1 %v7880_v4  ;;  %7450 = vmatprep.subr.mxu0 %v8348_v11  ;;  %v187_v4 = vld [vmem:[%s10653_s2 + $0x440] sm:$0xff] }
  0x62   :  { %7463 = vmatprep.subr.mxu1 %v8348_v11 }
  0x64   :  { %7451 = vmatpush3.msra.mxu0 %v135_v7  ;;  %v7937_v7 = vpack.c.bf16 %v187_v4, %v186_v2  ;;  %v6592_v2 = vld [vmem:[%s10654_s3 + $0x2] ss:$0 sm:$0xff] }
  0x65   :  { %7464 = vmatpush3.msra.mxu1 %v140_v10  ;;  %7453 = vmatmul.mubr.msk.f32.vlgmr.msra.gmra.mrb[16].mxu0 %vm411_vm1, %v8473_v19  ;;  %v188_v10 = vld [vmem:[%s10653_s2 + $0x448] sm:$0xff] }
  0x66   :  { %7466 = vmatmul.mubr.msk.f32.vlgmr.msra.gmra.mrb[16].mxu1 %vm411_vm1, %v8473_v19  ;;  %7882 = vmatprep.subr.bf16.mxu0 %v8346_v3 }
  0x67   :  { %7888 = vmatprep.subr.bf16.mxu1 %v8346_v3  ;;  %7884 = vmatpush3.bf16.msra.mxu0 %v7883_v12  ;;  %v189_v12 = vld [vmem:[%s10653_s2 + $0x450] sm:$0xff] }
  0x68   :  { %7890 = vmatpush3.bf16.msra.mxu1 %v7889_v13  ;;  %7885 = vmatprep.subr.bf16.mxu0 %v8346_v3  ;;  %v7934_v13 = vpack.c.bf16 %v184_v9, %v183_v8  ;;  %v7940_v14 = vpack.c.bf16 %v189_v12, %v188_v10 }
  0x69   :  { %7891 = vmatprep.subr.bf16.mxu1 %v8346_v3  ;;  %7478 = vmatprep.mubr.msk.f32.mxu0 %vm8347_vm0, %v8348_v11 }
  0x6a   :  { %7491 = vmatprep.mubr.msk.f32.mxu1 %vm8347_vm0, %v8348_v11 }
  0x6b   :  { %7887 = vmatpush3.bf16.msra.mxu0 %v7886_v18  ;;  %v196_v18 = vld [vmem:[%s10653_s2 + $0x488] sm:$0xff] }
  0x6c   :  { %7893 = vmatpush3.bf16.msra.mxu1 %v7892_v20  ;;  %7476 = vmatprep.subr.mxu0 %v8348_v11  ;;  %v197_v20 = vld [vmem:[%s10653_s2 + $0x490] sm:$0xff] }
  0x6d   :  { %7489 = vmatprep.subr.mxu1 %v8348_v11 }
  0x6f   :  { %7477 = vmatpush3.msra.mxu0 %v145_v23  ;;  %v7949_v23 = vpack.c.bf16 %v197_v20, %v196_v18 }
  0x70   :  { %7490 = vmatpush3.msra.mxu1 %v150_v26  ;;  %7479 = vmatmul.mubr.msk.f32.vlgmr.msra.gmra.mrb[18].mxu0 %vm411_vm1, %v8473_v19  ;;  %v198_v26 = vld [vmem:[%s10653_s2 + $0x498] sm:$0xff] }
  0x71   :  { %7492 = vmatmul.mubr.msk.f32.vlgmr.msra.gmra.mrb[18].mxu1 %vm411_vm1, %v8473_v19  ;;  %7894 = vmatprep.subr.bf16.mxu0 %v8346_v3 }
  0x72   :  { %7900 = vmatprep.subr.bf16.mxu1 %v8346_v3  ;;  %7896 = vmatpush3.bf16.msra.mxu0 %v7895_v27  ;;  %v199_v27 = vld [vmem:[%s10653_s2 + $0x4a0] sm:$0xff] }
  0x73   :  { %7902 = vmatpush3.bf16.msra.mxu1 %v7901_v28  ;;  %7897 = vmatprep.subr.bf16.mxu0 %v8346_v3  ;;  %v7946_v28 = vpack.c.bf16 %v194_v25, %v193_v24  ;;  %v7952_v29 = vpack.c.bf16 %v199_v27, %v198_v26  ;;  %v6606_v26 = vld [vmem:[%s10654_s3 + $0x10] ss:$0 sm:$0xff]  ;;  %v6607_v27 = vld [vmem:[%s10654_s3 + $0x11] ss:$0 sm:$0xff] }
  0x74   :  { %7903 = vmatprep.subr.bf16.mxu1 %v8346_v3  ;;  %7504 = vmatprep.mubr.msk.f32.mxu0 %vm8347_vm0, %v8348_v11 }
  0x75   :  { %7517 = vmatprep.mubr.msk.f32.mxu1 %vm8347_vm0, %v8348_v11 }
  0x76   :  { %7899 = vmatpush3.bf16.msra.mxu0 %v7898_v33 }
  0x77   :  { %7905 = vmatpush3.bf16.msra.mxu1 %v7904_v34  ;;  %7502 = vmatprep.subr.mxu0 %v8348_v11 }
  0x78   :  { %7515 = vmatprep.subr.mxu1 %v8348_v11 }
  0x7a   :  { %7503 = vmatpush3.msra.mxu0 %v155_v37 }
  0x7b   :  { %7516 = vmatpush3.msra.mxu1 %v160_v40  ;;  %7906 = vmatprep.subr.bf16.mxu0 %v8346_v3 }
  0x7c   :  { %7912 = vmatprep.subr.bf16.mxu1 %v8346_v3  ;;  %7505 = vmatmul.mubr.msk.f32.vlgmr.msra.gmra.mrb[20].mxu0 %vm411_vm1, %v8473_v19 }
  0x7d   :  { %7518 = vmatmul.mubr.msk.f32.vlgmr.msra.gmra.mrb[20].mxu1 %vm411_vm1, %v8473_v19  ;;  %7908 = vmatpush3.bf16.msra.mxu0 %v7907_v41 }
  0x7e   :  { %7914 = vmatpush3.bf16.msra.mxu1 %v7913_v42  ;;  %7909 = vmatprep.subr.bf16.mxu0 %v8346_v3 }
  0x7f   :  { %7915 = vmatprep.subr.bf16.mxu1 %v8346_v3  ;;  %7530 = vmatprep.mubr.msk.f32.mxu0 %vm8347_vm0, %v8348_v11 }
  0x80   :  { %7543 = vmatprep.mubr.msk.f32.mxu1 %vm8347_vm0, %v8348_v11 }
  0x81   :  { %7911 = vmatpush3.bf16.msra.mxu0 %v7910_v47 }
  0x82   :  { %7917 = vmatpush3.bf16.msra.mxu1 %v7916_v48  ;;  %7528 = vmatprep.subr.mxu0 %v8348_v11 }
  0x83   :  { %7541 = vmatprep.subr.mxu1 %v8348_v11 }
  0x85   :  { %7529 = vmatpush3.msra.mxu0 %v165_v51  ;;  %v6600_v51 = vld [vmem:[%s10654_s3 + $0xa] ss:$0 sm:$0xff] }
  0x86   :  { %7542 = vmatpush3.msra.mxu1 %v170_v54  ;;  %7918 = vmatprep.subr.bf16.mxu0 %v8346_v3  ;;  %v6590_v54 = vld [vmem:[%s10654_s3] ss:$0 sm:$0xff] }
  0x87   :  { %7924 = vmatprep.subr.bf16.mxu1 %v8346_v3  ;;  %7531 = vmatmul.mubr.msk.f32.vlgmr.msra.gmra.mrb[22].mxu0 %vm411_vm1, %v8473_v19 }
  0x88   :  { %7544 = vmatmul.mubr.msk.f32.vlgmr.msra.gmra.mrb[22].mxu1 %vm411_vm1, %v8473_v19  ;;  %7920 = vmatpush3.bf16.msra.mxu0 %v7919_v55 }
  0x89   :  { %7926 = vmatpush3.bf16.msra.mxu1 %v7925_v56  ;;  %7921 = vmatprep.subr.bf16.mxu0 %v8346_v3 }
  0x8a   :  { %7927 = vmatprep.subr.bf16.mxu1 %v8346_v3  ;;  %7556 = vmatprep.mubr.msk.f32.mxu0 %vm8347_vm0, %v8348_v11 }
  0x8b   :  { %7569 = vmatprep.mubr.msk.f32.mxu1 %vm8347_vm0, %v8348_v11 }
  0x8c   :  { %7923 = vmatpush3.bf16.msra.mxu0 %v7922_v61 }
  0x8d   :  { %7929 = vmatpush3.bf16.msra.mxu1 %v7928_v62  ;;  %7554 = vmatprep.subr.mxu0 %v8348_v11 }
  0x8e   :  { %7567 = vmatprep.subr.mxu1 %v8348_v11 }
  0x90   :  { %7555 = vmatpush3.msra.mxu0 %v175_v1 }
  0x91   :  { %7568 = vmatpush3.msra.mxu1 %v180_v5  ;;  %7930 = vmatprep.subr.bf16.mxu0 %v8346_v3 }
  0x92   :  { %7936 = vmatprep.subr.bf16.mxu1 %v8346_v3  ;;  %7557 = vmatmul.mubr.msk.f32.vlgmr.msra.gmra.mrb[24].mxu0 %vm411_vm1, %v8473_v19 }
  0x93   :  { %7570 = vmatmul.mubr.msk.f32.vlgmr.msra.gmra.mrb[24].mxu1 %vm411_vm1, %v8473_v19  ;;  %7932 = vmatpush3.bf16.msra.mxu0 %v7931_v6 }
  0x94   :  { %7938 = vmatpush3.bf16.msra.mxu1 %v7937_v7  ;;  %7933 = vmatprep.subr.bf16.mxu0 %v8346_v3  ;;  %v6593_v7 = vld [vmem:[%s10654_s3 + $0x3] ss:$0 sm:$0xff] }
  0x95   :  { %7939 = vmatprep.subr.bf16.mxu1 %v8346_v3  ;;  %7582 = vmatprep.mubr.msk.f32.mxu0 %vm8347_vm0, %v8348_v11 }
  0x96   :  { %7595 = vmatprep.mubr.msk.f32.mxu1 %vm8347_vm0, %v8348_v11 }
  0x97   :  { %7935 = vmatpush3.bf16.msra.mxu0 %v7934_v13  ;;  %v6604_v13 = vld [vmem:[%s10654_s3 + $0xe] ss:$0 sm:$0xff] }
  0x98   :  { %7941 = vmatpush3.bf16.msra.mxu1 %v7940_v14  ;;  %7580 = vmatprep.subr.mxu0 %v8348_v11  ;;  %v6605_v14 = vld [vmem:[%s10654_s3 + $0xf] ss:$0 sm:$0xff] }
  0x99   :  { %7593 = vmatprep.subr.mxu1 %v8348_v11 }
  0x9b   :  { %7581 = vmatpush3.msra.mxu0 %v185_v17 }
  0x9c   :  { %7594 = vmatpush3.msra.mxu1 %v190_v21  ;;  %7942 = vmatprep.subr.bf16.mxu0 %v8346_v3  ;;  %v6595_v21 = vld [vmem:[%s10654_s3 + $0x5] ss:$0 sm:$0xff] }
  0x9d   :  { %7948 = vmatprep.subr.bf16.mxu1 %v8346_v3  ;;  %7583 = vmatmul.mubr.msk.f32.vlgmr.msra.gmra.mrb[26].mxu0 %vm411_vm1, %v8473_v19 }
  0x9e   :  { %7596 = vmatmul.mubr.msk.f32.vlgmr.msra.gmra.mrb[26].mxu1 %vm411_vm1, %v8473_v19  ;;  %7944 = vmatpush3.bf16.msra.mxu0 %v7943_v22 }
  0x9f   :  { %7950 = vmatpush3.bf16.msra.mxu1 %v7949_v23  ;;  %7945 = vmatprep.subr.bf16.mxu0 %v8346_v3 }
  0xa0   :  { %7951 = vmatprep.subr.bf16.mxu1 %v8346_v3  ;;  %7608 = vmatprep.mubr.msk.f32.mxu0 %vm8347_vm0, %v8348_v11  ;;  %v200_v3 = vld [vmem:[%s10653_s2 + $0x4a8] sm:$0xff] }
  0xa1   :  { %7621 = vmatprep.mubr.msk.f32.mxu1 %vm8347_vm0, %v8348_v11 }
  0xa2   :  { %7947 = vmatpush3.bf16.msra.mxu0 %v7946_v28 }
  0xa3   :  { %7953 = vmatpush3.bf16.msra.mxu1 %v7952_v29  ;;  %7606 = vmatprep.subr.mxu0 %v8348_v11  ;;  %v6596_v29 = vld [vmem:[%s10654_s3 + $0x6] ss:$0 sm:$0xff] }
  0xa4   :  { %7619 = vmatprep.subr.mxu1 %v8348_v11 }
  0xa6   :  { %7607 = vmatpush3.msra.mxu0 %v195_v30 }
  0xa7   :  { %7620 = vmatpush3.msra.mxu1 %v200_v3  ;;  %7609 = vmatmul.mubr.msk.f32.vlgmr.msra.gmra.mrb[28].mxu0 %vm411_vm1, %v8473_v19 }
  0xa8   :  { %7622 = vmatmul.mubr.msk.f32.vlgmr.msra.gmra.mrb[28].mxu1 %vm411_vm1, %v8473_v19  ;;  %7624 = vmatprep.subr.mxu0 %v8348_v11 }
  0xa9   :  { %7629 = vmatprep.subr.mxu1 %v8348_v11  ;;  %7626 = vmatprep.mubr.msk.f32.mxu0 %vm8347_vm0, %v8348_v11 }
  0xaa   :  { %7631 = vmatprep.mubr.msk.f32.mxu1 %vm8347_vm0, %v8348_v11 }
  0xe0   :  { %v481_v31 = vpop.f32.mrb[0].mxu0 }
  0xe1   :  { %v7246_v32 = vpop.f32.mrb[1].mxu0  ;;  %v482_v61 = vadd.f32 %v6590_v54, %v481_v31 }
  0xe2   :  { %v551_v33 = vpop.f32.mrb[0].mxu1  ;;  %v6597_v32 = vld [vmem:[%s10654_s3 + $0x7] ss:$0 sm:$0xff] }
  0xe3   :  { %v7259_v34 = vpop.f32.mrb[1].mxu1  ;;  %v552_v62 = vadd.f32 %v6591_v58, %v551_v33 }
  0xeb   :  { %v621_v35 = vpop.f32.mrb[2].mxu0 }
  0xec   :  { %v7272_v36 = vpop.f32.mrb[3].mxu0  ;;  %v622_v10 = vadd.f32 %v6592_v2, %v621_v35 }
  0xed   :  { %v691_v37 = vpop.f32.mrb[2].mxu1 }
  0xee   :  { %v7285_v38 = vpop.f32.mrb[3].mxu1  ;;  %v692_v12 = vadd.f32 %v6593_v7, %v691_v37  ;;  %v6608_v37 = vld [vmem:[%s10654_s3 + $0x12] ss:$0 sm:$0xff] }
  0xef   :  { %v6609_v38 = vld [vmem:[%s10654_s3 + $0x13] ss:$0 sm:$0xff] }
  0xf6   :  { %v9099_v39 = vpop.f32.mrb[4].mxu0 }
  0xf7   :  { %v7298_v40 = vpop.f32.mrb[5].mxu0  ;;  %v762_v24 = vadd.f32 %v6594_v16, %v9099_v39 }
  0xf8   :  { %v9101_v41 = vpop.f32.mrb[4].mxu1  ;;  %v6598_v40 = vld [vmem:[%s10654_s3 + $0x8] ss:$0 sm:$0xff] }
  0xf9   :  { %v7311_v42 = vpop.f32.mrb[5].mxu1  ;;  %v832_v25 = vadd.f32 %v6595_v21, %v9101_v41 }
 0x101   :  { %v9103_v43 = vpop.f32.mrb[6].mxu0 }
 0x102   :  { %v7324_v44 = vpop.f32.mrb[7].mxu0  ;;  %v902_v35 = vadd.f32 %v6596_v29, %v9103_v43 }
 0x103   :  { %v9105_v45 = vpop.f32.mrb[6].mxu1  ;;  %v6599_v44 = vld [vmem:[%s10654_s3 + $0x9] ss:$0 sm:$0xff] }
 0x104   :  { %v7337_v46 = vpop.f32.mrb[7].mxu1  ;;  %v972_v36 = vadd.f32 %v6597_v32, %v9105_v45 }
 0x10c   :  { %v9107_v47 = vpop.f32.mrb[8].mxu0 }
 0x10d   :  { %v7350_v48 = vpop.f32.mrb[9].mxu0 }
 0x10e   :  { %v9109_v49 = vpop.f32.mrb[8].mxu1  ;;  %v1042_v48 = vadd.f32 %v6598_v40, %v9107_v47  ;;  %v6610_v47 = vld [vmem:[%s10654_s3 + $0x14] ss:$0 sm:$0xff] }
 0x10f   :  { %v7363_v50 = vpop.f32.mrb[9].mxu1 }
 0x110   :  { %v1112_v50 = vadd.f32 %v6599_v44, %v9109_v49  ;;  %v6611_v49 = vld [vmem:[%s10654_s3 + $0x15] ss:$0 sm:$0xff] }
 0x117   :  { %v1181_v53 = vpop.f32.mrb[10].mxu0 }
 0x118   :  { %v1182_v55 = vadd.f32 %v6600_v51, %v1181_v53  ;;  %v1251_v56 = vpop.f32.mrb[10].mxu1  ;;  %v7376_v57 = vpop.f32.mrb[11].mxu0 }
 0x119   :  { %v1252_v59 = vadd.f32 %v6601_v52, %v1251_v56  ;;  %v7389_v60 = vpop.f32.mrb[11].mxu1 }
 0x11a   :  { %7625 = vmatpush3.xpose.msk.msra.mxu0 %vm2515_vm2, %v1182_v55 }
 0x11b   :  { %7630 = vmatpush3.xpose.msk.msra.mxu1 %vm2515_vm2, %v1252_v59  ;;  %7634 = vmatprep.subr.mxu0 %v8348_v11 }
 0x11c   :  { %7639 = vmatprep.subr.mxu1 %v8348_v11 }
 0x11d   :  { %7627 = vmatmul.mubr.msk.f32.vlgmr.msra.gmra.mrb[30].mxu0 %vm2515_vm2, %v482_v61 }
 0x11e   :  { %7632 = vmatmul.mubr.msk.f32.vlgmr.msra.gmra.mrb[30].mxu1 %vm2515_vm2, %v552_v62  ;;  %7636 = vmatprep.mubr.msk.f32.mxu0 %vm8347_vm0, %v8348_v11 }
 0x11f   :  { %7641 = vmatprep.mubr.msk.f32.mxu1 %vm8347_vm0, %v8348_v11 }
 0x122   :  { %v1321_v1 = vpop.f32.mrb[12].mxu0 }
 0x123   :  { %v1322_v4 = vadd.f32 %v6602_v63, %v1321_v1  ;;  %v1391_v5 = vpop.f32.mrb[12].mxu1  ;;  %v7402_v6 = vpop.f32.mrb[13].mxu0 }
 0x124   :  { %v1392_v8 = vadd.f32 %v6603_v0, %v1391_v5  ;;  %v7415_v9 = vpop.f32.mrb[13].mxu1 }
 0x125   :  { %7635 = vmatpush3.xpose.msk.msra.mxu0 %vm2515_vm2, %v1322_v4 }
 0x126   :  { %7640 = vmatpush3.xpose.msk.msra.mxu1 %vm2515_vm2, %v1392_v8  ;;  %7644 = vmatprep.subr.mxu0 %v8348_v11 }
 0x127   :  { %7649 = vmatprep.subr.mxu1 %v8348_v11 }
 0x128   :  { %7637 = vmatmul.mubr.msk.f32.vlgmr.msra.gmra.mrb[32].mxu0 %vm2515_vm2, %v622_v10  ;;  %v3286_v10 = vlaneseq }
 0x129   :  { %7642 = vmatmul.mubr.msk.f32.vlgmr.msra.gmra.mrb[32].mxu1 %vm2515_vm2, %v692_v12  ;;  %7646 = vmatprep.mubr.msk.f32.mxu0 %vm8347_vm0, %v8348_v11 }
 0x12a   :  { %7651 = vmatprep.mubr.msk.f32.mxu1 %vm8347_vm0, %v8348_v11  ;;  %v9251_v12 = vshrl.u32 %v3286_v10, 7 }
 0x12d   :  { %v1461_v15 = vpop.f32.mrb[14].mxu0 }
 0x12e   :  { %v1462_v17 = vadd.f32 %v6604_v13, %v1461_v15  ;;  %v1531_v18 = vpop.f32.mrb[14].mxu1  ;;  %v7428_v20 = vpop.f32.mrb[15].mxu0  ;;  %v3289_v13 = vand.u32 127, %v3286_v10 }
 0x12f   :  { %v1532_v22 = vadd.f32 %v6605_v14, %v1531_v18  ;;  %v7441_v23 = vpop.f32.mrb[15].mxu1 }
 0x130   :  { %7645 = vmatpush3.xpose.msk.msra.mxu0 %vm2515_vm2, %v1462_v17  ;;  %vm9254_vm3 = vcmp.le.s32.totalorder %v3289_v13, %v9251_v12 }
 0x131   :  { %7650 = vmatpush3.xpose.msk.msra.mxu1 %vm2515_vm2, %v1532_v22  ;;  %7654 = vmatprep.subr.mxu0 %v8348_v11 }
 0x132   :  { %7659 = vmatprep.subr.mxu1 %v8348_v11 }
 0x133   :  { %7647 = vmatmul.mubr.msk.f32.vlgmr.msra.gmra.mrb[34].mxu0 %vm2515_vm2, %v762_v24 }
 0x134   :  { %7652 = vmatmul.mubr.msk.f32.vlgmr.msra.gmra.mrb[34].mxu1 %vm2515_vm2, %v832_v25  ;;  %7656 = vmatprep.mubr.msk.f32.mxu0 %vm8347_vm0, %v8348_v11 }
 0x135   :  { %7661 = vmatprep.mubr.msk.f32.mxu1 %vm8347_vm0, %v8348_v11 }
 0x138   :  { %v1601_v28 = vpop.f32.mrb[16].mxu0 }
 0x139   :  { %v1602_v30 = vadd.f32 %v6606_v26, %v1601_v28  ;;  %v1671_v3 = vpop.f32.mrb[16].mxu1  ;;  %v7454_v31 = vpop.f32.mrb[17].mxu0 }
 0x13a   :  { %v1672_v33 = vadd.f32 %v6607_v27, %v1671_v3  ;;  %v7467_v34 = vpop.f32.mrb[17].mxu1 }
 0x13b   :  { %7655 = vmatpush3.xpose.msk.msra.mxu0 %vm2515_vm2, %v1602_v30 }
 0x13c   :  { %7660 = vmatpush3.xpose.msk.msra.mxu1 %vm2515_vm2, %v1672_v33  ;;  %7664 = vmatprep.subr.mxu0 %v8348_v11 }
 0x13d   :  { %7669 = vmatprep.subr.mxu1 %v8348_v11 }
 0x13e   :  { %7657 = vmatmul.mubr.msk.f32.vlgmr.msra.gmra.mrb[36].mxu0 %vm2515_vm2, %v902_v35 }
 0x13f   :  { %7662 = vmatmul.mubr.msk.f32.vlgmr.msra.gmra.mrb[36].mxu1 %vm2515_vm2, %v972_v36  ;;  %7666 = vmatprep.mubr.msk.f32.mxu0 %vm8347_vm0, %v8348_v11 }
 0x140   :  { %7671 = vmatprep.mubr.msk.f32.mxu1 %vm8347_vm0, %v8348_v11 }
 0x143   :  { %v1741_v39 = vpop.f32.mrb[18].mxu0 }
 0x144   :  { %v1742_v41 = vadd.f32 %v6608_v37, %v1741_v39  ;;  %v1811_v42 = vpop.f32.mrb[18].mxu1  ;;  %v7480_v43 = vpop.f32.mrb[19].mxu0 }
 0x145   :  { %v1812_v45 = vadd.f32 %v6609_v38, %v1811_v42  ;;  %v7493_v46 = vpop.f32.mrb[19].mxu1 }
 0x146   :  { %7665 = vmatpush3.xpose.msk.msra.mxu0 %vm2515_vm2, %v1742_v41 }
 0x147   :  { %7670 = vmatpush3.xpose.msk.msra.mxu1 %vm2515_vm2, %v1812_v45  ;;  %7674 = vmatprep.subr.mxu0 %v8348_v11 }
 0x148   :  { %7679 = vmatprep.subr.mxu1 %v8348_v11 }
 0x149   :  { %7667 = vmatmul.mubr.msk.f32.vlgmr.msra.gmra.mrb[38].mxu0 %vm2515_vm2, %v1042_v48 }
 0x14a   :  { %7672 = vmatmul.mubr.msk.f32.vlgmr.msra.gmra.mrb[38].mxu1 %vm2515_vm2, %v1112_v50  ;;  %7676 = vmatprep.mubr.msk.f32.mxu0 %vm8347_vm0, %v8348_v11 }
 0x14b   :  { %7681 = vmatprep.mubr.msk.f32.mxu1 %vm8347_vm0, %v8348_v11 }
 0x14f   :  { %v1881_v51 = vpop.f32.mrb[20].mxu0 }
 0x150   :  { %v1882_v52 = vadd.f32 %v6610_v47, %v1881_v51  ;;  %v7506_v53 = vpop.f32.mrb[21].mxu0  ;;  %v1951_v54 = vpop.f32.mrb[20].mxu1 }
 0x151   :  { %v1952_v55 = vadd.f32 %v6611_v49, %v1951_v54  ;;  %v7519_v56 = vpop.f32.mrb[21].mxu1 }
 0x152   :  { %7675 = vmatpush3.msra.mxu0 %v1882_v52 }
 0x153   :  { %7680 = vmatpush3.msra.mxu1 %v1952_v55  ;;  %7684 = vmatprep.subr.mxu0 %v8348_v11 }
 0x154   :  { %7689 = vmatprep.subr.mxu1 %v8348_v11 }
 0x15a   :  { %v9235_v57 = vpop.f32.mrb[22].mxu0 }
 0x15b   :  { %v7532_v58 = vpop.f32.mrb[23].mxu0  ;;  %v9237_v59 = vpop.f32.mrb[22].mxu1 }
 0x15c   :  { %v7545_v60 = vpop.f32.mrb[23].mxu1 }
 0x165   :  { %v9239_v61 = vpop.f32.mrb[24].mxu0 }
 0x166   :  { %v7558_v62 = vpop.f32.mrb[25].mxu0  ;;  %v9241_v63 = vpop.f32.mrb[24].mxu1 }
 0x167   :  { %v7571_v0 = vpop.f32.mrb[25].mxu1 }
 0x170   :  { %v9243_v1 = vpop.f32.mrb[26].mxu0 }
 0x171   :  { %v9245_v2 = vpop.f32.mrb[26].mxu1  ;;  %v7584_v4 = vpop.f32.mrb[27].mxu0 }
 0x172   :  { %v7597_v5 = vpop.f32.mrb[27].mxu1 }
 0x17a   :  { %v9247_v6 = vpop.f32.mrb[28].mxu0 }
 0x17b   :  { %v9249_v7 = vpop.f32.mrb[28].mxu1  ;;  %v7610_v8 = vpop.f32.mrb[29].mxu0 }
 0x17c   :  { %v7623_v9 = vpop.f32.mrb[29].mxu1 }
 0x1f0   :  { %v2588_v14 = vpop.f32.mrb[30].mxu0 }
 0x1f1   :  { %v3276_v16 = vmul.f32 0.5, %v2588_v14  ;;  %v2664_v17 = vpop.f32.mrb[30].mxu1  ;;  %v7628_v18 = vpop.f32.mrb[31].mxu0 }
 0x1f2   :  { %v3277_v20 = vmul.f32 0.5, %v2664_v17  ;;  %v7633_v21 = vpop.f32.mrb[31].mxu1 }
 0x1f3   :  { %v3291_v22 = vsel %vm9254_vm3, %v3276_v16, -1e+30 }
 0x1f4   :  { %v3302_v23 = vsel %vm3301_vm4, %v3291_v22, -inf  ;;  %v3292_v24 = vsel %vm9254_vm3, %v3277_v20, -1e+30 }
 0x1f5   :  { %3303 = vmax.xlane.f32.xlu0 %v3302_v23  ;;  %v3305_v25 = vsel %vm3301_vm4, %v3292_v24, -inf }
 0x1f9   :  { %3306 = vmax.xlane.f32.xlu0 %v3305_v25 }
 0x1fb   :  { %v2740_v26 = vpop.f32.mrb[32].mxu0 }
 0x1fc   :  { %v3278_v27 = vmul.f32 0.5, %v2740_v26  ;;  %v2816_v28 = vpop.f32.mrb[32].mxu1  ;;  %v7638_v29 = vpop.f32.mrb[33].mxu0 }
 0x1fd   :  { %v3279_v30 = vmul.f32 0.5, %v2816_v28  ;;  %v7643_v3 = vpop.f32.mrb[33].mxu1 }
 0x1fe   :  { %v3293_v31 = vsel %vm9254_vm3, %v3278_v27, -1e+30 }
 0x1ff   :  { %v3308_v32 = vsel %vm3301_vm4, %v3293_v31, -inf  ;;  %v3294_v33 = vsel %vm9254_vm3, %v3279_v30, -1e+30 }
 0x200   :  { %3309 = vmax.xlane.f32.xlu1 %v3308_v32  ;;  %v3311_v34 = vsel %vm3301_vm4, %v3294_v33, -inf }
 0x204   :  { %3312 = vmax.xlane.f32.xlu1 %v3311_v34 }
 0x206   :  { %v2892_v35 = vpop.f32.mrb[34].mxu0 }
 0x207   :  { %v3280_v36 = vmul.f32 0.5, %v2892_v35  ;;  %v2968_v37 = vpop.f32.mrb[34].mxu1  ;;  %v7648_v38 = vpop.f32.mrb[35].mxu0 }
 0x208   :  { %v3281_v39 = vmul.f32 0.5, %v2968_v37  ;;  %v7653_v40 = vpop.f32.mrb[35].mxu1 }
 0x209   :  { %v3295_v41 = vsel %vm9254_vm3, %v3280_v36, -1e+30 }
 0x20a   :  { %v3296_v42 = vsel %vm9254_vm3, %v3281_v39, -1e+30  ;;  %v3314_v43 = vsel %vm3301_vm4, %v3295_v41, -inf }
 0x20b   :  { %v3317_v44 = vsel %vm3301_vm4, %v3296_v42, -inf  ;;  %3315 = vmax.xlane.f32.xlu0 %v3314_v43 }
 0x20c   :  { %3318 = vmax.xlane.f32.xlu1 %v3317_v44 }
 0x211   :  { %v3044_v45 = vpop.f32.mrb[36].mxu0 }
 0x212   :  { %v3282_v46 = vmul.f32 0.5, %v3044_v45  ;;  %v3120_v48 = vpop.f32.mrb[36].mxu1  ;;  %v7658_v50 = vpop.f32.mrb[37].mxu0 }
 0x213   :  { %v3283_v47 = vmul.f32 0.5, %v3120_v48  ;;  %v7663_v49 = vpop.f32.mrb[37].mxu1 }
 0x214   :  { %v3297_v51 = vsel %vm9254_vm3, %v3282_v46, -1e+30 }
 0x215   :  { %v3298_v52 = vsel %vm9254_vm3, %v3283_v47, -1e+30  ;;  %v3320_v53 = vsel %vm3301_vm4, %v3297_v51, -inf }
 0x216   :  { %v3323_v54 = vsel %vm3301_vm4, %v3298_v52, -inf  ;;  %3321 = vmax.xlane.f32.xlu0 %v3320_v53 }
 0x217   :  { %3324 = vmax.xlane.f32.xlu1 %v3323_v54 }
 0x21c   :  { %v3196_v55 = vpop.f32.mrb[38].mxu0 }
 0x21d   :  { %v3284_v56 = vmul.f32 0.5, %v3196_v55  ;;  %v3272_v58 = vpop.f32.mrb[38].mxu1  ;;  %v7668_v60 = vpop.f32.mrb[39].mxu0 }
 0x21e   :  { %v3285_v62 = vmul.f32 0.5, %v3272_v58  ;;  %v7673_v0 = vpop.f32.mrb[39].mxu1 }
 0x21f   :  { %v3299_v4 = vsel %vm9254_vm3, %v3284_v56, -1e+30 }
 0x220   :  { %v3300_v5 = vsel %vm9254_vm3, %v3285_v62, -1e+30  ;;  %v3326_v8 = vsel %vm3301_vm4, %v3299_v4, -inf }
 0x221   :  { %v3329_v9 = vsel %vm3301_vm4, %v3300_v5, -inf  ;;  %3327 = vmax.xlane.f32.xlu0 %v3326_v8 }
 0x222   :  { %3330 = vmax.xlane.f32.xlu1 %v3329_v9  ;;  %v6612_v9 = vld [vmem:[%s10654_s3 + $0x16] ss:$0 sm:$0xff] }
 0x282   :  { %v3304_v10 = vpop.xlane.xlu0 %3303 }
 0x283   :  { %v3332_v13 = vsub.f32 %v3291_v22, %v3304_v10 }
 0x285   :  { %v3342_v14 = vmul.f32 1.442695, %v3332_v13 }
 0x286   :  { %v3307_v16 = vpop.xlane.xlu0 %3306 }
 0x287   :  { %8278 = vpow2.f32 %v3342_v14  ;;  %v3333_v17 = vsub.f32 %v3292_v24, %v3307_v16  ;;  %v2022_v16 = vadd.f32 %v6612_v9, %v9235_v57  ;;  %v6614_v57 = vld [vmem:[%s10654_s3 + $0x18] ss:$0 sm:$0xff] }
 0x289   :  { %v3344_v18 = vmul.f32 1.442695, %v3333_v17  ;;  %v6613_v17 = vld [vmem:[%s10654_s3 + $0x17] ss:$0 sm:$0xff] }
 0x28b   :  { %8280 = vpow2.f32 %v3344_v18 }
 0x28d   :  { %v3310_v20 = vpop.xlane.xlu1 %3309 }
 0x28e   :  { %v3334_v21 = vsub.f32 %v3293_v31, %v3310_v20 }
 0x290   :  { %v3346_v23 = vmul.f32 1.442695, %v3334_v21 }
 0x291   :  { %v9288_v25 = vpop.eup %8278  ;;  %v3313_v15 = vpop.xlane.xlu1 %3312 }
 0x292   :  { %8282 = vpow2.f32 %v3346_v23  ;;  %v3335_v26 = vsub.f32 %v3294_v33, %v3313_v15  ;;  %v3362_v27 = vsel %vm3301_vm4, %v9288_v25, 0.0  ;;  %v2092_v23 = vadd.f32 %v6613_v17, %v9237_v59  ;;  %v4151_v17 = vld [vmem:[%s10655_s4 + $0x24] sm:$0xf] }
 0x293   :  { %3363 = vadd.xlane.f32.xlu0 %v3362_v27  ;;  %v2162_v59 = vadd.f32 %v6614_v57, %v9239_v61  ;;  %v6616_v61 = vld [vmem:[%s10654_s3 + $0x1a] ss:$0 sm:$0xff] }
 0x294   :  { %v3348_v28 = vmul.f32 1.442695, %v3335_v26 }
 0x295   :  { %v9292_v22 = vpop.eup %8280 }
 0x296   :  { %8284 = vpow2.f32 %v3348_v28  ;;  %v3365_v24 = vsel %vm3301_vm4, %v9292_v22, 0.0  ;;  %v6615_v28 = vld [vmem:[%s10654_s3 + $0x19] ss:$0 sm:$0xff] }
 0x297   :  { %3366 = vadd.xlane.f32.xlu1 %v3365_v24 }
 0x298   :  { %v3316_v29 = vpop.xlane.xlu0 %3315 }
 0x299   :  { %v3319_v30 = vpop.xlane.xlu1 %3318  ;;  %v3336_v3 = vsub.f32 %v3295_v41, %v3316_v29  ;;  %v2232_v29 = vadd.f32 %v6615_v28, %v9241_v63 }
 0x29a   :  { %v3337_v31 = vsub.f32 %v3296_v42, %v3319_v30 }
 0x29b   :  { %v3350_v32 = vmul.f32 1.442695, %v3336_v3  ;;  %v6617_v3 = vld [vmem:[%s10654_s3 + $0x1b] ss:$0 sm:$0xff] }
 0x29c   :  { %v9296_v34 = vpop.eup %8282  ;;  %v3352_v33 = vmul.f32 1.442695, %v3337_v31 }
 0x29d   :  { %8286 = vpow2.f32 %v3350_v32  ;;  %v3368_v35 = vsel %vm3301_vm4, %v9296_v34, 0.0 }
 0x29e   :  { %8288 = vpow2.f32 %v3352_v33  ;;  %3369 = vadd.xlane.f32.xlu0 %v3368_v35  ;;  %v2302_v33 = vadd.f32 %v6616_v61, %v9243_v1  ;;  %v6618_v1 = vld [vmem:[%s10654_s3 + $0x1c] ss:$0 sm:$0xff] }
 0x2a0   :  { %v9300_v36 = vpop.eup %8284 }
 0x2a1   :  { %v3371_v37 = vsel %vm3301_vm4, %v9300_v36, 0.0 }
 0x2a2   :  { %3372 = vadd.xlane.f32.xlu1 %v3371_v37  ;;  %v6619_v37 = vld [vmem:[%s10654_s3 + $0x1d] ss:$0 sm:$0xff] }
 0x2a3   :  { %v3322_v38 = vpop.xlane.xlu0 %3321 }
 0x2a4   :  { %v3325_v39 = vpop.xlane.xlu1 %3324  ;;  %v3338_v40 = vsub.f32 %v3297_v51, %v3322_v38 }
 0x2a5   :  { %v3339_v41 = vsub.f32 %v3298_v52, %v3325_v39 }
 0x2a6   :  { %v3354_v42 = vmul.f32 1.442695, %v3338_v40 }
 0x2a7   :  { %v9304_v43 = vpop.eup %8286  ;;  %v3356_v44 = vmul.f32 1.442695, %v3339_v41 }
 0x2a8   :  { %v9306_v45 = vpop.eup %8288  ;;  %8290 = vpow2.f32 %v3354_v42  ;;  %v3374_v46 = vsel %vm3301_vm4, %v9304_v43, 0.0  ;;  %v2442_v42 = vadd.f32 %v6618_v1, %v9247_v6 }
 0x2a9   :  { %8292 = vpow2.f32 %v3356_v44  ;;  %v3377_v48 = vsel %vm3301_vm4, %v9306_v45, 0.0  ;;  %3375 = vadd.xlane.f32.xlu0 %v3374_v46  ;;  %v2512_v44 = vadd.f32 %v6619_v37, %v9249_v7 }
 0x2aa   :  { %3378 = vadd.xlane.f32.xlu1 %v3377_v48  ;;  %v4142_v48 = vld [vmem:[%s10655_s4] sm:$0xf] }
 0x2ae   :  { %v3328_v50 = vpop.xlane.xlu0 %3327 }
 0x2af   :  { %v3331_v47 = vpop.xlane.xlu1 %3330  ;;  %v3340_v49 = vsub.f32 %v3299_v4, %v3328_v50  ;;  %v4143_v50 = vld [vmem:[%s10655_s4 + $0x4] sm:$0xf] }
 0x2b0   :  { %v3341_v51 = vsub.f32 %v3300_v5, %v3331_v47  ;;  %v4144_v47 = vld [vmem:[%s10655_s4 + $0x8] sm:$0xf] }
 0x2b1   :  { %v3358_v52 = vmul.f32 1.442695, %v3340_v49 }
 0x2b2   :  { %v9312_v53 = vpop.eup %8290  ;;  %v3360_v54 = vmul.f32 1.442695, %v3341_v51 }
 0x2b3   :  { %v9314_v55 = vpop.eup %8292  ;;  %8294 = vpow2.f32 %v3358_v52  ;;  %v3380_v56 = vsel %vm3301_vm4, %v9312_v53, 0.0  ;;  %v4145_v52 = vld [vmem:[%s10655_s4 + $0xc] sm:$0xf] }
 0x2b4   :  { %8296 = vpow2.f32 %v3360_v54  ;;  %v3383_v58 = vsel %vm3301_vm4, %v9314_v55, 0.0  ;;  %3381 = vadd.xlane.f32.xlu0 %v3380_v56 }
 0x2b5   :  { %3384 = vadd.xlane.f32.xlu1 %v3383_v58 }
 0x2bd   :  { %v9320_v60 = vpop.eup %8294 }
 0x2be   :  { %v9322_v62 = vpop.eup %8296  ;;  %v3386_v0 = vsel %vm3301_vm4, %v9320_v60, 0.0 }
 0x2bf   :  { %v3389_v4 = vsel %vm3301_vm4, %v9322_v62, 0.0  ;;  %3387 = vadd.xlane.f32.xlu0 %v3386_v0 }
 0x2c0   :  { %3390 = vadd.xlane.f32.xlu1 %v3389_v4  ;;  %v4148_v4 = vld [vmem:[%s10655_s4 + $0x18] sm:$0xf] }
 0x320   :  { %v3364_v5 = vpop.xlane.xlu0 %3363 }
 0x321   :  { %8298 = vrcp.f32 %v3364_v5 }
 0x324   :  { %v3367_v8 = vpop.xlane.xlu1 %3366 }
 0x325   :  { %8300 = vrcp.f32 %v3367_v8  ;;  %v4149_v8 = vld [vmem:[%s10655_s4 + $0x1c] sm:$0xf] }
 0x32b   :  { %v8299_v10 = vpop.eup %8298  ;;  %v3370_v13 = vpop.xlane.xlu0 %3369 }
 0x32c   :  { %v3402_v14 = vmul.f32 %v8299_v10, %v9288_v25  ;;  %8302 = vrcp.f32 %v3370_v13 }
 0x32e   :  { %7677 = vmatmul.mubr.msk.f32.vlgmr.msra.gmra.mrb[40].mxu0 %vm3301_vm4, %v3402_v14  ;;  %v4150_v14 = vld [vmem:[%s10655_s4 + $0x20] sm:$0xf] }
 0x32f   :  { %v8301_v18 = vpop.eup %8300  ;;  %v3373_v20 = vpop.xlane.xlu1 %3372  ;;  %7685 = vmatpush3.msra.mxu0 %v2022_v16  ;;  %7686 = vmatprep.mubr.msk.f32.mxu0 %vm8347_vm0, %v8348_v11 }
 0x330   :  { %v3403_v21 = vmul.f32 %v8301_v18, %v9292_v22  ;;  %8304 = vrcp.f32 %v3373_v20  ;;  %7694 = vmatprep.subr.mxu0 %v8348_v11 }
 0x332   :  { %7682 = vmatmul.mubr.msk.f32.vlgmr.msra.gmra.mrb[40].mxu1 %vm3301_vm4, %v3403_v21 }
 0x333   :  { %7690 = vmatpush3.msra.mxu1 %v2092_v23  ;;  %7691 = vmatprep.mubr.msk.f32.mxu1 %vm8347_vm0, %v8348_v11 }
 0x334   :  { %7699 = vmatprep.subr.mxu1 %v8348_v11 }
 0x336   :  { %v8303_v25 = vpop.eup %8302  ;;  %v3376_v15 = vpop.xlane.xlu0 %3375 }
 0x337   :  { %v3404_v26 = vmul.f32 %v8303_v25, %v9296_v34  ;;  %v3379_v27 = vpop.xlane.xlu1 %3378  ;;  %8306 = vrcp.f32 %v3376_v15 }
 0x338   :  { %8308 = vrcp.f32 %v3379_v27 }
 0x339   :  { %7687 = vmatmul.mubr.msk.f32.vlgmr.msra.gmra.mrb[42].mxu0 %vm3301_vm4, %v3404_v26 }
 0x33a   :  { %v8305_v22 = vpop.eup %8304  ;;  %7695 = vmatpush3.msra.mxu0 %v2162_v59  ;;  %7696 = vmatprep.mubr.msk.f32.mxu0 %vm8347_vm0, %v8348_v11 }
 0x33b   :  { %v3405_v24 = vmul.f32 %v8305_v22, %v9300_v36  ;;  %7704 = vmatprep.subr.mxu0 %v8348_v11  ;;  %v2372_v36 = vadd.f32 %v6617_v3, %v9245_v2 }
 0x33d   :  { %7692 = vmatmul.mubr.msk.f32.vlgmr.msra.gmra.mrb[42].mxu1 %vm3301_vm4, %v3405_v24 }
 0x33e   :  { %7700 = vmatpush3.msra.mxu1 %v2232_v29  ;;  %7701 = vmatprep.mubr.msk.f32.mxu1 %vm8347_vm0, %v8348_v11 }
 0x33f   :  { %7709 = vmatprep.subr.mxu1 %v8348_v11 }
 0x341   :  { %v8307_v30 = vpop.eup %8306  ;;  %v3382_v31 = vpop.xlane.xlu0 %3381 }
 0x342   :  { %v8309_v32 = vpop.eup %8308  ;;  %v3406_v63 = vmul.f32 %v8307_v30, %v9304_v43  ;;  %v3385_v34 = vpop.xlane.xlu1 %3384  ;;  %8310 = vrcp.f32 %v3382_v31 }
 0x343   :  { %v3407_v35 = vmul.f32 %v8309_v32, %v9306_v45  ;;  %8312 = vrcp.f32 %v3385_v34 }
 0x344   :  { %7697 = vmatmul.mubr.msk.f32.vlgmr.msra.gmra.mrb[44].mxu0 %vm3301_vm4, %v3406_v63 }
 0x345   :  { %7702 = vmatmul.mubr.msk.f32.vlgmr.msra.gmra.mrb[44].mxu1 %vm3301_vm4, %v3407_v35  ;;  %7705 = vmatpush3.msra.mxu0 %v2302_v33 }
 0x346   :  { %7710 = vmatpush3.msra.mxu1 %v2372_v36  ;;  %7706 = vmatprep.mubr.msk.f32.mxu0 %vm8347_vm0, %v8348_v11 }
 0x347   :  { %7711 = vmatprep.mubr.msk.f32.mxu1 %vm8347_vm0, %v8348_v11  ;;  %7714 = vmatprep.subr.mxu0 %v8348_v11 }
 0x348   :  { %7719 = vmatprep.subr.mxu1 %v8348_v11 }
 0x34c   :  { %v8311_v2 = vpop.eup %8310  ;;  %v3388_v38 = vpop.xlane.xlu0 %3387 }
 0x34d   :  { %v8313_v39 = vpop.eup %8312  ;;  %v3408_v40 = vmul.f32 %v8311_v2, %v9312_v53  ;;  %v3391_v41 = vpop.xlane.xlu1 %3390  ;;  %8314 = vrcp.f32 %v3388_v38 }
 0x34e   :  { %v3409_v43 = vmul.f32 %v8313_v39, %v9314_v55  ;;  %8316 = vrcp.f32 %v3391_v41  ;;  %v4146_v55 = vld [vmem:[%s10655_s4 + $0x10] sm:$0xf] }
 0x34f   :  { %7707 = vmatmul.mubr.msk.f32.vlgmr.msra.gmra.mrb[46].mxu0 %vm3301_vm4, %v3408_v40 }
 0x350   :  { %7712 = vmatmul.mubr.msk.f32.vlgmr.msra.gmra.mrb[46].mxu1 %vm3301_vm4, %v3409_v43  ;;  %7715 = vmatpush3.msra.mxu0 %v2442_v42 }
 0x351   :  { %7720 = vmatpush3.msra.mxu1 %v2512_v44  ;;  %7716 = vmatprep.mubr.msk.f32.mxu0 %vm8347_vm0, %v8348_v11 }
 0x352   :  { %7721 = vmatprep.mubr.msk.f32.mxu1 %vm8347_vm0, %v8348_v11  ;;  %7724 = vmatprep.subr.mxu0 %v8348_v11 }
 0x353   :  { %7729 = vmatprep.subr.mxu1 %v8348_v11 }
 0x357   :  { %v8315_v6 = vpop.eup %8314 }
 0x358   :  { %v8317_v45 = vpop.eup %8316  ;;  %v3410_v7 = vmul.f32 %v8315_v6, %v9320_v60  ;;  %v4147_v60 = vld [vmem:[%s10655_s4 + $0x14] sm:$0xf] }
 0x359   :  { %v3411_v46 = vmul.f32 %v8317_v45, %v9322_v62 }
 0x35a   :  { %7717 = vmatmul.mubr.msk.f32.vlgmr.msra.gmra.mrb[48].mxu0 %vm3301_vm4, %v3410_v7 }
 0x35b   :  { %7722 = vmatmul.mubr.msk.f32.vlgmr.msra.gmra.mrb[48].mxu1 %vm3301_vm4, %v3411_v46  ;;  %7726 = vmatprep.mubr.msk.f32.mxu0 %vm8347_vm0, %v8348_v11 }
 0x35c   :  { %7731 = vmatprep.mubr.msk.f32.mxu1 %vm8347_vm0, %v8348_v11  ;;  %7725 = vmatpush3.msk.msra.mxu0 %vm4155_vm5, %v4142_v48 }
 0x35d   :  { %7734 = vmatprep.subr.mxu0 %v8348_v11  ;;  %7730 = vmatpush3.msk.msra.mxu1 %vm4155_vm5, %v4143_v50 }
 0x35e   :  { %7739 = vmatprep.subr.mxu1 %v8348_v11 }
 0x401   :  { %v3481_v49 = vpop.f32.mrb[40].mxu0 }
 0x402   :  { %v7678_v51 = vpop.f32.mrb[41].mxu0  ;;  %7727 = vmatmul.mubr.msk.f32.vlgmr.msra.gmra.mrb[50].mxu0 %vm2515_vm2, %v3481_v49 }
 0x403   :  { %7735 = vmatpush3.msk.msra.mxu0 %vm4155_vm5, %v4144_v47  ;;  %7736 = vmatprep.mubr.msk.f32.mxu0 %vm8347_vm0, %v8348_v11 }
 0x404   :  { %7744 = vmatprep.subr.mxu0 %v8348_v11 }
 0x405   :  { %v3554_v53 = vpop.f32.mrb[40].mxu1 }
 0x406   :  { %v7683_v54 = vpop.f32.mrb[41].mxu1  ;;  %7732 = vmatmul.mubr.msk.f32.vlgmr.msra.gmra.mrb[50].mxu1 %vm2515_vm2, %v3554_v53 }
 0x407   :  { %7740 = vmatpush3.msk.msra.mxu1 %vm4155_vm5, %v4145_v52  ;;  %7741 = vmatprep.mubr.msk.f32.mxu1 %vm8347_vm0, %v8348_v11  ;;  %v6700_v54 = vld [vmem:[%s10656_s5] ss:$0 sm:$0xff] }
 0x408   :  { %7749 = vmatprep.subr.mxu1 %v8348_v11 }
 0x40c   :  { %v3627_v56 = vpop.f32.mrb[42].mxu0 }
 0x40d   :  { %v7688_v58 = vpop.f32.mrb[43].mxu0  ;;  %7737 = vmatmul.mubr.msk.f32.vlgmr.msra.gmra.mrb[52].mxu0 %vm2515_vm2, %v3627_v56 }
 0x40e   :  { %7745 = vmatpush3.msk.msra.mxu0 %vm4155_vm5, %v4146_v55  ;;  %7746 = vmatprep.mubr.msk.f32.mxu0 %vm8347_vm0, %v8348_v11 }
 0x40f   :  { %7754 = vmatprep.subr.mxu0 %v8348_v11 }
 0x410   :  { %v3700_v62 = vpop.f32.mrb[42].mxu1 }
 0x411   :  { %v7693_v0 = vpop.f32.mrb[43].mxu1  ;;  %7742 = vmatmul.mubr.msk.f32.vlgmr.msra.gmra.mrb[52].mxu1 %vm2515_vm2, %v3700_v62 }
 0x412   :  { %7750 = vmatpush3.msk.msra.mxu1 %vm4155_vm5, %v4147_v60  ;;  %7751 = vmatprep.mubr.msk.f32.mxu1 %vm8347_vm0, %v8348_v11 }
 0x413   :  { %7759 = vmatprep.subr.mxu1 %v8348_v11 }
 0x417   :  { %v3773_v5 = vpop.f32.mrb[44].mxu0 }
 0x418   :  { %v3846_v9 = vpop.f32.mrb[44].mxu1  ;;  %v7698_v10 = vpop.f32.mrb[45].mxu0  ;;  %7747 = vmatmul.mubr.msk.f32.vlgmr.msra.gmra.mrb[54].mxu0 %vm2515_vm2, %v3773_v5 }
 0x419   :  { %v7703_v13 = vpop.f32.mrb[45].mxu1  ;;  %7752 = vmatmul.mubr.msk.f32.vlgmr.msra.gmra.mrb[54].mxu1 %vm2515_vm2, %v3846_v9  ;;  %7755 = vmatpush3.msk.msra.mxu0 %vm4155_vm5, %v4148_v4  ;;  %v4972_v9 = vld [vmem:[%s10661_s10 + $0x8] sm:$0xff] }
 0x41a   :  { %7756 = vmatprep.mubr.msk.f32.mxu0 %vm8347_vm0, %v8348_v11  ;;  %7760 = vmatpush3.msk.msra.mxu1 %vm4155_vm5, %v4149_v8  ;;  %v4988_v10 = vld [vmem:[%s10661_s10 + $0x88] sm:$0xff] }
 0x41b   :  { %7761 = vmatprep.mubr.msk.f32.mxu1 %vm8347_vm0, %v8348_v11  ;;  %7764 = vmatprep.subr.mxu0 %v8348_v11  ;;  %v7954_v13 = vpack.c.bf16 %v4988_v10, %v4972_v9  ;;  %v5042_v9 = vld [vmem:[%s10661_s10 + $0x238] sm:$0xff]  ;;  %v4980_v10 = vld [vmem:[%s10661_s10 + $0x48] sm:$0xff] }
 0x41c   :  { %7769 = vmatprep.subr.mxu1 %v8348_v11 }
 0x422   :  { %v3919_v16 = vpop.f32.mrb[46].mxu0 }
 0x423   :  { %v3992_v18 = vpop.f32.mrb[46].mxu1  ;;  %v7708_v20 = vpop.f32.mrb[47].mxu0  ;;  %7757 = vmatmul.mubr.msk.f32.vlgmr.msra.gmra.mrb[56].mxu0 %vm2515_vm2, %v3919_v16  ;;  %v4971_v16 = vld [vmem:[%s10661_s10] sm:$0xff] }
 0x424   :  { %v7713_v21 = vpop.f32.mrb[47].mxu1  ;;  %7762 = vmatmul.mubr.msk.f32.vlgmr.msra.gmra.mrb[56].mxu1 %vm2515_vm2, %v3992_v18  ;;  %7765 = vmatpush3.msk.msra.mxu0 %vm4155_vm5, %v4150_v14  ;;  %v4990_v14 = vld [vmem:[%s10661_s10 + $0x98] sm:$0xff] }
 0x425   :  { %7766 = vmatprep.mubr.msk.f32.mxu0 %vm8347_vm0, %v8348_v11  ;;  %7770 = vmatpush3.msk.msra.mxu1 %vm4155_vm5, %v4151_v17  ;;  %v4987_v17 = vld [vmem:[%s10661_s10 + $0x80] sm:$0xff]  ;;  %v4973_v21 = vld [vmem:[%s10661_s10 + $0x10] sm:$0xff] }
 0x426   :  { %7771 = vmatprep.mubr.msk.f32.mxu1 %vm8347_vm0, %v8348_v11  ;;  %v7956_v20 = vpack.c.bf16 %v4987_v17, %v4971_v16  ;;  %7955 = vmatprep.subr.bf16.mxu0 %v7954_v13  ;;  %v4982_v13 = vld [vmem:[%s10661_s10 + $0x58] sm:$0xff]  ;;  %v5041_v16 = vld [vmem:[%s10661_s10 + $0x230] sm:$0xff] }
 0x427   :  { %v4998_v17 = vld [vmem:[%s10661_s10 + $0xd8] sm:$0xff] }
 0x42d   :  { %v4065_v23 = vpop.f32.mrb[48].mxu0 }
 0x42e   :  { %v4138_v57 = vpop.f32.mrb[48].mxu1  ;;  %v7718_v25 = vpop.f32.mrb[49].mxu0  ;;  %7767 = vmatmul.mubr.msk.f32.vlgmr.msra.gmra.mrb[58].mxu0 %vm2515_vm2, %v4065_v23  ;;  %v4989_v23 = vld [vmem:[%s10661_s10 + $0x90] sm:$0xff] }
 0x42f   :  { %v7723_v15 = vpop.f32.mrb[49].mxu1  ;;  %7772 = vmatmul.mubr.msk.f32.vlgmr.msra.gmra.mrb[58].mxu1 %vm2515_vm2, %v4138_v57  ;;  %5202 = vmatprep.mubr.f32.mxu0 %v8348_v11  ;;  %v7964_v57 = vpack.c.bf16 %v4989_v23, %v4973_v21  ;;  %v5004_v25 = vld [vmem:[%s10661_s10 + $0x108] sm:$0xff]  ;;  %v4981_v21 = vld [vmem:[%s10661_s10 + $0x50] sm:$0xff] }
 0x430   :  { %5273 = vmatprep.mubr.f32.mxu1 %v8348_v11  ;;  %7957 = vmatpush1.bf16.msra.mxu0 %v7956_v20  ;;  %v5020_v15 = vld [vmem:[%s10661_s10 + $0x188] sm:$0xff]  ;;  %v4995_v20 = vld [vmem:[%s10661_s10 + $0xc0] sm:$0xff]  ;;  %v4997_v23 = vld [vmem:[%s10661_s10 + $0xd0] sm:$0xff] }
 0x4d5   :  { %v4225_v26 = vpop.f32.mrb[50].mxu0 }
 0x4d6   :  { %v7728_v27 = vpop.f32.mrb[51].mxu0  ;;  %v4913_v28 = vsel %vm411_vm1, %v4225_v26, 0.0  ;;  %v5006_v26 = vld [vmem:[%s10661_s10 + $0x118] sm:$0xff] }
 0x4d7   :  { %v7958_v27 = vpack.c.bf16 %v5020_v15, %v5004_v25  ;;  %v5028_v25 = vld [vmem:[%s10661_s10 + $0x1c8] sm:$0xff]  ;;  %v5014_v15 = vld [vmem:[%s10661_s10 + $0x158] sm:$0xff] }
 0x4d9   :  { %v4301_v59 = vpop.f32.mrb[50].mxu1  ;;  %7959 = vmatprep.subr.bf16.mxu0 %v7958_v27 }
 0x4da   :  { %v4914_v22 = vsel %vm411_vm1, %v4301_v59, 0.0  ;;  %v7733_v24 = vpop.f32.mrb[51].mxu1  ;;  %v5022_v59 = vld [vmem:[%s10661_s10 + $0x198] sm:$0xff] }
 0x4db   :  { %v4915_v29 = vadd.f32 %v4914_v22, %v4913_v28  ;;  %v5003_v28 = vld [vmem:[%s10661_s10 + $0x100] sm:$0xff]  ;;  %v7966_v24 = vpack.c.bf16 %v5022_v59, %v5006_v26  ;;  %v5030_v26 = vld [vmem:[%s10661_s10 + $0x1d8] sm:$0xff]  ;;  %v7994_v59 = vpack.c.bf16 %v4998_v17, %v4982_v13 }
 0x4dc   :  { %v5019_v22 = vld [vmem:[%s10661_s10 + $0x180] sm:$0xff]  ;;  %v5741_v17 = vld [vmem:[%s10663_s12 + $0x98] sm:$0xff] }
 0x4dd   :  { %v5754_v13 = vld [vmem:[%s10663_s12 + $0x100] sm:$0xff] }
 0x4e0   :  { %v4377_v61 = vpop.f32.mrb[52].mxu0 }
 0x4e1   :  { %v4916_v30 = vsel %vm411_vm1, %v4377_v61, 0.0  ;;  %v7738_v3 = vpop.f32.mrb[53].mxu0  ;;  %v5005_v61 = vld [vmem:[%s10661_s10 + $0x110] sm:$0xff] }
 0x4e2   :  { %v4917_v31 = vadd.f32 %v4916_v30, %v4915_v29  ;;  %v7960_v29 = vpack.c.bf16 %v5019_v22, %v5003_v28  ;;  %v5021_v30 = vld [vmem:[%s10661_s10 + $0x190] sm:$0xff]  ;;  %v7996_v22 = vpack.c.bf16 %v4997_v23, %v4981_v21 }
 0x4e3   :  { %v7968_v3 = vpack.c.bf16 %v5021_v30, %v5005_v61  ;;  %v7998_v61 = vpack.c.bf16 %v5030_v26, %v5014_v15  ;;  %v5027_v30 = vld [vmem:[%s10661_s10 + $0x1c0] sm:$0xff]  ;;  %v5724_v15 = vld [vmem:[%s10663_s12 + $0x10] sm:$0xff]  ;;  %v5725_v26 = vld [vmem:[%s10663_s12 + $0x18] sm:$0xff] }
 0x4e4   :  { %v4453_v32 = vpop.f32.mrb[52].mxu1  ;;  %7961 = vmatpush1.bf16.msra.mxu0 %v7960_v29 }
 0x4e5   :  { %v4918_v63 = vsel %vm411_vm1, %v4453_v32, 0.0  ;;  %v7743_v34 = vpop.f32.mrb[53].mxu1  ;;  %v5038_v32 = vld [vmem:[%s10661_s10 + $0x218] sm:$0xff] }
 0x4e6   :  { %v4919_v33 = vadd.f32 %v4918_v63, %v4917_v31  ;;  %v5036_v31 = vld [vmem:[%s10661_s10 + $0x208] sm:$0xff]  ;;  %v5035_v34 = vld [vmem:[%s10661_s10 + $0x200] sm:$0xff] }
 0x4e7   :  { %v4976_v63 = vld [vmem:[%s10661_s10 + $0x28] sm:$0xff]  ;;  %5146 = vmatprep.subr.mxu0 %v5036_v31  ;;  %v5029_v31 = vld [vmem:[%s10661_s10 + $0x1d0] sm:$0xff] }
 0x4e8   :  { %5147 = vmatpush1.msra.mxu0 %v5035_v34  ;;  %v5044_v34 = vld [vmem:[%s10661_s10 + $0x248] sm:$0xff] }
 0x4eb   :  { %v4529_v35 = vpop.f32.mrb[54].mxu0 }
 0x4ec   :  { %v4920_v36 = vsel %vm411_vm1, %v4529_v35, 0.0  ;;  %v4605_v1 = vpop.f32.mrb[54].mxu1  ;;  %v7748_v2 = vpop.f32.mrb[55].mxu0  ;;  %v4992_v35 = vld [vmem:[%s10661_s10 + $0xa8] sm:$0xff] }
 0x4ed   :  { %v4921_v37 = vadd.f32 %v4920_v36, %v4919_v33  ;;  %v7753_v38 = vpop.f32.mrb[55].mxu1  ;;  %v4922_v39 = vsel %vm411_vm1, %v4605_v1, 0.0  ;;  %v5037_v33 = vld [vmem:[%s10661_s10 + $0x210] sm:$0xff]  ;;  %v7970_v36 = vpack.c.bf16 %v4992_v35, %v4976_v63  ;;  %v4978_v1 = vld [vmem:[%s10661_s10 + $0x38] sm:$0xff]  ;;  %v4984_v35 = vld [vmem:[%s10661_s10 + $0x68] sm:$0xff] }
 0x4ee   :  { %v4994_v2 = vld [vmem:[%s10661_s10 + $0xb8] sm:$0xff] }
 0x4ef   :  { %v4923_v40 = vadd.f32 %v4922_v39, %v4921_v37  ;;  %v7978_v37 = vpack.c.bf16 %v4994_v2, %v4978_v1  ;;  %7971 = vmatprep.subr.bf16.mxu0 %v7970_v36  ;;  %v5000_v36 = vld [vmem:[%s10661_s10 + $0xe8] sm:$0xff]  ;;  %v4986_v1 = vld [vmem:[%s10661_s10 + $0x78] sm:$0xff]  ;;  %v5043_v2 = vld [vmem:[%s10661_s10 + $0x240] sm:$0xff] }
 0x4f6   :  { %v4681_v41 = vpop.f32.mrb[56].mxu0 }
 0x4f7   :  { %v4924_v42 = vsel %vm411_vm1, %v4681_v41, 0.0  ;;  %v4757_v43 = vpop.f32.mrb[56].mxu1  ;;  %v7758_v44 = vpop.f32.mrb[57].mxu0  ;;  %v6701_v41 = vld [vmem:[%s10657_s6] ss:$0 sm:$0xff] }
 0x4f8   :  { %v4925_v6 = vadd.f32 %v4924_v42, %v4923_v40  ;;  %v7763_v45 = vpop.f32.mrb[57].mxu1  ;;  %v4926_v7 = vsel %vm411_vm1, %v4757_v43, 0.0  ;;  %v6702_v43 = vld [vmem:[%s10658_s7] ss:$0 sm:$0xff] }
 0x4f9   :  { %v4975_v44 = vld [vmem:[%s10661_s10 + $0x20] sm:$0xff] }
 0x4fa   :  { %v4927_v46 = vadd.f32 %v4926_v7, %v4925_v6  ;;  %v4991_v6 = vld [vmem:[%s10661_s10 + $0xa0] sm:$0xff]  ;;  %v4977_v7 = vld [vmem:[%s10661_s10 + $0x30] sm:$0xff] }
 0x501   :  { %v4833_v48 = vpop.f32.mrb[58].mxu0 }
 0x502   :  { %v4928_v50 = vsel %vm411_vm1, %v4833_v48, 0.0  ;;  %v4909_v47 = vpop.f32.mrb[58].mxu1  ;;  %v7768_v49 = vpop.f32.mrb[59].mxu0  ;;  %v5008_v48 = vld [vmem:[%s10661_s10 + $0x128] sm:$0xff] }
 0x503   :  { %v4929_v51 = vadd.f32 %v4928_v50, %v4927_v46  ;;  %v7773_v52 = vpop.f32.mrb[59].mxu1  ;;  %v4930_v53 = vsel %vm411_vm1, %v4909_v47, 0.0  ;;  %v4993_v46 = vld [vmem:[%s10661_s10 + $0xb0] sm:$0xff]  ;;  %v5024_v50 = vld [vmem:[%s10661_s10 + $0x1a8] sm:$0xff]  ;;  %v5010_v47 = vld [vmem:[%s10661_s10 + $0x138] sm:$0xff] }
 0x504   :  { %v5026_v49 = vld [vmem:[%s10661_s10 + $0x1b8] sm:$0xff]  ;;  %v7972_v52 = vpack.c.bf16 %v4991_v6, %v4975_v44  ;;  %v5032_v44 = vld [vmem:[%s10661_s10 + $0x1e8] sm:$0xff] }
 0x505   :  { %v4931_v55 = vadd.f32 %v4930_v53, %v4929_v51  ;;  %v7980_v53 = vpack.c.bf16 %v4993_v46, %v4977_v7  ;;  %v5018_v6 = vld [vmem:[%s10661_s10 + $0x178] sm:$0xff]  ;;  %v8002_v7 = vpack.c.bf16 %v5000_v36, %v4984_v35  ;;  %v5758_v35 = vld [vmem:[%s10663_s12 + $0x120] sm:$0xff]  ;;  %v5759_v36 = vld [vmem:[%s10663_s12 + $0x128] sm:$0xff] }
 0x507   :  { %v4939_v56 = vadd.f32 %v6700_v54, %v4931_v55  ;;  %v5007_v54 = vld [vmem:[%s10661_s10 + $0x120] sm:$0xff] }
 0x509   :  { %v4940_v58 = vadd.f32 %v4939_v56, %v8473_v19  ;;  %v4974_v19 = vld [vmem:[%s10661_s10 + $0x18] sm:$0xff]  ;;  %v7974_v56 = vpack.c.bf16 %v5024_v50, %v5008_v48 }
 0x50a   :  { %v7962_v18 = vpack.c.bf16 %v4990_v14, %v4974_v19  ;;  %v4996_v19 = vld [vmem:[%s10661_s10 + $0xc8] sm:$0xff]  ;;  %v5039_v14 = vld [vmem:[%s10661_s10 + $0x220] sm:$0xff] }
 0x50b   :  { %v4943_v60 = vsel %vm411_vm1, %v4940_v58, 0.0  ;;  %v7986_v27 = vpack.c.bf16 %v4996_v19, %v4980_v10  ;;  %v5722_v10 = vld [vmem:[%s10663_s12] sm:$0xff]  ;;  %v5723_v19 = vld [vmem:[%s10663_s12 + $0x8] sm:$0xff] }
 0x50c   :  { %4944 = vadd.xlane.f32.xlu0 %v4943_v60  ;;  %7963 = vmatprep.subr.bf16.mxu1 %v7962_v18  ;;  %v5023_v60 = vld [vmem:[%s10661_s10 + $0x1a0] sm:$0xff] }
 0x50d   :  { %7965 = vmatpush1.bf16.msra.mxu1 %v7964_v57  ;;  %v4979_v18 = vld [vmem:[%s10661_s10 + $0x40] sm:$0xff]  ;;  %v5012_v57 = vld [vmem:[%s10661_s10 + $0x148] sm:$0xff] }
 0x50e   :  { %7967 = vmatprep.subr.bf16.mxu1 %v7966_v24  ;;  %v7988_v28 = vpack.c.bf16 %v4995_v20, %v4979_v18  ;;  %v5011_v24 = vld [vmem:[%s10661_s10 + $0x140] sm:$0xff]  ;;  %v7990_v29 = vpack.c.bf16 %v5028_v25, %v5012_v57  ;;  %v5772_v18 = vld [vmem:[%s10663_s12 + $0x190] sm:$0xff]  ;;  %v5773_v20 = vld [vmem:[%s10663_s12 + $0x198] sm:$0xff]  ;;  %v8020_v57 = vpack.c.bf16 %v5723_v19, %v5722_v10 }
 0x511   :  { %7969 = vmatpush1.bf16.msra.mxu1 %v7968_v3  ;;  %v5013_v3 = vld [vmem:[%s10661_s10 + $0x150] sm:$0xff] }
 0x512   :  { %5217 = vmatprep.subr.mxu1 %v5038_v32  ;;  %v7992_v32 = vpack.c.bf16 %v5027_v30, %v5011_v24  ;;  %v8000_v63 = vpack.c.bf16 %v5029_v31, %v5013_v3  ;;  %v5742_v24 = vld [vmem:[%s10663_s12 + $0xa0] sm:$0xff]  ;;  %v5775_v30 = vld [vmem:[%s10663_s12 + $0x1a8] sm:$0xff]  ;;  %v8024_v3 = vpack.c.bf16 %v5725_v26, %v5724_v15 }
 0x513   :  { %v5735_v26 = vld [vmem:[%s10663_s12 + $0x68] sm:$0xff] }
 0x515   :  { %5218 = vmatpush1.msra.mxu1 %v5037_v33  ;;  %v5046_v33 = vld [vmem:[%s10661_s10 + $0x258] sm:$0xff] }
 0x516   :  { %7979 = vmatprep.subr.bf16.mxu1 %v7978_v37  ;;  %v5045_v37 = vld [vmem:[%s10661_s10 + $0x250] sm:$0xff] }
 0x599   :  { %v4945_v62 = vpop.xlane.xlu0 %4944 }
 0x59a   :  { %v4947_v0 = vmul.f32 0.025, %v4945_v62  ;;  %v5009_v62 = vld [vmem:[%s10661_s10 + $0x130] sm:$0xff] }
 0x59c   :  { %v4948_v4 = vsub.f32 %v4940_v58, %v4947_v0  ;;  %v7982_v58 = vpack.c.bf16 %v5026_v49, %v5010_v47  ;;  %v5025_v0 = vld [vmem:[%s10661_s10 + $0x1b0] sm:$0xff]  ;;  %v5015_v47 = vld [vmem:[%s10661_s10 + $0x160] sm:$0xff] }
 0x59e   :  { %v4949_v5 = vmul.f32 %v4948_v4, %v4948_v4 }
 0x5a0   :  { %v4950_v8 = vsel %vm411_vm1, %v4949_v5, 0.0  ;;  %v7984_v5 = vpack.c.bf16 %v5025_v0, %v5009_v62  ;;  %v5050_v62 = vld [vmem:[%s10661_s10 + $0x278] sm:$0xff]  ;;  %v5738_v0 = vld [vmem:[%s10663_s12 + $0x80] sm:$0xff] }
 0x5a1   :  { %4951 = vadd.xlane.f32.xlu1 %v4950_v8  ;;  %v5040_v8 = vld [vmem:[%s10661_s10 + $0x228] sm:$0xff] }
 0x62e   :  { %v4952_v38 = vpop.xlane.xlu1 %4951 }
 0x62f   :  { %v4953_v39 = vmul.f32 0.025, %v4952_v38  ;;  %v5002_v38 = vld [vmem:[%s10661_s10 + $0xf8] sm:$0xff] }
 0x630   :  { %v8010_v46 = vpack.c.bf16 %v5002_v38, %v4986_v1  ;;  %v5744_v1 = vld [vmem:[%s10663_s12 + $0xb0] sm:$0xff]  ;;  %v5777_v38 = vld [vmem:[%s10663_s12 + $0x1b8] sm:$0xff] }
 0x631   :  { %v4954_v40 = vadd.f32 1e-05, %v4953_v39  ;;  %v4983_v39 = vld [vmem:[%s10661_s10 + $0x60] sm:$0xff] }
 0x633   :  { %8318 = vrsqrt.f32 %v4954_v40  ;;  %v4999_v40 = vld [vmem:[%s10661_s10 + $0xe0] sm:$0xff] }
 0x634   :  { %v8004_v48 = vpack.c.bf16 %v4999_v40, %v4983_v39  ;;  %v8060_v40 = vpack.c.bf16 %v5759_v36, %v5758_v35  ;;  %v5769_v35 = vld [vmem:[%s10663_s12 + $0x178] sm:$0xff] }
 0x63d   :  { %v8319_v42 = vpop.eup %8318 }
 0x63e   :  { %v4956_v45 = vmul.f32 %v8319_v42, %v4948_v4  ;;  %v7976_v4 = vpack.c.bf16 %v5023_v60, %v5007_v54  ;;  %v5001_v42 = vld [vmem:[%s10661_s10 + $0xf0] sm:$0xff]  ;;  %v5048_v60 = vld [vmem:[%s10661_s10 + $0x268] sm:$0xff] }
 0x63f   :  { %v5033_v54 = vld [vmem:[%s10661_s10 + $0x1f0] sm:$0xff] }
 0x640   :  { %v4963_v51 = vmul.f32 %v6701_v41, %v4956_v45  ;;  %v4985_v41 = vld [vmem:[%s10661_s10 + $0x70] sm:$0xff]  ;;  %v5034_v45 = vld [vmem:[%s10661_s10 + $0x1f8] sm:$0xff] }
 0x641   :  { %v8012_v50 = vpack.c.bf16 %v5001_v42, %v4985_v41  ;;  %v5728_v41 = vld [vmem:[%s10663_s12 + $0x30] sm:$0xff]  ;;  %v5729_v42 = vld [vmem:[%s10663_s12 + $0x38] sm:$0xff] }
 0x642   :  { %v9605_v55 = vadd.f32 %v6702_v43, %v4963_v51  ;;  %v5016_v43 = vld [vmem:[%s10661_s10 + $0x168] sm:$0xff]  ;;  %v8014_v51 = vpack.c.bf16 %v5034_v45, %v5018_v6  ;;  %v5760_v6 = vld [vmem:[%s10663_s12 + $0x130] sm:$0xff]  ;;  %v5761_v45 = vld [vmem:[%s10663_s12 + $0x138] sm:$0xff] }
 0x643   :  { %v8006_v49 = vpack.c.bf16 %v5032_v44, %v5016_v43 }
 0x644   :  { %6703 = vmatmul.mubr.msk.f32.vlgmr.msra.gmra.mrb[60].mxu0 %vm411_vm1, %v9605_v55  ;;  %6704 = vmatmul.mubr.msk.f32.vlgmr.msra.gmra.mrb[60].mxu1 %vm411_vm1, %v9605_v55 }
 0x645   :  { %7973 = vmatpush1.bf16.msra.mxu0 %v7972_v52  ;;  %7981 = vmatpush1.bf16.msra.mxu1 %v7980_v53  ;;  %v5031_v52 = vld [vmem:[%s10661_s10 + $0x1e0] sm:$0xff]  ;;  %v5017_v53 = vld [vmem:[%s10661_s10 + $0x170] sm:$0xff] }
 0x646   :  { %7975 = vmatprep.subr.bf16.mxu0 %v7974_v56  ;;  %7983 = vmatprep.subr.bf16.mxu1 %v7982_v58  ;;  %v8008_v56 = vpack.c.bf16 %v5031_v52, %v5015_v47  ;;  %v8016_v58 = vpack.c.bf16 %v5033_v54, %v5017_v53  ;;  %v8032_v47 = vpack.c.bf16 %v5729_v42, %v5728_v41  ;;  %v5731_v52 = vld [vmem:[%s10663_s12 + $0x48] sm:$0xff]  ;;  %v5057_v41 = vsub.s32 0, %v9251_v12 }
 0x647   :  { %5344 = vmatprep.mubr.f32.mxu0 %v8348_v11  ;;  %5415 = vmatprep.mubr.f32.mxu1 %v8348_v11  ;;  %v5065_v42 = vsub.s32 2, %v9251_v12 }
 0x649   :  { %7977 = vmatpush1.bf16.msra.mxu0 %v7976_v4  ;;  %7985 = vmatpush1.bf16.msra.mxu1 %v7984_v5  ;;  %v5739_v4 = vld [vmem:[%s10663_s12 + $0x88] sm:$0xff]  ;;  %v5770_v5 = vld [vmem:[%s10663_s12 + $0x180] sm:$0xff] }
 0x64a   :  { %5288 = vmatprep.subr.mxu0 %v5040_v8  ;;  %5359 = vmatprep.subr.mxu1 %v5042_v9  ;;  %v5047_v8 = vld [vmem:[%s10661_s10 + $0x260] sm:$0xff]  ;;  %v5771_v9 = vld [vmem:[%s10663_s12 + $0x188] sm:$0xff]  ;;  %v8018_v21 = vpack.c.bf16 %v5739_v4, %v5738_v0  ;;  %v5780_v0 = vld [vmem:[%s10663_s12 + $0x1d0] sm:$0xff] }
 0x64b   :  { %v8050_v23 = vpack.c.bf16 %v5771_v9, %v5770_v5  ;;  %v5781_v4 = vld [vmem:[%s10663_s12 + $0x1d8] sm:$0xff] }
 0x64c   :  { %v5733_v9 = vld [vmem:[%s10663_s12 + $0x58] sm:$0xff]  ;;  %v8070_v19 = vpack.c.bf16 %v5781_v4, %v5780_v0 }
 0x64d   :  { %5289 = vmatpush1.msra.mxu0 %v5039_v14  ;;  %5360 = vmatpush1.msra.mxu1 %v5041_v16  ;;  %v5755_v14 = vld [vmem:[%s10663_s12 + $0x108] sm:$0xff]  ;;  %v5740_v16 = vld [vmem:[%s10663_s12 + $0x90] sm:$0xff] }
 0x64e   :  { %6705 = vmatmul.mubr.msk.f32.vlgmr.msra.gmra.mrb[62].mxu0 %vm411_vm1, %v9605_v55  ;;  %6706 = vmatmul.mubr.msk.f32.vlgmr.msra.gmra.mrb[62].mxu1 %vm411_vm1, %v9605_v55  ;;  %v8052_v25 = vpack.c.bf16 %v5755_v14, %v5754_v13  ;;  %v5764_v13 = vld [vmem:[%s10663_s12 + $0x150] sm:$0xff]  ;;  %v5765_v14 = vld [vmem:[%s10663_s12 + $0x158] sm:$0xff] }
 0x64f   :  { %7987 = vmatprep.subr.bf16.mxu0 %v7986_v27  ;;  %7995 = vmatprep.subr.bf16.mxu1 %v7994_v59  ;;  %v8022_v27 = vpack.c.bf16 %v5741_v17, %v5740_v16  ;;  %v8054_v59 = vpack.c.bf16 %v5773_v20, %v5772_v18  ;;  %v5750_v16 = vld [vmem:[%s10663_s12 + $0xe0] sm:$0xff]  ;;  %v5751_v17 = vld [vmem:[%s10663_s12 + $0xe8] sm:$0xff] }
 0x650   :  { %7989 = vmatpush1.bf16.msra.mxu0 %v7988_v28  ;;  %7997 = vmatpush1.bf16.msra.mxu1 %v7996_v22  ;;  %v5756_v28 = vld [vmem:[%s10663_s12 + $0x110] sm:$0xff]  ;;  %v5757_v22 = vld [vmem:[%s10663_s12 + $0x118] sm:$0xff]  ;;  %v5782_v18 = vld [vmem:[%s10663_s12 + $0x1e0] sm:$0xff] }
 0x651   :  { %7991 = vmatprep.subr.bf16.mxu0 %v7990_v29  ;;  %7999 = vmatprep.subr.bf16.mxu1 %v7998_v61  ;;  %v5743_v29 = vld [vmem:[%s10663_s12 + $0xa8] sm:$0xff]  ;;  %v5774_v61 = vld [vmem:[%s10663_s12 + $0x1a0] sm:$0xff]  ;;  %v8056_v31 = vpack.c.bf16 %v5757_v22, %v5756_v28 }
 0x652   :  { %5486 = vmatprep.mubr.f32.mxu0 %v8348_v11  ;;  %5557 = vmatprep.mubr.f32.mxu1 %v8348_v11  ;;  %v5783_v20 = vld [vmem:[%s10663_s12 + $0x1e8] sm:$0xff] }
 0x653   :  { %v8074_v15 = vpack.c.bf16 %v5783_v20, %v5782_v18  ;;  %v5789_v18 = vld [vmem:[%s10663_s12 + $0x218] sm:$0xff] }
 0x654   :  { %7993 = vmatpush1.bf16.msra.mxu0 %v7992_v32  ;;  %8001 = vmatpush1.bf16.msra.mxu1 %v8000_v63  ;;  %v5726_v32 = vld [vmem:[%s10663_s12 + $0x20] sm:$0xff]  ;;  %v5727_v63 = vld [vmem:[%s10663_s12 + $0x28] sm:$0xff] }
 0x655   :  { %5430 = vmatprep.subr.mxu0 %v5044_v34  ;;  %5501 = vmatprep.subr.mxu1 %v5046_v33  ;;  %v8026_v34 = vpack.c.bf16 %v5743_v29, %v5742_v24  ;;  %v8058_v33 = vpack.c.bf16 %v5775_v30, %v5774_v61  ;;  %v8028_v39 = vpack.c.bf16 %v5727_v63, %v5726_v32  ;;  %v5752_v24 = vld [vmem:[%s10663_s12 + $0xf0] sm:$0xff]  ;;  %v5753_v29 = vld [vmem:[%s10663_s12 + $0xf8] sm:$0xff] }
 0x656   :  { %v5784_v61 = vld [vmem:[%s10663_s12 + $0x1f0] sm:$0xff]  ;;  %v8046_v30 = vpack.c.bf16 %v5753_v29, %v5752_v24  ;;  %v5737_v32 = vld [vmem:[%s10663_s12 + $0x78] sm:$0xff] }
 0x658   :  { %5431 = vmatpush1.msra.mxu0 %v5043_v2  ;;  %5502 = vmatpush1.msra.mxu1 %v5045_v37  ;;  %v5745_v2 = vld [vmem:[%s10663_s12 + $0xb8] sm:$0xff]  ;;  %v5776_v37 = vld [vmem:[%s10663_s12 + $0x1b0] sm:$0xff] }
 0x659   :  { %6707 = vmatmul.mubr.msk.f32.vlgmr.msra.gmra.mrb[64].mxu0 %vm411_vm1, %v9605_v55  ;;  %6708 = vmatmul.mubr.msk.f32.vlgmr.msra.gmra.mrb[64].mxu1 %vm411_vm1, %v9605_v55  ;;  %v8030_v43 = vpack.c.bf16 %v5745_v2, %v5744_v1  ;;  %v8062_v44 = vpack.c.bf16 %v5777_v38, %v5776_v37  ;;  %v5802_v1 = vld [vmem:[%s10663_s12 + $0x280] sm:$0xff]  ;;  %v5803_v2 = vld [vmem:[%s10663_s12 + $0x288] sm:$0xff] }
 0x65a   :  { %8003 = vmatprep.subr.bf16.mxu0 %v8002_v7  ;;  %8011 = vmatprep.subr.bf16.mxu1 %v8010_v46  ;;  %v5746_v7 = vld [vmem:[%s10663_s12 + $0xc0] sm:$0xff]  ;;  %v5747_v46 = vld [vmem:[%s10663_s12 + $0xc8] sm:$0xff]  ;;  %v8082_v38 = vpack.c.bf16 %v5803_v2, %v5802_v1 }
 0x65b   :  { %8005 = vmatpush1.bf16.msra.mxu0 %v8004_v48  ;;  %8013 = vmatpush1.bf16.msra.mxu1 %v8012_v50  ;;  %v5778_v48 = vld [vmem:[%s10663_s12 + $0x1c0] sm:$0xff]  ;;  %v5779_v50 = vld [vmem:[%s10663_s12 + $0x1c8] sm:$0xff]  ;;  %v8034_v53 = vpack.c.bf16 %v5747_v46, %v5746_v7 }
 0x65c   :  { %8007 = vmatprep.subr.bf16.mxu0 %v8006_v49  ;;  %8015 = vmatprep.subr.bf16.mxu1 %v8014_v51  ;;  %v8064_v49 = vpack.c.bf16 %v5761_v45, %v5760_v6  ;;  %v5730_v51 = vld [vmem:[%s10663_s12 + $0x40] sm:$0xff]  ;;  %v8066_v54 = vpack.c.bf16 %v5779_v50, %v5778_v48  ;;  %v5069_v6 = vsub.s32 3, %v9251_v12 }
 0x65d   :  { %5628 = vmatprep.mubr.f32.mxu0 %v8348_v11  ;;  %5699 = vmatprep.mubr.f32.mxu1 %v8348_v11  ;;  %v5049_v11 = vld [vmem:[%s10661_s10 + $0x270] sm:$0xff]  ;;  %v8036_v5 = vpack.c.bf16 %v5731_v52, %v5730_v51  ;;  %v5834_v37 = vld [vmem:[%s10663_s12 + $0x380] sm:$0xff]  ;;  %v5787_v51 = vld [vmem:[%s10663_s12 + $0x208] sm:$0xff] }
 0x65f   :  { %8009 = vmatpush1.bf16.msra.mxu0 %v8008_v56  ;;  %8017 = vmatpush1.bf16.msra.mxu1 %v8016_v58  ;;  %v5762_v56 = vld [vmem:[%s10663_s12 + $0x140] sm:$0xff]  ;;  %v5763_v58 = vld [vmem:[%s10663_s12 + $0x148] sm:$0xff] }
 0x660   :  { %5572 = vmatprep.subr.mxu0 %v5048_v60  ;;  %5643 = vmatprep.subr.mxu1 %v5050_v62  ;;  %v5748_v60 = vld [vmem:[%s10663_s12 + $0xd0] sm:$0xff]  ;;  %v5749_v62 = vld [vmem:[%s10663_s12 + $0xd8] sm:$0xff] }
 0x661   :  { %v8038_v10 = vpack.c.bf16 %v5749_v62, %v5748_v60  ;;  %v5819_v60 = vld [vmem:[%s10663_s12 + $0x308] sm:$0xff]  ;;  %v5804_v62 = vld [vmem:[%s10663_s12 + $0x290] sm:$0xff] }
 0x663   :  { %5573 = vmatpush1.msra.mxu0 %v5047_v8  ;;  %5644 = vmatpush1.msra.mxu1 %v5049_v11  ;;  %v8068_v8 = vpack.c.bf16 %v5763_v58, %v5762_v56  ;;  %v5732_v11 = vld [vmem:[%s10663_s12 + $0x50] sm:$0xff]  ;;  %v5818_v58 = vld [vmem:[%s10663_s12 + $0x300] sm:$0xff] }
 0x664   :  { %6709 = vmatmul.mubr.msk.f32.vlgmr.msra.gmra.mrb[66].mxu0 %vm411_vm1, %v9605_v55  ;;  %6710 = vmatmul.mubr.msk.f32.vlgmr.msra.gmra.mrb[66].mxu1 %vm411_vm1, %v9605_v55 }
 0x665   :  { %8019 = vmatprep.subr.bf16.mxu0 %v8018_v21  ;;  %8051 = vmatprep.subr.bf16.mxu1 %v8050_v23  ;;  %v8040_v21 = vpack.c.bf16 %v5733_v9, %v5732_v11  ;;  %v8072_v23 = vpack.c.bf16 %v5765_v14, %v5764_v13  ;;  %v5837_v11 = vld [vmem:[%s10663_s12 + $0x398] sm:$0xff]  ;;  %v8116_v14 = vpack.c.bf16 %v5819_v60, %v5818_v58  ;;  %v5811_v58 = vld [vmem:[%s10663_s12 + $0x2c8] sm:$0xff] }
 0x666   :  { %8021 = vmatpush3.bf16.msra.mxu0 %v8020_v57  ;;  %8053 = vmatpush3.bf16.msra.mxu1 %v8052_v25  ;;  %v5734_v57 = vld [vmem:[%s10663_s12 + $0x60] sm:$0xff]  ;;  %v8042_v25 = vpack.c.bf16 %v5751_v17, %v5750_v16  ;;  %v5085_v16 = vsub.s32 7, %v9251_v12  ;;  %v5788_v17 = vld [vmem:[%s10663_s12 + $0x210] sm:$0xff]  ;;  %v10100_v60 = vld [vmem:[%s10662_s11 + $0x8] sm:$0xff] }
 0x667   :  { %8023 = vmatprep.subr.bf16.mxu0 %v8022_v27  ;;  %8055 = vmatprep.subr.bf16.mxu1 %v8054_v59  ;;  %v5766_v27 = vld [vmem:[%s10663_s12 + $0x160] sm:$0xff]  ;;  %v5767_v59 = vld [vmem:[%s10663_s12 + $0x168] sm:$0xff]  ;;  %v8044_v28 = vpack.c.bf16 %v5735_v26, %v5734_v57  ;;  %v8088_v29 = vpack.c.bf16 %v5789_v18, %v5788_v17 }
 0x668   :  { %v8076_v22 = vpack.c.bf16 %v5767_v59, %v5766_v27  ;;  %v5806_v26 = vld [vmem:[%s10663_s12 + $0x2a0] sm:$0xff]  ;;  %v5807_v27 = vld [vmem:[%s10663_s12 + $0x2a8] sm:$0xff] }
 0x669   :  { %v5838_v59 = vld [vmem:[%s10663_s12 + $0x3a0] sm:$0xff]  ;;  %v5827_v18 = vld [vmem:[%s10663_s12 + $0x348] sm:$0xff] }
 0x66a   :  { %8025 = vmatpush3.bf16.msra.mxu0 %v8024_v3  ;;  %8057 = vmatpush3.bf16.msra.mxu1 %v8056_v31  ;;  %v5785_v3 = vld [vmem:[%s10663_s12 + $0x1f8] sm:$0xff]  ;;  %v5736_v31 = vld [vmem:[%s10663_s12 + $0x70] sm:$0xff] }
 0x66b   :  { %8027 = vmatprep.subr.bf16.mxu0 %v8026_v34  ;;  %8059 = vmatprep.subr.bf16.mxu1 %v8058_v33  ;;  %v8078_v63 = vpack.c.bf16 %v5785_v3, %v5784_v61  ;;  %v8048_v34 = vpack.c.bf16 %v5737_v32, %v5736_v31  ;;  %v5768_v33 = vld [vmem:[%s10663_s12 + $0x170] sm:$0xff]  ;;  %v5790_v31 = vld [vmem:[%s10663_s12 + $0x220] sm:$0xff]  ;;  %v5791_v32 = vld [vmem:[%s10663_s12 + $0x228] sm:$0xff] }
 0x66c   :  { %v8080_v36 = vpack.c.bf16 %v5769_v35, %v5768_v33  ;;  %v5822_v33 = vld [vmem:[%s10663_s12 + $0x320] sm:$0xff]  ;;  %v5823_v35 = vld [vmem:[%s10663_s12 + $0x328] sm:$0xff] }
 0x66e   :  { %8029 = vmatpush3.bf16.msra.mxu0 %v8028_v39  ;;  %8061 = vmatpush3.bf16.msra.mxu1 %v8060_v40  ;;  %v5835_v39 = vld [vmem:[%s10663_s12 + $0x388] sm:$0xff] }
 0x66f   :  { %8031 = vmatprep.subr.bf16.mxu0 %v8030_v43  ;;  %8063 = vmatprep.subr.bf16.mxu1 %v8062_v44  ;;  %v8114_v40 = vpack.c.bf16 %v5835_v39, %v5834_v37  ;;  %v9979_v43 = vld [vmem:[%s10662_s11] sm:$0xff]  ;;  %v5061_v44 = vsub.s32 1, %v9251_v12  ;;  %v5809_v37 = vld [vmem:[%s10663_s12 + $0x2b8] sm:$0xff] }
 0x670   :  { %v5058_v45 = vrot.slane %v9979_v43, %v5057_v41  ;;  %v5066_v7 = vrot.slane %v9979_v43, %v5065_v42  ;;  %v5070_v48 = vrot.slane %v9979_v43, %v5069_v6  ;;  %v5086_v24 = vrot.slane %v9979_v43, %v5085_v16  ;;  %v5841_v39 = vld [vmem:[%s10663_s12 + $0x3b8] sm:$0xff] }
 0x671   :  { %v5062_v46 = vrot.slane %v9979_v43, %v5061_v44 }
 0x672   :  { %8033 = vmatpush3.bf16.msra.mxu0 %v8032_v47  ;;  %8065 = vmatpush3.bf16.msra.mxu1 %v8064_v49  ;;  %v5786_v49 = vld [vmem:[%s10663_s12 + $0x200] sm:$0xff] }
 0x673   :  { %8035 = vmatprep.subr.bf16.mxu0 %v8034_v53  ;;  %8067 = vmatprep.subr.bf16.mxu1 %v8066_v54  ;;  %v8084_v9 = vpack.c.bf16 %v5787_v51, %v5786_v49 }
 0x676   :  { %8037 = vmatpush3.bf16.msra.mxu0 %v8036_v5  ;;  %8069 = vmatpush3.bf16.msra.mxu1 %v8068_v8  ;;  %v5805_v5 = vld [vmem:[%s10663_s12 + $0x298] sm:$0xff]  ;;  %v5836_v8 = vld [vmem:[%s10663_s12 + $0x390] sm:$0xff] }
 0x677   :  { %8039 = vmatprep.subr.bf16.mxu0 %v8038_v10  ;;  %8071 = vmatprep.subr.bf16.mxu1 %v8070_v19  ;;  %v5077_v10 = vsub.s32 5, %v9251_v12  ;;  %v8118_v57 = vpack.c.bf16 %v5837_v11, %v5836_v8  ;;  %v5794_v11 = vld [vmem:[%s10663_s12 + $0x240] sm:$0xff] }
 0x67a   :  { %8041 = vmatpush3.bf16.msra.mxu0 %v8040_v21  ;;  %8073 = vmatpush3.bf16.msra.mxu1 %v8072_v23  ;;  %v8086_v23 = vpack.c.bf16 %v5805_v5, %v5804_v62  ;;  %v5842_v62 = vld [vmem:[%s10663_s12 + $0x3c0] sm:$0xff] }
 0x67b   :  { %8043 = vmatprep.subr.bf16.mxu0 %v8042_v25  ;;  %8075 = vmatprep.subr.bf16.mxu1 %v8074_v15  ;;  %v5820_v25 = vld [vmem:[%s10663_s12 + $0x310] sm:$0xff]  ;;  %v5821_v15 = vld [vmem:[%s10663_s12 + $0x318] sm:$0xff] }
 0x67c   :  { %v8120_v61 = vpack.c.bf16 %v5821_v15, %v5820_v25 }
 0x67e   :  { %8045 = vmatpush3.bf16.msra.mxu0 %v8044_v28  ;;  %8077 = vmatpush3.bf16.msra.mxu1 %v8076_v22  ;;  %v5839_v28 = vld [vmem:[%s10663_s12 + $0x3a8] sm:$0xff]  ;;  %v5078_v22 = vrot.slane %v9979_v43, %v5077_v10 }
 0x67f   :  { %8047 = vmatprep.subr.bf16.mxu0 %v8046_v30  ;;  %8079 = vmatprep.subr.bf16.mxu1 %v8078_v63  ;;  %v8090_v30 = vpack.c.bf16 %v5807_v27, %v5806_v26  ;;  %v8122_v3 = vpack.c.bf16 %v5839_v28, %v5838_v59  ;;  %v5796_v27 = vld [vmem:[%s10663_s12 + $0x250] sm:$0xff]  ;;  %v5797_v59 = vld [vmem:[%s10663_s12 + $0x258] sm:$0xff] }
 0x680   :  { %v5828_v28 = vld [vmem:[%s10663_s12 + $0x350] sm:$0xff] }
 0x682   :  { %8049 = vmatpush3.bf16.msra.mxu0 %v8048_v34  ;;  %8081 = vmatpush3.bf16.msra.mxu1 %v8080_v36  ;;  %v5808_v36 = vld [vmem:[%s10663_s12 + $0x2b0] sm:$0xff] }
 0x683   :  { %8083 = vmatprep.subr.bf16.mxu0 %v8082_v38  ;;  %8115 = vmatprep.subr.bf16.mxu1 %v8114_v40  ;;  %v5840_v38 = vld [vmem:[%s10663_s12 + $0x3b0] sm:$0xff] }
 0x717   :  { %v5204_v50 = vpop.f32.mrb[60].mxu0  ;;  %v5275_v47 = vpop.f32.mrb[60].mxu1 }
 0x718   :  { %v5205_v52 = vadd.f32 %v5204_v50, %v5058_v45  ;;  %v5276_v53 = vadd.f32 %v5275_v47, %v5066_v7  ;;  %v5206_v54 = vpop.f32.mrb[61].mxu0  ;;  %v5277_v56 = vpop.f32.mrb[61].mxu1  ;;  %v8092_v7 = vpack.c.bf16 %v5791_v32, %v5790_v31  ;;  %v5793_v50 = vld [vmem:[%s10663_s12 + $0x238] sm:$0xff]  ;;  %v5824_v47 = vld [vmem:[%s10663_s12 + $0x330] sm:$0xff]  ;;  %v5814_v31 = vld [vmem:[%s10663_s12 + $0x2e0] sm:$0xff] }
 0x719   :  { %v5207_v0 = vadd.f32 %v5206_v54, %v5062_v46  ;;  %v5278_v4 = vadd.f32 %v5277_v56, %v5070_v48  ;;  %v8124_v46 = vpack.c.bf16 %v5823_v35, %v5822_v33  ;;  %v5792_v48 = vld [vmem:[%s10663_s12 + $0x230] sm:$0xff]  ;;  %v5825_v54 = vld [vmem:[%s10663_s12 + $0x338] sm:$0xff]  ;;  %v5810_v56 = vld [vmem:[%s10663_s12 + $0x2c0] sm:$0xff] }
 0x71a   :  { %v5706_v20 = vmax.f32 %v5205_v52, 0.0  ;;  %v5708_v21 = vmax.f32 %v5276_v53, 0.0  ;;  %v8094_v52 = vpack.c.bf16 %v5809_v37, %v5808_v36  ;;  %v8126_v53 = vpack.c.bf16 %v5841_v39, %v5840_v38  ;;  %v5815_v32 = vld [vmem:[%s10663_s12 + $0x2e8] sm:$0xff]  ;;  %v5846_v33 = vld [vmem:[%s10663_s12 + $0x3e0] sm:$0xff] }
 0x71b   :  { %v5707_v19 = vmax.f32 %v5207_v0, 0.0  ;;  %v5709_v13 = vmax.f32 %v5278_v4, 0.0  ;;  %v5843_v0 = vld [vmem:[%s10663_s12 + $0x3c8] sm:$0xff]  ;;  %v8096_v4 = vpack.c.bf16 %v5793_v50, %v5792_v48  ;;  %v8128_v5 = vpack.c.bf16 %v5825_v54, %v5824_v47  ;;  %v5798_v38 = vld [vmem:[%s10663_s12 + $0x260] sm:$0xff]  ;;  %v5816_v48 = vld [vmem:[%s10663_s12 + $0x2f0] sm:$0xff] }
 0x71c   :  { %v8098_v8 = vpack.c.bf16 %v5811_v58, %v5810_v56  ;;  %v8130_v17 = vpack.c.bf16 %v5843_v0, %v5842_v62  ;;  %v5847_v35 = vld [vmem:[%s10663_s12 + $0x3e8] sm:$0xff]  ;;  %v5073_v36 = vsub.s32 4, %v9251_v12  ;;  %v8106_v37 = vpack.c.bf16 %v5815_v32, %v5814_v31  ;;  %v5817_v50 = vld [vmem:[%s10663_s12 + $0x2f8] sm:$0xff]  ;;  %v5848_v47 = vld [vmem:[%s10663_s12 + $0x3f0] sm:$0xff] }
 0x71d   :  { %6049 = vmatprep.mubr.f32.mxu0 %v5707_v19  ;;  %6119 = vmatprep.mubr.f32.mxu1 %v5709_v13  ;;  %v5826_v19 = vld [vmem:[%s10663_s12 + $0x340] sm:$0xff]  ;;  %v5090_v13 = vrot.slane %v10100_v60, %v5057_v41  ;;  %v5844_v41 = vld [vmem:[%s10663_s12 + $0x3d0] sm:$0xff]  ;;  %v5799_v39 = vld [vmem:[%s10663_s12 + $0x268] sm:$0xff] }
 0x71e   :  { %6050 = vmatmul.mubr.f32.vlgmr.msra.gmra.mrb[68].mxu0 %v5706_v20  ;;  %6120 = vmatmul.mubr.f32.vlgmr.msra.gmra.mrb[68].mxu1 %v5708_v21  ;;  %v5812_v20 = vld [vmem:[%s10663_s12 + $0x2d0] sm:$0xff]  ;;  %v5813_v21 = vld [vmem:[%s10663_s12 + $0x2d8] sm:$0xff]  ;;  %v8132_v15 = vpack.c.bf16 %v5827_v18, %v5826_v19  ;;  %v5102_v18 = vrot.slane %v10100_v60, %v5069_v6  ;;  %v5850_v6 = vld [vmem:[%s10663_s12 + $0x400] sm:$0xff] }
 0x71f   :  { %8085 = vmatpush3.bf16.msra.mxu0 %v8084_v9  ;;  %8117 = vmatpush3.bf16.msra.mxu1 %v8116_v14  ;;  %v5795_v9 = vld [vmem:[%s10663_s12 + $0x248] sm:$0xff]  ;;  %v5098_v14 = vrot.slane %v10100_v60, %v5065_v42  ;;  %v5845_v42 = vld [vmem:[%s10663_s12 + $0x3d8] sm:$0xff]  ;;  %v8102_v26 = vpack.c.bf16 %v5813_v21, %v5812_v20  ;;  %v5800_v54 = vld [vmem:[%s10663_s12 + $0x270] sm:$0xff] }
 0x720   :  { %8087 = vmatprep.subr.bf16.mxu0 %v8086_v23  ;;  %8119 = vmatprep.subr.bf16.mxu1 %v8118_v57  ;;  %v8100_v23 = vpack.c.bf16 %v5795_v9, %v5794_v11  ;;  %v5801_v56 = vld [vmem:[%s10663_s12 + $0x278] sm:$0xff]  ;;  %v5832_v58 = vld [vmem:[%s10663_s12 + $0x370] sm:$0xff]  ;;  %v5867_v11 = vld [vmem:[%s10663_s12 + $0x488] sm:$0xff] }
 0x721   :  { %v10057_v63 = vpop.f32.mrb[62].mxu0  ;;  %v10059_v34 = vpop.f32.mrb[62].mxu1  ;;  %v8112_v21 = vpack.c.bf16 %v5801_v56, %v5800_v54  ;;  %v5855_v54 = vld [vmem:[%s10663_s12 + $0x428] sm:$0xff]  ;;  %v5886_v56 = vld [vmem:[%s10663_s12 + $0x520] sm:$0xff] }
 0x722   :  { %v5348_v1 = vpop.f32.mrb[63].mxu0  ;;  %v5419_v2 = vpop.f32.mrb[63].mxu1 }
 0x723   :  { %v5349_v40 = vadd.f32 %v5348_v1, %v5078_v22  ;;  %v5420_v45 = vadd.f32 %v5419_v2, %v5086_v24  ;;  %8089 = vmatpush3.bf16.msra.mxu0 %v8088_v29  ;;  %8121 = vmatpush3.bf16.msra.mxu1 %v8120_v61  ;;  %v8104_v1 = vpack.c.bf16 %v5797_v59, %v5796_v27  ;;  %v5882_v59 = vld [vmem:[%s10663_s12 + $0x500] sm:$0xff] }
 0x724   :  { %8091 = vmatprep.subr.bf16.mxu0 %v8090_v30  ;;  %8123 = vmatprep.subr.bf16.mxu1 %v8122_v3  ;;  %v8134_v30 = vpack.c.bf16 %v5845_v42, %v5844_v41  ;;  %v5829_v3 = vld [vmem:[%s10663_s12 + $0x358] sm:$0xff] }
 0x725   :  { %v5711_v49 = vmax.f32 %v5349_v40, 0.0  ;;  %v5713_v51 = vmax.f32 %v5420_v45, 0.0  ;;  %v8136_v2 = vpack.c.bf16 %v5829_v3, %v5828_v28  ;;  %v5830_v40 = vld [vmem:[%s10663_s12 + $0x360] sm:$0xff]  ;;  %v5081_v45 = vsub.s32 6, %v9251_v12  ;;  %v5883_v28 = vld [vmem:[%s10663_s12 + $0x508] sm:$0xff]  ;;  %v5868_v3 = vld [vmem:[%s10663_s12 + $0x490] sm:$0xff] }
 0x726   :  { %v5946_v12 = vld [vmem:[%s10663_s12 + $0x700] sm:$0xff] }
 0x727   :  { %8093 = vmatpush3.bf16.msra.mxu0 %v8092_v7  ;;  %6189 = vmatprep.mubr.f32.mxu0 %v5711_v49  ;;  %v8138_v7 = vpack.c.bf16 %v5847_v35, %v5846_v33  ;;  %v5849_v49 = vld [vmem:[%s10663_s12 + $0x3f8] sm:$0xff]  ;;  %v5114_v62 = vrot.slane %v10100_v60, %v5081_v45  ;;  %v5082_v9 = vrot.slane %v9979_v43, %v5081_v45  ;;  %v5900_v33 = vld [vmem:[%s10663_s12 + $0x590] sm:$0xff]  ;;  %v5871_v45 = vld [vmem:[%s10663_s12 + $0x4a8] sm:$0xff] }
 0x728   :  { %8125 = vmatpush3.bf16.msra.mxu1 %v8124_v46  ;;  %6259 = vmatprep.mubr.f32.mxu1 %v5713_v51  ;;  %v5831_v46 = vld [vmem:[%s10663_s12 + $0x368] sm:$0xff]  ;;  %v5074_v51 = vrot.slane %v9979_v43, %v5073_v36  ;;  %v8142_v19 = vpack.c.bf16 %v5849_v49, %v5848_v47 }
 0x729   :  { %8095 = vmatprep.subr.bf16.mxu0 %v8094_v52  ;;  %8127 = vmatprep.subr.bf16.mxu1 %v8126_v53  ;;  %v5106_v52 = vrot.slane %v10100_v60, %v5073_v36  ;;  %v8108_v53 = vpack.c.bf16 %v5799_v39, %v5798_v38  ;;  %v8140_v0 = vpack.c.bf16 %v5831_v46, %v5830_v40  ;;  %v5885_v39 = vld [vmem:[%s10663_s12 + $0x518] sm:$0xff]  ;;  %v5870_v40 = vld [vmem:[%s10663_s12 + $0x4a0] sm:$0xff] }
 0x72a   :  { %v8180_v36 = vpack.c.bf16 %v5883_v28, %v5882_v59  ;;  %v5890_v59 = vld [vmem:[%s10663_s12 + $0x540] sm:$0xff] }
 0x72b   :  { %8097 = vmatpush3.bf16.msra.mxu0 %v8096_v4  ;;  %v8110_v4 = vpack.c.bf16 %v5817_v50, %v5816_v48  ;;  %v5902_v48 = vld [vmem:[%s10663_s12 + $0x5a0] sm:$0xff]  ;;  %v5903_v50 = vld [vmem:[%s10663_s12 + $0x5a8] sm:$0xff] }
 0x72c   :  { %v5488_v57 = vpop.f32.mrb[64].mxu0  ;;  %v5559_v25 = vpop.f32.mrb[64].mxu1  ;;  %8129 = vmatpush3.bf16.msra.mxu1 %v8128_v5  ;;  %8099 = vmatprep.subr.bf16.mxu0 %v8098_v8  ;;  %v5833_v5 = vld [vmem:[%s10663_s12 + $0x378] sm:$0xff]  ;;  %v5866_v8 = vld [vmem:[%s10663_s12 + $0x480] sm:$0xff] }
 0x72d   :  { %v10147_v22 = vadd.f32 %v5488_v57, %v5090_v13  ;;  %v10149_v24 = vadd.f32 %v5559_v25, %v5098_v14  ;;  %v10151_v29 = vpop.f32.mrb[65].mxu0  ;;  %v10153_v61 = vpop.f32.mrb[65].mxu1  ;;  %8131 = vmatprep.subr.bf16.mxu1 %v8130_v17  ;;  %v5094_v13 = vrot.slane %v10100_v60, %v5061_v44  ;;  %v5898_v14 = vld [vmem:[%s10663_s12 + $0x580] sm:$0xff]  ;;  %v5899_v17 = vld [vmem:[%s10663_s12 + $0x588] sm:$0xff]  ;;  %v8144_v41 = vpack.c.bf16 %v5833_v5, %v5832_v58  ;;  %v5904_v5 = vld [vmem:[%s10663_s12 + $0x5b0] sm:$0xff] }
 0x72e   :  { %v8146_v42 = vpack.c.bf16 %v5867_v11, %v5866_v8  ;;  %v5347_v44 = vadd.f32 %v10057_v63, %v5074_v51  ;;  %v5418_v63 = vadd.f32 %v10059_v34, %v5082_v9  ;;  %v8178_v27 = vpack.c.bf16 %v5899_v17, %v5898_v14  ;;  %v5869_v34 = vld [vmem:[%s10663_s12 + $0x498] sm:$0xff]  ;;  %v5888_v17 = vld [vmem:[%s10663_s12 + $0x530] sm:$0xff] }
 0x72f   :  { %8101 = vmatpush3.bf16.msra.mxu0 %v8100_v23  ;;  %v5562_v31 = vadd.f32 %v10153_v61, %v5102_v18  ;;  %v5853_v61 = vld [vmem:[%s10663_s12 + $0x418] sm:$0xff]  ;;  %v8150_v38 = vpack.c.bf16 %v5869_v34, %v5868_v3  ;;  %v8186_v58 = vpack.c.bf16 %v5903_v50, %v5902_v48  ;;  %v5876_v3 = vld [vmem:[%s10663_s12 + $0x4d0] sm:$0xff]  ;;  %v5862_v50 = vld [vmem:[%s10663_s12 + $0x460] sm:$0xff] }
 0x730   :  { %8133 = vmatpush3.bf16.msra.mxu1 %v8132_v15  ;;  %8103 = vmatprep.subr.bf16.mxu0 %v8102_v26  ;;  %v5851_v26 = vld [vmem:[%s10663_s12 + $0x408] sm:$0xff]  ;;  %v5710_v35 = vmax.f32 %v5347_v44, 0.0  ;;  %v5905_v8 = vld [vmem:[%s10663_s12 + $0x5b8] sm:$0xff] }
 0x731   :  { %8135 = vmatprep.subr.bf16.mxu1 %v8134_v30  ;;  %v5491_v30 = vadd.f32 %v10151_v29, %v5094_v13  ;;  %v8148_v32 = vpack.c.bf16 %v5851_v26, %v5850_v6  ;;  %v5901_v29 = vld [vmem:[%s10663_s12 + $0x598] sm:$0xff]  ;;  %v5717_v47 = vmax.f32 %v5562_v31, 0.0  ;;  %v5856_v13 = vld [vmem:[%s10663_s12 + $0x430] sm:$0xff]  ;;  %v8190_v18 = vpack.c.bf16 %v5905_v8, %v5904_v5 }
 0x732   :  { %v8182_v46 = vpack.c.bf16 %v5901_v29, %v5900_v33  ;;  %v5857_v14 = vld [vmem:[%s10663_s12 + $0x438] sm:$0xff]  ;;  %v5908_v31 = vld [vmem:[%s10663_s12 + $0x5d0] sm:$0xff] }
 0x733   :  { %8105 = vmatpush3.bf16.msra.mxu0 %v8104_v1  ;;  %v5852_v1 = vld [vmem:[%s10663_s12 + $0x410] sm:$0xff]  ;;  %v8160_v44 = vpack.c.bf16 %v5857_v14, %v5856_v13  ;;  %v5877_v34 = vld [vmem:[%s10663_s12 + $0x4d8] sm:$0xff]  ;;  %v5930_v13 = vld [vmem:[%s10663_s12 + $0x680] sm:$0xff] }
 0x734   :  { %8137 = vmatpush3.bf16.msra.mxu1 %v8136_v2  ;;  %8107 = vmatprep.subr.bf16.mxu0 %v8106_v37  ;;  %v5884_v2 = vld [vmem:[%s10663_s12 + $0x510] sm:$0xff]  ;;  %v5712_v37 = vmax.f32 %v5418_v63, 0.0  ;;  %v8152_v49 = vpack.c.bf16 %v5853_v61, %v5852_v1  ;;  %v5858_v63 = vld [vmem:[%s10663_s12 + $0x440] sm:$0xff]  ;;  %v5861_v1 = vld [vmem:[%s10663_s12 + $0x458] sm:$0xff] }
 0x735   :  { %8139 = vmatprep.subr.bf16.mxu1 %v8138_v7  ;;  %v5715_v7 = vmax.f32 %v5491_v30, 0.0  ;;  %v8184_v51 = vpack.c.bf16 %v5885_v39, %v5884_v2  ;;  %v5891_v30 = vld [vmem:[%s10663_s12 + $0x548] sm:$0xff]  ;;  %v5892_v61 = vld [vmem:[%s10663_s12 + $0x550] sm:$0xff]  ;;  %v5865_v8 = vld [vmem:[%s10663_s12 + $0x478] sm:$0xff] }
 0x736   :  { %v8196_v29 = vpack.c.bf16 %v5891_v30, %v5890_v59  ;;  %v5879_v39 = vld [vmem:[%s10663_s12 + $0x4e8] sm:$0xff]  ;;  %v5864_v5 = vld [vmem:[%s10663_s12 + $0x470] sm:$0xff]  ;;  %v5714_v30 = vmax.f32 %v10147_v22, 0.0  ;;  %v5949_v22 = vld [vmem:[%s10663_s12 + $0x718] sm:$0xff] }
 0x737   :  { %v5630_v20 = vpop.f32.mrb[66].mxu0  ;;  %v5701_v43 = vpop.f32.mrb[66].mxu1  ;;  %8109 = vmatpush3.bf16.msra.mxu0 %v8108_v53  ;;  %v5854_v53 = vld [vmem:[%s10663_s12 + $0x420] sm:$0xff]  ;;  %v5931_v14 = vld [vmem:[%s10663_s12 + $0x688] sm:$0xff] }
 0x738   :  { %v10231_v23 = vadd.f32 %v5630_v20, %v5106_v52  ;;  %v10233_v57 = vadd.f32 %v5701_v43, %v5114_v62  ;;  %v10235_v25 = vpop.f32.mrb[67].mxu0  ;;  %v10237_v15 = vpop.f32.mrb[67].mxu1  ;;  %8141 = vmatpush3.bf16.msra.mxu1 %v8140_v0  ;;  %8111 = vmatprep.subr.bf16.mxu0 %v8110_v4  ;;  %v8154_v52 = vpack.c.bf16 %v5871_v45, %v5870_v40  ;;  %v5887_v62 = vld [vmem:[%s10663_s12 + $0x528] sm:$0xff]  ;;  %v5872_v0 = vld [vmem:[%s10663_s12 + $0x4b0] sm:$0xff]  ;;  %v5873_v4 = vld [vmem:[%s10663_s12 + $0x4b8] sm:$0xff] }
 0x739   :  { %8143 = vmatprep.subr.bf16.mxu1 %v8142_v19  ;;  %v8156_v11 = vpack.c.bf16 %v5855_v54, %v5854_v53  ;;  %v8188_v9 = vpack.c.bf16 %v5887_v62, %v5886_v56  ;;  %v8158_v19 = vpack.c.bf16 %v5873_v4, %v5872_v0  ;;  %v5889_v20 = vld [vmem:[%s10663_s12 + $0x538] sm:$0xff]  ;;  %v5874_v43 = vld [vmem:[%s10663_s12 + $0x4c0] sm:$0xff]  ;;  %v5911_v45 = vld [vmem:[%s10663_s12 + $0x5e8] sm:$0xff] }
 0x73a   :  { %v8192_v6 = vpack.c.bf16 %v5889_v20, %v5888_v17  ;;  %v5910_v40 = vld [vmem:[%s10663_s12 + $0x5e0] sm:$0xff]  ;;  %v5880_v53 = vld [vmem:[%s10663_s12 + $0x4f0] sm:$0xff]  ;;  %v5881_v54 = vld [vmem:[%s10663_s12 + $0x4f8] sm:$0xff]  ;;  %v5110_v17 = vrot.slane %v10100_v60, %v5077_v10 }
 0x73b   :  { %8113 = vmatpush3.bf16.msra.mxu0 %v8112_v21  ;;  %v5875_v21 = vld [vmem:[%s10663_s12 + $0x4c8] sm:$0xff]  ;;  %v5912_v56 = vld [vmem:[%s10663_s12 + $0x5f0] sm:$0xff]  ;;  %v8174_v4 = vpack.c.bf16 %v5881_v54, %v5880_v53  ;;  %v5914_v10 = vld [vmem:[%s10663_s12 + $0x600] sm:$0xff] }
 0x73c   :  { %8145 = vmatpush3.bf16.msra.mxu1 %v8144_v41  ;;  %8147 = vmatprep.subr.bf16.mxu0 %v8146_v42  ;;  %v5906_v41 = vld [vmem:[%s10663_s12 + $0x5c0] sm:$0xff]  ;;  %v5907_v42 = vld [vmem:[%s10663_s12 + $0x5c8] sm:$0xff]  ;;  %v8162_v26 = vpack.c.bf16 %v5875_v21, %v5874_v43  ;;  %v5118_v43 = vrot.slane %v10100_v60, %v5085_v16  ;;  %v8176_v21 = vpack.c.bf16 %v5865_v8, %v5864_v5 }
 0x73d   :  { %8179 = vmatprep.subr.bf16.mxu1 %v8178_v27  ;;  %v5859_v27 = vld [vmem:[%s10663_s12 + $0x448] sm:$0xff]  ;;  %v8194_v28 = vpack.c.bf16 %v5907_v42, %v5906_v41  ;;  %v8210_v42 = vpack.c.bf16 %v5931_v14, %v5930_v13  ;;  %v5633_v60 = vadd.f32 %v10235_v25, %v5110_v17  ;;  %v5965_v25 = vld [vmem:[%s10663_s12 + $0x798] sm:$0xff]  ;;  %v5938_v5 = vld [vmem:[%s10663_s12 + $0x6c0] sm:$0xff] }
 0x73e   :  { %6190 = vmatmul.mubr.f32.vlgmr.msra.gmra.mrb[70].mxu0 %v5710_v35  ;;  %v8164_v33 = vpack.c.bf16 %v5859_v27, %v5858_v63  ;;  %v8166_v35 = vpack.c.bf16 %v5877_v34, %v5876_v3  ;;  %v5963_v20 = vld [vmem:[%s10663_s12 + $0x788] sm:$0xff]  ;;  %v5933_v63 = vld [vmem:[%s10663_s12 + $0x698] sm:$0xff]  ;;  %v5704_v27 = vadd.f32 %v10237_v15, %v5118_v43  ;;  %v5916_v34 = vld [vmem:[%s10663_s12 + $0x610] sm:$0xff] }
 0x73f   :  { %6260 = vmatmul.mubr.f32.vlgmr.msra.gmra.mrb[70].mxu1 %v5712_v37  ;;  %8149 = vmatpush3.bf16.msra.mxu0 %v8148_v32  ;;  %v5909_v32 = vld [vmem:[%s10663_s12 + $0x5d8] sm:$0xff]  ;;  %v5947_v16 = vld [vmem:[%s10663_s12 + $0x708] sm:$0xff]  ;;  %v5922_v17 = vld [vmem:[%s10663_s12 + $0x640] sm:$0xff] }
 0x740   :  { %6329 = vmatprep.mubr.f32.mxu0 %v5715_v7  ;;  %8181 = vmatpush3.bf16.msra.mxu1 %v8180_v36  ;;  %v5860_v36 = vld [vmem:[%s10663_s12 + $0x450] sm:$0xff]  ;;  %v8198_v2 = vpack.c.bf16 %v5909_v32, %v5908_v31  ;;  %v5893_v37 = vld [vmem:[%s10663_s12 + $0x558] sm:$0xff]  ;;  %v8244_v3 = vpack.c.bf16 %v5947_v16, %v5946_v12  ;;  %v5716_v32 = vmax.f32 %v10149_v24, 0.0  ;;  %v5966_v24 = vld [vmem:[%s10663_s12 + $0x7a0] sm:$0xff] }
 0x741   :  { %6399 = vmatprep.mubr.f32.mxu1 %v5717_v47  ;;  %8151 = vmatprep.subr.bf16.mxu0 %v8150_v38  ;;  %v5878_v38 = vld [vmem:[%s10663_s12 + $0x4e0] sm:$0xff]  ;;  %v8168_v7 = vpack.c.bf16 %v5861_v1, %v5860_v36  ;;  %v5863_v47 = vld [vmem:[%s10663_s12 + $0x468] sm:$0xff]  ;;  %v5917_v15 = vld [vmem:[%s10663_s12 + $0x618] sm:$0xff]  ;;  %v5719_v36 = vmax.f32 %v5633_v60, 0.0 }
 0x742   :  { %8183 = vmatprep.subr.bf16.mxu1 %v8182_v46  ;;  %v8200_v46 = vpack.c.bf16 %v5893_v37, %v5892_v61  ;;  %v8170_v48 = vpack.c.bf16 %v5879_v39, %v5878_v38  ;;  %v8172_v62 = vpack.c.bf16 %v5863_v47, %v5862_v50  ;;  %v5948_v31 = vld [vmem:[%s10663_s12 + $0x710] sm:$0xff]  ;;  %v5967_v61 = vld [vmem:[%s10663_s12 + $0x7a8] sm:$0xff]  ;;  %v8216_v37 = vpack.c.bf16 %v5917_v15, %v5916_v34  ;;  %v5937_v47 = vld [vmem:[%s10663_s12 + $0x6b8] sm:$0xff] }
 0x743   :  { %8153 = vmatpush3.bf16.msra.mxu0 %v8152_v49  ;;  %v5894_v49 = vld [vmem:[%s10663_s12 + $0x560] sm:$0xff]  ;;  %v8248_v38 = vpack.c.bf16 %v5949_v22, %v5948_v31  ;;  %v5936_v50 = vld [vmem:[%s10663_s12 + $0x6b0] sm:$0xff]  ;;  %v5939_v8 = vld [vmem:[%s10663_s12 + $0x6c8] sm:$0xff] }
 0x744   :  { %8185 = vmatpush3.bf16.msra.mxu1 %v8184_v51  ;;  %8155 = vmatprep.subr.bf16.mxu0 %v8154_v52  ;;  %v8202_v51 = vpack.c.bf16 %v5911_v45, %v5910_v40  ;;  %v5895_v52 = vld [vmem:[%s10663_s12 + $0x568] sm:$0xff]  ;;  %v5918_v40 = vld [vmem:[%s10663_s12 + $0x620] sm:$0xff]  ;;  %v8222_v54 = vpack.c.bf16 %v5937_v47, %v5936_v50  ;;  %v8226_v14 = vpack.c.bf16 %v5939_v8, %v5938_v5  ;;  %v5924_v60 = vld [vmem:[%s10663_s12 + $0x650] sm:$0xff]  ;;  %v5718_v47 = vmax.f32 %v10231_v23, 0.0 }
 0x745   :  { %8187 = vmatprep.subr.bf16.mxu1 %v8186_v58  ;;  %v5913_v58 = vld [vmem:[%s10663_s12 + $0x5f8] sm:$0xff]  ;;  %v8204_v0 = vpack.c.bf16 %v5895_v52, %v5894_v49  ;;  %v5919_v45 = vld [vmem:[%s10663_s12 + $0x628] sm:$0xff]  ;;  %v5968_v49 = vld [vmem:[%s10663_s12 + $0x7b0] sm:$0xff] }
 0x746   :  { %v8220_v52 = vpack.c.bf16 %v5919_v45, %v5918_v40  ;;  %v5958_v22 = vld [vmem:[%s10663_s12 + $0x760] sm:$0xff]  ;;  %v5929_v40 = vld [vmem:[%s10663_s12 + $0x678] sm:$0xff] }
 0x747   :  { %8157 = vmatpush3.bf16.msra.mxu0 %v8156_v11  ;;  %v5896_v11 = vld [vmem:[%s10663_s12 + $0x570] sm:$0xff] }
 0x748   :  { %8189 = vmatpush3.bf16.msra.mxu1 %v8188_v9  ;;  %8159 = vmatprep.subr.bf16.mxu0 %v8158_v19  ;;  %v8206_v9 = vpack.c.bf16 %v5913_v58, %v5912_v56  ;;  %v5897_v19 = vld [vmem:[%s10663_s12 + $0x578] sm:$0xff]  ;;  %v5920_v56 = vld [vmem:[%s10663_s12 + $0x630] sm:$0xff] }
 0x749   :  { %8191 = vmatprep.subr.bf16.mxu1 %v8190_v18  ;;  %v5962_v18 = vld [vmem:[%s10663_s12 + $0x780] sm:$0xff]  ;;  %v8208_v41 = vpack.c.bf16 %v5897_v19, %v5896_v11  ;;  %v5921_v58 = vld [vmem:[%s10663_s12 + $0x638] sm:$0xff] }
 0x74a   :  { %v5970_v11 = vld [vmem:[%s10663_s12 + $0x7c0] sm:$0xff]  ;;  %v8224_v19 = vpack.c.bf16 %v5921_v58, %v5920_v56 }
 0x74b   :  { %8161 = vmatpush3.bf16.msra.mxu0 %v8160_v44  ;;  %v5915_v44 = vld [vmem:[%s10663_s12 + $0x608] sm:$0xff] }
 0x74c   :  { %8193 = vmatpush3.bf16.msra.mxu1 %v8192_v6  ;;  %8163 = vmatprep.subr.bf16.mxu0 %v8162_v26  ;;  %v8242_v6 = vpack.c.bf16 %v5963_v20, %v5962_v18  ;;  %v5932_v26 = vld [vmem:[%s10663_s12 + $0x690] sm:$0xff]  ;;  %v8212_v59 = vpack.c.bf16 %v5915_v44, %v5914_v10  ;;  %v5923_v18 = vld [vmem:[%s10663_s12 + $0x648] sm:$0xff]  ;;  %v5954_v20 = vld [vmem:[%s10663_s12 + $0x740] sm:$0xff] }
 0x74d   :  { %8195 = vmatprep.subr.bf16.mxu1 %v8194_v28  ;;  %v5964_v28 = vld [vmem:[%s10663_s12 + $0x790] sm:$0xff]  ;;  %v5973_v44 = vld [vmem:[%s10663_s12 + $0x7d8] sm:$0xff] }
 0x74e   :  { %v8246_v1 = vpack.c.bf16 %v5965_v25, %v5964_v28  ;;  %v5972_v10 = vld [vmem:[%s10663_s12 + $0x7d0] sm:$0xff]  ;;  %v5942_v28 = vld [vmem:[%s10663_s12 + $0x6e0] sm:$0xff]  ;;  %v5943_v25 = vld [vmem:[%s10663_s12 + $0x6e8] sm:$0xff] }
 0x74f   :  { %8165 = vmatpush3.bf16.msra.mxu0 %v8164_v33  ;;  %v8214_v33 = vpack.c.bf16 %v5933_v63, %v5932_v26  ;;  %v5925_v26 = vld [vmem:[%s10663_s12 + $0x658] sm:$0xff]  ;;  %v5956_v63 = vld [vmem:[%s10663_s12 + $0x750] sm:$0xff]  ;;  %v8234_v31 = vpack.c.bf16 %v5943_v25, %v5942_v28 }
 0x750   :  { %8197 = vmatpush3.bf16.msra.mxu1 %v8196_v29  ;;  %8167 = vmatprep.subr.bf16.mxu0 %v8166_v35  ;;  %v5934_v29 = vld [vmem:[%s10663_s12 + $0x6a0] sm:$0xff]  ;;  %v5935_v35 = vld [vmem:[%s10663_s12 + $0x6a8] sm:$0xff]  ;;  %v8232_v34 = vpack.c.bf16 %v5925_v26, %v5924_v60 }
 0x751   :  { %8199 = vmatprep.subr.bf16.mxu1 %v8198_v2  ;;  %v5721_v2 = vmax.f32 %v5704_v27, 0.0  ;;  %v8218_v39 = vpack.c.bf16 %v5935_v35, %v5934_v29  ;;  %v8262_v27 = vpack.c.bf16 %v5973_v44, %v5972_v10  ;;  %v5959_v35 = vld [vmem:[%s10663_s12 + $0x768] sm:$0xff] }
 0x753   :  { %8169 = vmatpush3.bf16.msra.mxu0 %v8168_v7  ;;  %v5950_v7 = vld [vmem:[%s10663_s12 + $0x720] sm:$0xff] }
 0x754   :  { %8201 = vmatpush3.bf16.msra.mxu1 %v8200_v46  ;;  %8171 = vmatprep.subr.bf16.mxu0 %v8170_v48  ;;  %v8250_v46 = vpack.c.bf16 %v5967_v61, %v5966_v24  ;;  %v5951_v48 = vld [vmem:[%s10663_s12 + $0x728] sm:$0xff]  ;;  %v5976_v24 = vld [vmem:[%s10663_s12 + $0x7f0] sm:$0xff]  ;;  %v5977_v61 = vld [vmem:[%s10663_s12 + $0x7f8] sm:$0xff] }
 0x755   :  { %8203 = vmatprep.subr.bf16.mxu1 %v8202_v51  ;;  %v5969_v51 = vld [vmem:[%s10663_s12 + $0x7b8] sm:$0xff]  ;;  %v8252_v53 = vpack.c.bf16 %v5951_v48, %v5950_v7  ;;  %v8270_v45 = vpack.c.bf16 %v5977_v61, %v5976_v24  ;;  %v5960_v7 = vld [vmem:[%s10663_s12 + $0x770] sm:$0xff] }
 0x757   :  { %8173 = vmatpush3.bf16.msra.mxu0 %v8172_v62  ;;  %v5952_v62 = vld [vmem:[%s10663_s12 + $0x730] sm:$0xff] }
 0x758   :  { %8205 = vmatpush3.bf16.msra.mxu1 %v8204_v0  ;;  %8175 = vmatprep.subr.bf16.mxu0 %v8174_v4  ;;  %v8254_v0 = vpack.c.bf16 %v5969_v51, %v5968_v49  ;;  %v5953_v4 = vld [vmem:[%s10663_s12 + $0x738] sm:$0xff]  ;;  %v5720_v49 = vmax.f32 %v10233_v57, 0.0 }
 0x759   :  { %8207 = vmatprep.subr.bf16.mxu1 %v8206_v9  ;;  %v5971_v9 = vld [vmem:[%s10663_s12 + $0x7c8] sm:$0xff]  ;;  %v8256_v13 = vpack.c.bf16 %v5953_v4, %v5952_v62 }
 0x75a   :  { %v8258_v43 = vpack.c.bf16 %v5971_v9, %v5970_v11 }
 0x75b   :  { %8177 = vmatpush3.bf16.msra.mxu0 %v8176_v21  ;;  %v5955_v21 = vld [vmem:[%s10663_s12 + $0x748] sm:$0xff] }
 0x75c   :  { %8209 = vmatpush3.bf16.msra.mxu1 %v8208_v41  ;;  %8211 = vmatprep.subr.bf16.mxu0 %v8210_v42  ;;  %v5940_v41 = vld [vmem:[%s10663_s12 + $0x6d0] sm:$0xff]  ;;  %v5941_v42 = vld [vmem:[%s10663_s12 + $0x6d8] sm:$0xff]  ;;  %v8260_v12 = vpack.c.bf16 %v5955_v21, %v5954_v20 }
 0x75d   :  { %8243 = vmatprep.subr.bf16.mxu1 %v8242_v6  ;;  %v8228_v6 = vpack.c.bf16 %v5923_v18, %v5922_v17  ;;  %v8230_v16 = vpack.c.bf16 %v5941_v42, %v5940_v41 }
 0x75e   :  { %6330 = vmatmul.mubr.f32.vlgmr.msra.gmra.mrb[72].mxu0 %v5714_v30  ;;  %v5974_v30 = vld [vmem:[%s10663_s12 + $0x7e0] sm:$0xff] }
 0x75f   :  { %6400 = vmatmul.mubr.f32.vlgmr.msra.gmra.mrb[72].mxu1 %v5716_v32  ;;  %8213 = vmatpush3.bf16.msra.mxu0 %v8212_v59  ;;  %v5957_v59 = vld [vmem:[%s10663_s12 + $0x758] sm:$0xff]  ;;  %v5926_v32 = vld [vmem:[%s10663_s12 + $0x660] sm:$0xff] }
 0x760   :  { %6469 = vmatprep.mubr.f32.mxu0 %v5719_v36  ;;  %8245 = vmatpush3.bf16.msra.mxu1 %v8244_v3  ;;  %v5975_v3 = vld [vmem:[%s10663_s12 + $0x7e8] sm:$0xff]  ;;  %v8264_v15 = vpack.c.bf16 %v5957_v59, %v5956_v63  ;;  %v5944_v36 = vld [vmem:[%s10663_s12 + $0x6f0] sm:$0xff] }
 0x761   :  { %6539 = vmatprep.mubr.f32.mxu1 %v5721_v2  ;;  %8215 = vmatprep.subr.bf16.mxu0 %v8214_v33  ;;  %v5927_v33 = vld [vmem:[%s10663_s12 + $0x668] sm:$0xff]  ;;  %v8266_v29 = vpack.c.bf16 %v5975_v3, %v5974_v30 }
 0x762   :  { %8247 = vmatprep.subr.bf16.mxu1 %v8246_v1  ;;  %v5945_v1 = vld [vmem:[%s10663_s12 + $0x6f8] sm:$0xff]  ;;  %v8236_v2 = vpack.c.bf16 %v5927_v33, %v5926_v32 }
 0x763   :  { %8217 = vmatpush3.bf16.msra.mxu0 %v8216_v37  ;;  %v8268_v37 = vpack.c.bf16 %v5959_v35, %v5958_v22  ;;  %v6712_v22 = vld [vmem:[%s10659_s8] ss:$0 sm:$0xff] }
 0x764   :  { %8249 = vmatpush3.bf16.msra.mxu1 %v8248_v38  ;;  %8219 = vmatprep.subr.bf16.mxu0 %v8218_v39  ;;  %v8238_v38 = vpack.c.bf16 %v5945_v1, %v5944_v36  ;;  %v5928_v39 = vld [vmem:[%s10663_s12 + $0x670] sm:$0xff] }
 0x765   :  { %8251 = vmatprep.subr.bf16.mxu1 %v8250_v46  ;;  %v5961_v46 = vld [vmem:[%s10663_s12 + $0x778] sm:$0xff]  ;;  %v8240_v48 = vpack.c.bf16 %v5929_v40, %v5928_v39 }
 0x766   :  { %v8272_v50 = vpack.c.bf16 %v5961_v46, %v5960_v7 }
 0x767   :  { %8221 = vmatpush3.bf16.msra.mxu0 %v8220_v52 }
 0x768   :  { %8253 = vmatpush3.bf16.msra.mxu1 %v8252_v53  ;;  %8223 = vmatprep.subr.bf16.mxu0 %v8222_v54  ;;  %v6711_v53 = vld [vmem:[%s10664_s13] ss:$0 sm:$0xff] }
 0x769   :  { %8255 = vmatprep.subr.bf16.mxu1 %v8254_v0 }
 0x76b   :  { %8225 = vmatpush3.bf16.msra.mxu0 %v8224_v19 }
 0x76c   :  { %8257 = vmatpush3.bf16.msra.mxu1 %v8256_v13  ;;  %8227 = vmatprep.subr.bf16.mxu0 %v8226_v14 }
 0x76d   :  { %8259 = vmatprep.subr.bf16.mxu1 %v8258_v43 }
 0x76f   :  { %8229 = vmatpush3.bf16.msra.mxu0 %v8228_v6 }
 0x770   :  { %8261 = vmatpush3.bf16.msra.mxu1 %v8260_v12  ;;  %8231 = vmatprep.subr.bf16.mxu0 %v8230_v16 }
 0x771   :  { %8263 = vmatprep.subr.bf16.mxu1 %v8262_v27 }
 0x773   :  { %8233 = vmatpush3.bf16.msra.mxu0 %v8232_v34 }
 0x774   :  { %8265 = vmatpush3.bf16.msra.mxu1 %v8264_v15  ;;  %8235 = vmatprep.subr.bf16.mxu0 %v8234_v31 }
 0x775   :  { %8267 = vmatprep.subr.bf16.mxu1 %v8266_v29  ;;  %v6713_v29 = vld [vmem:[%s10660_s9] ss:$0 sm:$0xff] }
 0x777   :  { %8237 = vmatpush3.bf16.msra.mxu0 %v8236_v2 }
 0x778   :  { %8269 = vmatpush3.bf16.msra.mxu1 %v8268_v37  ;;  %8239 = vmatprep.subr.bf16.mxu0 %v8238_v38 }
 0x779   :  { %8271 = vmatprep.subr.bf16.mxu1 %v8270_v45 }
 0x77b   :  { %8241 = vmatpush3.bf16.msra.mxu0 %v8240_v48 }
 0x77c   :  { %8273 = vmatpush3.bf16.msra.mxu1 %v8272_v50 }
 0x77e   :  { %6470 = vmatmul.mubr.f32.vlgmr.msra.gmra.mrb[74].mxu0 %v5718_v47 }
 0x77f   :  { %6540 = vmatmul.mubr.f32.vlgmr.msra.gmra.mrb[74].mxu1 %v5720_v49 }
 0x7f1   :  { %v6986_v51 = vpop.f32.mrb[68].mxu0  ;;  %v7021_v52 = vpop.f32.mrb[68].mxu1 }
 0x7f2   :  { %v6987_v54 = vpop.f32.mrb[69].mxu0  ;;  %v7022_v56 = vpop.f32.mrb[69].mxu1 }
 0x7f3   :  { %v6988_v58 = vadd.f32 %v6987_v54, %v6986_v51  ;;  %v7023_v62 = vadd.f32 %v7022_v56, %v7021_v52 }
 0x7f5   :  { %v6052_v0 = vadd.f32 %v6988_v58, %v6711_v53 }
 0x7f7   :  { %v6122_v4 = vadd.f32 %v7023_v62, %v6052_v0 }
 0x811   :  { %v7056_v5 = vpop.f32.mrb[70].mxu0 }
 0x812   :  { %v7091_v8 = vpop.f32.mrb[70].mxu1  ;;  %v7057_v23 = vpop.f32.mrb[71].mxu0 }
 0x813   :  { %v7058_v11 = vadd.f32 %v7057_v23, %v7056_v5  ;;  %v7092_v9 = vpop.f32.mrb[71].mxu1 }
 0x814   :  { %v7093_v57 = vadd.f32 %v7092_v9, %v7091_v8 }
 0x815   :  { %v6192_v19 = vadd.f32 %v7058_v11, %v6122_v4 }
 0x817   :  { %v6262_v13 = vadd.f32 %v7093_v57, %v6192_v19 }
 0x831   :  { %v7126_v14 = vpop.f32.mrb[72].mxu0 }
 0x832   :  { %v7161_v17 = vpop.f32.mrb[72].mxu1  ;;  %v7127_v18 = vpop.f32.mrb[73].mxu0 }
 0x833   :  { %v7128_v20 = vadd.f32 %v7127_v18, %v7126_v14  ;;  %v7162_v43 = vpop.f32.mrb[73].mxu1 }
 0x834   :  { %v7163_v21 = vadd.f32 %v7162_v43, %v7161_v17 }
 0x835   :  { %v6332_v41 = vadd.f32 %v7128_v20, %v6262_v13 }
 0x837   :  { %v6402_v42 = vadd.f32 %v7163_v21, %v6332_v41 }
 0x851   :  { %v7196_v10 = vpop.f32.mrb[74].mxu0 }
 0x852   :  { %v7231_v44 = vpop.f32.mrb[74].mxu1  ;;  %v7197_v6 = vpop.f32.mrb[75].mxu0 }
 0x853   :  { %v7198_v12 = vadd.f32 %v7197_v6, %v7196_v10  ;;  %v7232_v16 = vpop.f32.mrb[75].mxu1 }
 0x854   :  { %v7233_v60 = vadd.f32 %v7232_v16, %v7231_v44 }
 0x855   :  { %v6472_v26 = vadd.f32 %v7198_v12, %v6402_v42 }
 0x857   :  { %v6542_v63 = vadd.f32 %v7233_v60, %v6472_v26 }
 0x859   :  { %v6545_v27 = vadd.f32 %v6542_v63, %v9605_v55 }
 0x85b   :  { %v6548_v59 = vsel %vm411_vm1, %v6545_v27, 0.0 }
 0x85c   :  { %6549 = vadd.xlane.f32.xlu0 %v6548_v59 }
 0x8e9   :  { %v6550_v28 = vpop.xlane.xlu0 %6549 }
 0x8ea   :  { %v6551_v25 = vmul.f32 0.025, %v6550_v28 }
 0x8ec   :  { %v6552_v30 = vsub.f32 %v6545_v27, %v6551_v25 }
 0x8ee   :  { %v6553_v3 = vmul.f32 %v6552_v30, %v6552_v30 }
 0x8f0   :  { %v6554_v34 = vsel %vm411_vm1, %v6553_v3, 0.0 }
 0x8f1   :  { %6555 = vadd.xlane.f32.xlu1 %v6554_v34 }
 0x97e   :  { %v6556_v15 = vpop.xlane.xlu1 %6555 }
 0x97f   :  { %v6557_v31 = vmul.f32 0.025, %v6556_v15 }
 0x981   :  { %v6558_v32 = vadd.f32 1e-05, %v6557_v31 }
 0x983   :  { %8320 = vrsqrt.f32 %v6558_v32 }
 0x98d   :  { %v8321_v33 = vpop.eup %8320 }
 0x98e   :  { %v6560_v55 = vmul.f32 %v8321_v33, %v6552_v30 }
 0x990   :  { %v6567_v35 = vmul.f32 %v6712_v22, %v6560_v55 }
 0x992   :  { %v6574_v36 = vadd.f32 %v6713_v29, %v6567_v35 }
 0x994   :  { %6575 = vst.msk [vmem:[#allocation2] sm:$0xff] %vm411_vm1, %v6574_v36 }
 0x995   :  { %8333 = shalt.err (!%p8330_p4)
}
 0x996   :  { %s8334_s23 = scalar_lea.hbm %s10665_s14, 128 }
 0x997   :  { %p8335_p5 = scmp.ne.s32.totalorder %s10665_s14, %s8334_s23  ;;  %p8338_p6 = scmp.lt.u32.totalorder %s8334_s23, %s10665_s14 }
 0x999   :  { %p8340_p7 = pnand %p8338_p6, %p8335_p5 }
 0x99b   :  { %8343 = shalt.err (!%p8340_p7)
}
 0x99c   :  { %6585 = dma.vmem_to_hbm [thread:$0]  %s6583_s22, 128, %s10665_s14, [#allocation3]  }
 0x99d   :  { %8344 = dma.done.wait [#allocation3], 128  }
 0x99e   :  { %8345 = vsyncadd [#allocation3], 4294967168 }
 0x99f   :  { %6589 = vsyncpa [#allocation3], 1 }

</bundles_post_ra>
